<compile_context>
chip_gen: v5e
topology: v5e:2x2
jax: 0.10.0
libtpu: 0.0.40
codegen_flags: <defaults>
</compile_context>

<pallas_src>
import math

import jax
import jax.numpy as jnp
from jax.experimental import pallas as pl
from jax.experimental.pallas import tpu as pltpu

# ---------------- model config (small, synthetic) ----------------
B = 2            # batch
C = 3            # input channels
IMG = 16         # image H = W
PATCH = 4        # patch size
HIDDEN = 32      # transformer hidden dim
HEADS = 2        # attention heads
HEAD_DIM = HIDDEN // HEADS
LAYERS = 2       # encoder blocks
MLP = 64         # MLP hidden dim
REPR = 1000      # torchvision ViT backbone output (ImageNet classes)
NUM_CLASSES = 10 # ViT.linear output
N_TOK = (IMG // PATCH) ** 2      # 16 patches
SEQ = N_TOK + 1                  # + class token = 17
SEQ_PAD = 24                     # padded to a multiple of 8 (sublane-aligned)
ROWS = B * SEQ_PAD               # batch folded into rows = 48
PATCH_K = C * PATCH * PATCH      # 48
LN_EPS = 1e-6
NEG_BIG = -1e30                  # softmax mask for padded key columns


# ---------------- in-kernel helpers (pure jnp, traced into the kernel) -------
def _layernorm(x, g, b, eps=LN_EPS):
    mean = jnp.mean(x, axis=-1, keepdims=True)
    xc = x - mean
    var = jnp.mean(xc * xc, axis=-1, keepdims=True)
    return xc * jax.lax.rsqrt(var + eps) * g + b


def _erf(x):
    # TODO(synk): exact lax.erf lowering is not guaranteed in Mosaic; use the
    # Abramowitz & Stegun 7.1.26 rational approximation (max abs err ~1.5e-7).
    a = jnp.abs(x)
    t = 1.0 / (1.0 + 0.3275911 * a)
    poly = ((((1.061405429 * t - 1.453152027) * t + 1.421413741) * t
             - 0.284496736) * t + 0.254829592) * t
    e = 1.0 - poly * jnp.exp(-a * a)
    return jnp.where(x < 0.0, -e, e)


def _gelu(x):
    # torch nn.GELU() default = exact erf GELU
    return 0.5 * x * (1.0 + _erf(x * (1.0 / math.sqrt(2.0))))


# ---------------- the single fused kernel ------------------------------------
def _vit_kernel(patches_ref, pw_ref, add_ref,
                ln1g_ref, ln1b_ref, wqkv_ref, bqkv_ref, wo_ref, bo_ref,
                ln2g_ref, ln2b_ref, w1_ref, b1_ref, w2_ref, b2_ref,
                lnfg_ref, lnfb_ref, hw_ref, hb_ref, o_ref):
    # ---- fused patch embed + cls token + positional embedding ----
    # patches rows: [cls(zero), 16 patches, 7 zero-pad] x B ; embed_add folds
    # cls/pos/conv-bias into one additive table (zeros on pad rows).
    x = (jnp.dot(patches_ref[...], pw_ref[...],
                 preferred_element_type=jnp.float32) + add_ref[...])   # [ROWS, HIDDEN]

    # key-column mask for padded sequence slots (shared by all layers/heads)
    col = jax.lax.broadcasted_iota(jnp.int32, (SEQ_PAD, SEQ_PAD), 1)
    kmask = jnp.where(col < SEQ, 0.0, NEG_BIG).astype(jnp.float32)

    for l in range(LAYERS):                      # static unroll (LAYERS=2)
        # --- attention sub-block: LN1 -> fused QKV -> per-(batch,head) softmax
        #     -> concatenated out-projection -> residual ---
        h = _layernorm(x, ln1g_ref[l], ln1b_ref[l])
        # attention scale is pre-folded into the Q columns of wqkv/bqkv
        qkv = (jnp.dot(h, wqkv_ref[l], preferred_element_type=jnp.float32)
               + bqkv_ref[l])                     # [ROWS, 3*HIDDEN]
        batch_out = []
        for b in range(B):                        # block-diagonal attention
            r0 = b * SEQ_PAD
            per_head = []
            for hd in range(HEADS):               # static unroll (HEADS=2)
                c0 = hd * HEAD_DIM
                q = qkv[r0:r0 + SEQ_PAD, c0:c0 + HEAD_DIM]
                k = qkv[r0:r0 + SEQ_PAD, HIDDEN + c0:HIDDEN + c0 + HEAD_DIM]
                v = qkv[r0:r0 + SEQ_PAD, 2 * HIDDEN + c0:2 * HIDDEN + c0 + HEAD_DIM]
                s = jax.lax.dot_general(q, k, (((1,), (1,)), ((), ())),
                                        preferred_element_type=jnp.float32)
                s = s + kmask                      # mask padded key columns
                m = jnp.max(s, axis=-1, keepdims=True)
                p = jnp.exp(s - m)
                p = p * pl.reciprocal(jnp.sum(p, axis=-1, keepdims=True),
                                      approx=True)
                per_head.append(jnp.dot(p, v, preferred_element_type=jnp.float32))
            batch_out.append(jnp.concatenate(per_head, axis=-1))   # [SEQ_PAD, HIDDEN]
        attn = jnp.concatenate(batch_out, axis=0)                   # [ROWS, HIDDEN]
        x = x + (jnp.dot(attn, wo_ref[l], preferred_element_type=jnp.float32)
                 + bo_ref[l])

        # --- MLP sub-block: LN2 -> w1 -> GELU -> w2 -> residual ---
        h2 = _layernorm(x, ln2g_ref[l], ln2b_ref[l])
        h2 = jnp.dot(h2, w1_ref[l], preferred_element_type=jnp.float32) + b1_ref[l]
        h2 = _gelu(h2)
        x = x + (jnp.dot(h2, w2_ref[l], preferred_element_type=jnp.float32)
                 + b2_ref[l])

    # ---- final LN on cls rows only + folded 32->10 head ----
    cls = jnp.concatenate([x[b * SEQ_PAD:b * SEQ_PAD + 1, :] for b in range(B)],
                          axis=0)                                    # [B, HIDDEN]
    cls = _layernorm(cls, lnfg_ref[...], lnfb_ref[...])
    o_ref[...] = (jnp.dot(cls, hw_ref[...], preferred_element_type=jnp.float32)
                  + hb_ref[...])


def vit_fused(patches, pp):
    s2 = lambda s: pl.BlockSpec(s, lambda i: (0, 0))
    s3 = lambda s: pl.BlockSpec(s, lambda i: (0, 0, 0))
    return pl.pallas_call(
        _vit_kernel,
        out_shape=jax.ShapeDtypeStruct((B, NUM_CLASSES), jnp.float32),
        grid=(1,),
        in_specs=[
            s2((ROWS, PATCH_K)),                 # patches (flat, padded)
            s2((PATCH_K, HIDDEN)),               # patch-embed weight
            s2((ROWS, HIDDEN)),                  # cls/pos/conv-bias add table
            s3((LAYERS, 1, HIDDEN)), s3((LAYERS, 1, HIDDEN)),          # ln1 g,b
            s3((LAYERS, HIDDEN, 3 * HIDDEN)), s3((LAYERS, 1, 3 * HIDDEN)),  # qkv
            s3((LAYERS, HIDDEN, HIDDEN)), s3((LAYERS, 1, HIDDEN)),     # out proj
            s3((LAYERS, 1, HIDDEN)), s3((LAYERS, 1, HIDDEN)),          # ln2 g,b
            s3((LAYERS, HIDDEN, MLP)), s3((LAYERS, 1, MLP)),           # mlp w1,b1
            s3((LAYERS, MLP, HIDDEN)), s3((LAYERS, 1, HIDDEN)),        # mlp w2,b2
            s2((1, HIDDEN)), s2((1, HIDDEN)),                          # final ln
            s2((HIDDEN, NUM_CLASSES)), s2((1, NUM_CLASSES)),           # folded head
        ],
        out_specs=pl.BlockSpec((B, NUM_CLASSES), lambda i: (0, 0)),
        compiler_params=pltpu.CompilerParams(dimension_semantics=("arbitrary",)),
    )(patches, pp["patch_w"], pp["embed_add"],
      pp["ln1_g"], pp["ln1_b"], pp["wqkv"], pp["bqkv"], pp["wo"], pp["bo"],
      pp["ln2_g"], pp["ln2_b"], pp["w1"], pp["b1"], pp["w2"], pp["b2"],
      pp["ln_f_g"], pp["ln_f_b"], pp["head_w"], pp["head_b"])


# ---------------- deterministic parameter init (unchanged module spec) -------
def init_params(key):
    keys = iter(jax.random.split(key, 128))

    def nrm(shape, scale=0.02):
        return scale * jax.random.normal(next(keys), shape, dtype=jnp.float32)

    p = {
        "conv_w": nrm((HIDDEN, C, PATCH, PATCH)),
        "conv_b": nrm((HIDDEN,)),
        "cls": nrm((1, 1, HIDDEN)),
        "pos": nrm((1, SEQ, HIDDEN)),
        "layers": [],
        "ln_f_g": jnp.ones((HIDDEN,), jnp.float32),
        "ln_f_b": jnp.zeros((HIDDEN,), jnp.float32),
        "head_w": nrm((HIDDEN, REPR)),     # backbone head: Linear(HIDDEN, 1000)
        "head_b": nrm((REPR,)),
        "fc_w": nrm((REPR, NUM_CLASSES)),  # ViT.linear: Linear(1000, num_classes)
        "fc_b": nrm((NUM_CLASSES,)),
    }
    for _ in range(LAYERS):
        p["layers"].append({
            "ln1_g": jnp.ones((HIDDEN,), jnp.float32),
            "ln1_b": jnp.zeros((HIDDEN,), jnp.float32),
            "wq": nrm((HIDDEN, HIDDEN)), "bq": nrm((HIDDEN,)),
            "wk": nrm((HIDDEN, HIDDEN)), "bk": nrm((HIDDEN,)),
            "wv": nrm((HIDDEN, HIDDEN)), "bv": nrm((HIDDEN,)),
            "wo": nrm((HIDDEN, HIDDEN)), "bo": nrm((HIDDEN,)),
            "ln2_g": jnp.ones((HIDDEN,), jnp.float32),
            "ln2_b": jnp.zeros((HIDDEN,), jnp.float32),
            "w1": nrm((HIDDEN, MLP)), "b1": nrm((MLP,)),
            "w2": nrm((MLP, HIDDEN)), "b2": nrm((HIDDEN,)),
        })
    return p


# ---------------- one-time weight repacking (outside the jitted forward) -----
def pack_params(p):
    scale = 1.0 / math.sqrt(HEAD_DIM)        # power of two -> exact fold into Q
    cls2 = p["cls"].reshape(1, HIDDEN)
    pos2 = p["pos"].reshape(SEQ, HIDDEN)
    # per-batch additive table: row 0 = cls + pos[0], rows 1..16 = conv_b + pos,
    # rows 17..23 = zeros (padding); tiled across the folded batch dimension.
    add_one = jnp.concatenate(
        [cls2 + pos2[0:1],
         pos2[1:] + p["conv_b"][None, :],
         jnp.zeros((SEQ_PAD - SEQ, HIDDEN), jnp.float32)], axis=0)
    packed = {
        "patch_w": p["conv_w"].reshape(HIDDEN, PATCH_K).T,           # [48, 32]
        "embed_add": jnp.tile(add_one, (B, 1)),                      # [48, 32]
        "ln_f_g": p["ln_f_g"].reshape(1, HIDDEN),
        "ln_f_b": p["ln_f_b"].reshape(1, HIDDEN),
        # fold Linear(32->1000) . Linear(1000->10): exact (no nonlinearity)
        "head_w": p["head_w"] @ p["fc_w"],                           # [32, 10]
        "head_b": (p["head_b"] @ p["fc_w"] + p["fc_b"]).reshape(1, NUM_CLASSES),
    }

    def stack(fn):
        return jnp.stack([fn(lp) for lp in p["layers"]], axis=0)

    packed.update({
        "ln1_g": stack(lambda lp: lp["ln1_g"].reshape(1, HIDDEN)),
        "ln1_b": stack(lambda lp: lp["ln1_b"].reshape(1, HIDDEN)),
        # fused QKV weight: [wq*scale | wk | wv], heads contiguous within each block
        "wqkv": stack(lambda lp: jnp.concatenate(
            [lp["wq"] * scale, lp["wk"], lp["wv"]], axis=1)),        # [32, 96]
        "bqkv": stack(lambda lp: jnp.concatenate(
            [lp["bq"] * scale, lp["bk"], lp["bv"]], axis=0).reshape(1, 3 * HIDDEN)),
        "wo": stack(lambda lp: lp["wo"]),
        "bo": stack(lambda lp: lp["bo"].reshape(1, HIDDEN)),
        "ln2_g": stack(lambda lp: lp["ln2_g"].reshape(1, HIDDEN)),
        "ln2_b": stack(lambda lp: lp["ln2_b"].reshape(1, HIDDEN)),
        "w1": stack(lambda lp: lp["w1"]),
        "b1": stack(lambda lp: lp["b1"].reshape(1, MLP)),
        "w2": stack(lambda lp: lp["w2"]),
        "b2": stack(lambda lp: lp["b2"].reshape(1, HIDDEN)),
    })
    return packed


# ---------------- forward pass ----------------
def vit_forward(pp, x):
    # x: [B, C, H, W] (NCHW, PyTorch convention). Patch extraction / padding is
    # pure layout glue and stays in XLA; everything else is one Pallas kernel.
    Bn, Cn, H, W = x.shape
    nH, nW = H // PATCH, W // PATCH
    patches = x.reshape(Bn, Cn, nH, PATCH, nW, PATCH)
    patches = patches.transpose(0, 2, 4, 1, 3, 5).reshape(Bn, nH * nW, PATCH_K)
    # 1 zero row in front (cls slot) + zero rows at the back (SEQ padding)
    patches = jnp.pad(patches, ((0, 0), (1, SEQ_PAD - SEQ), (0, 0)))
    patches = patches.reshape(Bn * SEQ_PAD, PATCH_K)                 # [48, 48]
    return vit_fused(patches, pp)                                    # [B, 10]


if __name__ == "__main__":
    key = jax.random.PRNGKey(0)
    kx, kp = jax.random.split(key)
    x = jax.random.normal(kx, (B, C, IMG, IMG), dtype=jnp.float32)
    params = init_params(kp)
    packed = pack_params(params)          # one-time repack / head folding

    out = jax.jit(vit_forward)(packed, x)
    jax.block_until_ready(out)
    assert out.shape == (B, NUM_CLASSES), out.shape
    assert bool(jnp.all(jnp.isfinite(out)))
    print("KERNEL_OK")
</pallas_src>

<mosaic_0001>
module attributes {stable_mosaic.version = 11 : i64} {
  func.func @_vit_kernel(%arg0: i32, %arg1: memref<48x48xf32, #tpu.memory_space<vmem>>, %arg2: memref<48x32xf32, #tpu.memory_space<vmem>>, %arg3: memref<48x32xf32, #tpu.memory_space<vmem>>, %arg4: memref<2x1x32xf32, #tpu.memory_space<vmem>>, %arg5: memref<2x1x32xf32, #tpu.memory_space<vmem>>, %arg6: memref<2x32x96xf32, #tpu.memory_space<vmem>>, %arg7: memref<2x1x96xf32, #tpu.memory_space<vmem>>, %arg8: memref<2x32x32xf32, #tpu.memory_space<vmem>>, %arg9: memref<2x1x32xf32, #tpu.memory_space<vmem>>, %arg10: memref<2x1x32xf32, #tpu.memory_space<vmem>>, %arg11: memref<2x1x32xf32, #tpu.memory_space<vmem>>, %arg12: memref<2x32x64xf32, #tpu.memory_space<vmem>>, %arg13: memref<2x1x64xf32, #tpu.memory_space<vmem>>, %arg14: memref<2x64x32xf32, #tpu.memory_space<vmem>>, %arg15: memref<2x1x32xf32, #tpu.memory_space<vmem>>, %arg16: memref<1x32xf32, #tpu.memory_space<vmem>>, %arg17: memref<1x32xf32, #tpu.memory_space<vmem>>, %arg18: memref<32x10xf32, #tpu.memory_space<vmem>>, %arg19: memref<1x10xf32, #tpu.memory_space<vmem>>, %arg20: memref<2x10xf32, #tpu.memory_space<vmem>>) attributes {dimension_semantics = [#tpu.dimension_semantics<arbitrary>], iteration_bounds = array<i64: 1>, scalar_prefetch = 0 : i64, scratch_operands = 0 : i64, tpu.core_type = #tpu.core_type<tc>, window_params = [{pipeline_mode = #tpu.pipeline_mode<synchronous>, transform_indices = @transform_0, window_bounds = array<i64: 48, 48>}, {pipeline_mode = #tpu.pipeline_mode<synchronous>, transform_indices = @transform_1, window_bounds = array<i64: 48, 32>}, {pipeline_mode = #tpu.pipeline_mode<synchronous>, transform_indices = @transform_2, window_bounds = array<i64: 48, 32>}, {pipeline_mode = #tpu.pipeline_mode<synchronous>, transform_indices = @transform_3, window_bounds = array<i64: 2, 1, 32>}, {pipeline_mode = #tpu.pipeline_mode<synchronous>, transform_indices = @transform_4, window_bounds = array<i64: 2, 1, 32>}, {pipeline_mode = #tpu.pipeline_mode<synchronous>, transform_indices = @transform_5, window_bounds = array<i64: 2, 32, 96>}, {pipeline_mode = #tpu.pipeline_mode<synchronous>, transform_indices = @transform_6, window_bounds = array<i64: 2, 1, 96>}, {pipeline_mode = #tpu.pipeline_mode<synchronous>, transform_indices = @transform_7, window_bounds = array<i64: 2, 32, 32>}, {pipeline_mode = #tpu.pipeline_mode<synchronous>, transform_indices = @transform_8, window_bounds = array<i64: 2, 1, 32>}, {pipeline_mode = #tpu.pipeline_mode<synchronous>, transform_indices = @transform_9, window_bounds = array<i64: 2, 1, 32>}, {pipeline_mode = #tpu.pipeline_mode<synchronous>, transform_indices = @transform_10, window_bounds = array<i64: 2, 1, 32>}, {pipeline_mode = #tpu.pipeline_mode<synchronous>, transform_indices = @transform_11, window_bounds = array<i64: 2, 32, 64>}, {pipeline_mode = #tpu.pipeline_mode<synchronous>, transform_indices = @transform_12, window_bounds = array<i64: 2, 1, 64>}, {pipeline_mode = #tpu.pipeline_mode<synchronous>, transform_indices = @transform_13, window_bounds = array<i64: 2, 64, 32>}, {pipeline_mode = #tpu.pipeline_mode<synchronous>, transform_indices = @transform_14, window_bounds = array<i64: 2, 1, 32>}, {pipeline_mode = #tpu.pipeline_mode<synchronous>, transform_indices = @transform_15, window_bounds = array<i64: 1, 32>}, {pipeline_mode = #tpu.pipeline_mode<synchronous>, transform_indices = @transform_16, window_bounds = array<i64: 1, 32>}, {pipeline_mode = #tpu.pipeline_mode<synchronous>, transform_indices = @transform_17, window_bounds = array<i64: 32, 10>}, {pipeline_mode = #tpu.pipeline_mode<synchronous>, transform_indices = @transform_18, window_bounds = array<i64: 1, 10>}, {pipeline_mode = #tpu.pipeline_mode<synchronous>, transform_indices = @transform_19, window_bounds = array<i64: 2, 10>}]} {
    %c0 = arith.constant 0 : index
    %c0_0 = arith.constant 0 : index
    %0 = vector.load %arg1[%c0, %c0_0] : memref<48x48xf32, #tpu.memory_space<vmem>>, vector<48x48xf32>
    %c0_1 = arith.constant 0 : index
    %c0_2 = arith.constant 0 : index
    %1 = vector.load %arg2[%c0_1, %c0_2] : memref<48x32xf32, #tpu.memory_space<vmem>>, vector<48x32xf32>
    %cst = arith.constant dense<0.000000e+00> : vector<48x32xf32>
    %2 = tpu.matmul %0, %1, %cst {dimension_numbers = #tpu.dot_dimension_numbers<[1], [0], [0], [1], [0, 0, 1, 1], [], []>} : vector<48x48xf32>, vector<48x32xf32>, vector<48x32xf32> -> vector<48x32xf32>
    %c0_3 = arith.constant 0 : index
    %c0_4 = arith.constant 0 : index
    %3 = vector.load %arg3[%c0_3, %c0_4] : memref<48x32xf32, #tpu.memory_space<vmem>>, vector<48x32xf32>
    %4 = arith.addf %2, %3 : vector<48x32xf32>
    %5 = tpu.iota {dimensions = array<i32: 1>} : vector<24x24xi32>
    %c17_i32 = arith.constant 17 : i32
    %6 = vector.broadcast %c17_i32 : i32 to vector<24x24xi32>
    %7 = arith.cmpi slt, %5, %6 : vector<24x24xi32>
    %cst_5 = arith.constant 0.000000e+00 : f32
    %cst_6 = arith.constant -1.000000e+30 : f32
    %8 = vector.broadcast %cst_5 : f32 to vector<24x24xf32>
    %9 = vector.broadcast %cst_6 : f32 to vector<24x24xf32>
    %10 = arith.select %7, %8, %9 : vector<24x24xi1>, vector<24x24xf32>
    %c0_7 = arith.constant 0 : index
    %c0_8 = arith.constant 0 : index
    %c0_9 = arith.constant 0 : index
    %11 = vector.load %arg4[%c0_7, %c0_8, %c0_9] : memref<2x1x32xf32, #tpu.memory_space<vmem>>, vector<1x1x32xf32>
    %12 = vector.shape_cast %11 : vector<1x1x32xf32> to vector<1x32xf32>
    %c0_10 = arith.constant 0 : index
    %c0_11 = arith.constant 0 : index
    %c0_12 = arith.constant 0 : index
    %13 = vector.load %arg5[%c0_10, %c0_11, %c0_12] : memref<2x1x32xf32, #tpu.memory_space<vmem>>, vector<1x1x32xf32>
    %14 = vector.shape_cast %13 : vector<1x1x32xf32> to vector<1x32xf32>
    %cst_13 = arith.constant dense<0.000000e+00> : vector<48xf32>
    %15 = vector.multi_reduction <add>, %4, %cst_13 [1] : vector<48x32xf32> to vector<48xf32>
    %16 = vector.shape_cast %15 : vector<48xf32> to vector<48x1xf32>
    %cst_14 = arith.constant 3.200000e+01 : f32
    %17 = vector.broadcast %cst_14 : f32 to vector<48x1xf32>
    %18 = arith.divf %16, %17 : vector<48x1xf32>
    %19 = vector.broadcast %18 : vector<48x1xf32> to vector<48x32xf32>
    %20 = arith.subf %4, %19 : vector<48x32xf32>
    %21 = arith.mulf %20, %20 : vector<48x32xf32>
    %cst_15 = arith.constant dense<0.000000e+00> : vector<48xf32>
    %22 = vector.multi_reduction <add>, %21, %cst_15 [1] : vector<48x32xf32> to vector<48xf32>
    %23 = vector.shape_cast %22 : vector<48xf32> to vector<48x1xf32>
    %cst_16 = arith.constant 3.200000e+01 : f32
    %24 = vector.broadcast %cst_16 : f32 to vector<48x1xf32>
    %25 = arith.divf %23, %24 : vector<48x1xf32>
    %cst_17 = arith.constant 9.99999997E-7 : f32
    %26 = vector.broadcast %cst_17 : f32 to vector<48x1xf32>
    %27 = arith.addf %25, %26 : vector<48x1xf32>
    %28 = math.rsqrt %27 : vector<48x1xf32>
    %29 = vector.broadcast %28 : vector<48x1xf32> to vector<48x32xf32>
    %30 = arith.mulf %20, %29 : vector<48x32xf32>
    %31 = vector.broadcast %12 : vector<1x32xf32> to vector<48x32xf32>
    %32 = arith.mulf %30, %31 : vector<48x32xf32>
    %33 = vector.broadcast %14 : vector<1x32xf32> to vector<48x32xf32>
    %34 = arith.addf %32, %33 : vector<48x32xf32>
    %c0_18 = arith.constant 0 : index
    %c0_19 = arith.constant 0 : index
    %c0_20 = arith.constant 0 : index
    %35 = vector.load %arg6[%c0_18, %c0_19, %c0_20] : memref<2x32x96xf32, #tpu.memory_space<vmem>>, vector<1x32x96xf32>
    %36 = vector.shape_cast %35 : vector<1x32x96xf32> to vector<32x96xf32>
    %cst_21 = arith.constant dense<0.000000e+00> : vector<48x96xf32>
    %37 = tpu.matmul %34, %36, %cst_21 {dimension_numbers = #tpu.dot_dimension_numbers<[1], [0], [0], [1], [0, 0, 1, 1], [], []>} : vector<48x32xf32>, vector<32x96xf32>, vector<48x96xf32> -> vector<48x96xf32>
    %c0_22 = arith.constant 0 : index
    %c0_23 = arith.constant 0 : index
    %c0_24 = arith.constant 0 : index
    %38 = vector.load %arg7[%c0_22, %c0_23, %c0_24] : memref<2x1x96xf32, #tpu.memory_space<vmem>>, vector<1x1x96xf32>
    %39 = vector.shape_cast %38 : vector<1x1x96xf32> to vector<1x96xf32>
    %40 = vector.broadcast %39 : vector<1x96xf32> to vector<48x96xf32>
    %41 = arith.addf %37, %40 : vector<48x96xf32>
    %42 = vector.extract_strided_slice %41 {offsets = [0, 0], sizes = [24, 16], strides = [1, 1]} : vector<48x96xf32> to vector<24x16xf32>
    %43 = vector.extract_strided_slice %41 {offsets = [0, 32], sizes = [24, 16], strides = [1, 1]} : vector<48x96xf32> to vector<24x16xf32>
    %44 = vector.extract_strided_slice %41 {offsets = [0, 64], sizes = [24, 16], strides = [1, 1]} : vector<48x96xf32> to vector<24x16xf32>
    %cst_25 = arith.constant dense<0.000000e+00> : vector<24x24xf32>
    %45 = tpu.matmul %42, %43, %cst_25 {dimension_numbers = #tpu.dot_dimension_numbers<[1], [1], [0], [0], [0, 0, 1, 0], [], []>} : vector<24x16xf32>, vector<24x16xf32>, vector<24x24xf32> -> vector<24x24xf32>
    %46 = arith.addf %45, %10 : vector<24x24xf32>
    %cst_26 = arith.constant dense<0xFF800000> : vector<24xf32>
    %47 = vector.multi_reduction <maximumf>, %46, %cst_26 [1] : vector<24x24xf32> to vector<24xf32>
    %48 = vector.shape_cast %47 : vector<24xf32> to vector<24x1xf32>
    %49 = vector.broadcast %48 : vector<24x1xf32> to vector<24x24xf32>
    %50 = arith.subf %46, %49 : vector<24x24xf32>
    %51 = math.exp %50 : vector<24x24xf32>
    %cst_27 = arith.constant dense<0.000000e+00> : vector<24xf32>
    %52 = vector.multi_reduction <add>, %51, %cst_27 [1] : vector<24x24xf32> to vector<24xf32>
    %53 = vector.shape_cast %52 : vector<24xf32> to vector<24x1xf32>
    %54 = tpu.reciprocal %53 {approx = true} : vector<24x1xf32> -> vector<24x1xf32>
    %55 = vector.broadcast %54 : vector<24x1xf32> to vector<24x24xf32>
    %56 = arith.mulf %51, %55 : vector<24x24xf32>
    %cst_28 = arith.constant dense<0.000000e+00> : vector<24x16xf32>
    %57 = tpu.matmul %56, %44, %cst_28 {dimension_numbers = #tpu.dot_dimension_numbers<[1], [0], [0], [1], [0, 0, 1, 1], [], []>} : vector<24x24xf32>, vector<24x16xf32>, vector<24x16xf32> -> vector<24x16xf32>
    %58 = vector.extract_strided_slice %41 {offsets = [0, 16], sizes = [24, 16], strides = [1, 1]} : vector<48x96xf32> to vector<24x16xf32>
    %59 = vector.extract_strided_slice %41 {offsets = [0, 48], sizes = [24, 16], strides = [1, 1]} : vector<48x96xf32> to vector<24x16xf32>
    %60 = vector.extract_strided_slice %41 {offsets = [0, 80], sizes = [24, 16], strides = [1, 1]} : vector<48x96xf32> to vector<24x16xf32>
    %cst_29 = arith.constant dense<0.000000e+00> : vector<24x24xf32>
    %61 = tpu.matmul %58, %59, %cst_29 {dimension_numbers = #tpu.dot_dimension_numbers<[1], [1], [0], [0], [0, 0, 1, 0], [], []>} : vector<24x16xf32>, vector<24x16xf32>, vector<24x24xf32> -> vector<24x24xf32>
    %62 = arith.addf %61, %10 : vector<24x24xf32>
    %cst_30 = arith.constant dense<0xFF800000> : vector<24xf32>
    %63 = vector.multi_reduction <maximumf>, %62, %cst_30 [1] : vector<24x24xf32> to vector<24xf32>
    %64 = vector.shape_cast %63 : vector<24xf32> to vector<24x1xf32>
    %65 = vector.broadcast %64 : vector<24x1xf32> to vector<24x24xf32>
    %66 = arith.subf %62, %65 : vector<24x24xf32>
    %67 = math.exp %66 : vector<24x24xf32>
    %cst_31 = arith.constant dense<0.000000e+00> : vector<24xf32>
    %68 = vector.multi_reduction <add>, %67, %cst_31 [1] : vector<24x24xf32> to vector<24xf32>
    %69 = vector.shape_cast %68 : vector<24xf32> to vector<24x1xf32>
    %70 = tpu.reciprocal %69 {approx = true} : vector<24x1xf32> -> vector<24x1xf32>
    %71 = vector.broadcast %70 : vector<24x1xf32> to vector<24x24xf32>
    %72 = arith.mulf %67, %71 : vector<24x24xf32>
    %cst_32 = arith.constant dense<0.000000e+00> : vector<24x16xf32>
    %73 = tpu.matmul %72, %60, %cst_32 {dimension_numbers = #tpu.dot_dimension_numbers<[1], [0], [0], [1], [0, 0, 1, 1], [], []>} : vector<24x24xf32>, vector<24x16xf32>, vector<24x16xf32> -> vector<24x16xf32>
    %74 = tpu.concatenate %57, %73 in 1 : vector<24x16xf32>, vector<24x16xf32> -> vector<24x32xf32>
    %75 = vector.extract_strided_slice %41 {offsets = [24, 0], sizes = [24, 16], strides = [1, 1]} : vector<48x96xf32> to vector<24x16xf32>
    %76 = vector.extract_strided_slice %41 {offsets = [24, 32], sizes = [24, 16], strides = [1, 1]} : vector<48x96xf32> to vector<24x16xf32>
    %77 = vector.extract_strided_slice %41 {offsets = [24, 64], sizes = [24, 16], strides = [1, 1]} : vector<48x96xf32> to vector<24x16xf32>
    %cst_33 = arith.constant dense<0.000000e+00> : vector<24x24xf32>
    %78 = tpu.matmul %75, %76, %cst_33 {dimension_numbers = #tpu.dot_dimension_numbers<[1], [1], [0], [0], [0, 0, 1, 0], [], []>} : vector<24x16xf32>, vector<24x16xf32>, vector<24x24xf32> -> vector<24x24xf32>
    %79 = arith.addf %78, %10 : vector<24x24xf32>
    %cst_34 = arith.constant dense<0xFF800000> : vector<24xf32>
    %80 = vector.multi_reduction <maximumf>, %79, %cst_34 [1] : vector<24x24xf32> to vector<24xf32>
    %81 = vector.shape_cast %80 : vector<24xf32> to vector<24x1xf32>
    %82 = vector.broadcast %81 : vector<24x1xf32> to vector<24x24xf32>
    %83 = arith.subf %79, %82 : vector<24x24xf32>
    %84 = math.exp %83 : vector<24x24xf32>
    %cst_35 = arith.constant dense<0.000000e+00> : vector<24xf32>
    %85 = vector.multi_reduction <add>, %84, %cst_35 [1] : vector<24x24xf32> to vector<24xf32>
    %86 = vector.shape_cast %85 : vector<24xf32> to vector<24x1xf32>
    %87 = tpu.reciprocal %86 {approx = true} : vector<24x1xf32> -> vector<24x1xf32>
    %88 = vector.broadcast %87 : vector<24x1xf32> to vector<24x24xf32>
    %89 = arith.mulf %84, %88 : vector<24x24xf32>
    %cst_36 = arith.constant dense<0.000000e+00> : vector<24x16xf32>
    %90 = tpu.matmul %89, %77, %cst_36 {dimension_numbers = #tpu.dot_dimension_numbers<[1], [0], [0], [1], [0, 0, 1, 1], [], []>} : vector<24x24xf32>, vector<24x16xf32>, vector<24x16xf32> -> vector<24x16xf32>
    %91 = vector.extract_strided_slice %41 {offsets = [24, 16], sizes = [24, 16], strides = [1, 1]} : vector<48x96xf32> to vector<24x16xf32>
    %92 = vector.extract_strided_slice %41 {offsets = [24, 48], sizes = [24, 16], strides = [1, 1]} : vector<48x96xf32> to vector<24x16xf32>
    %93 = vector.extract_strided_slice %41 {offsets = [24, 80], sizes = [24, 16], strides = [1, 1]} : vector<48x96xf32> to vector<24x16xf32>
    %cst_37 = arith.constant dense<0.000000e+00> : vector<24x24xf32>
    %94 = tpu.matmul %91, %92, %cst_37 {dimension_numbers = #tpu.dot_dimension_numbers<[1], [1], [0], [0], [0, 0, 1, 0], [], []>} : vector<24x16xf32>, vector<24x16xf32>, vector<24x24xf32> -> vector<24x24xf32>
    %95 = arith.addf %94, %10 : vector<24x24xf32>
    %cst_38 = arith.constant dense<0xFF800000> : vector<24xf32>
    %96 = vector.multi_reduction <maximumf>, %95, %cst_38 [1] : vector<24x24xf32> to vector<24xf32>
    %97 = vector.shape_cast %96 : vector<24xf32> to vector<24x1xf32>
    %98 = vector.broadcast %97 : vector<24x1xf32> to vector<24x24xf32>
    %99 = arith.subf %95, %98 : vector<24x24xf32>
    %100 = math.exp %99 : vector<24x24xf32>
    %cst_39 = arith.constant dense<0.000000e+00> : vector<24xf32>
    %101 = vector.multi_reduction <add>, %100, %cst_39 [1] : vector<24x24xf32> to vector<24xf32>
    %102 = vector.shape_cast %101 : vector<24xf32> to vector<24x1xf32>
    %103 = tpu.reciprocal %102 {approx = true} : vector<24x1xf32> -> vector<24x1xf32>
    %104 = vector.broadcast %103 : vector<24x1xf32> to vector<24x24xf32>
    %105 = arith.mulf %100, %104 : vector<24x24xf32>
    %cst_40 = arith.constant dense<0.000000e+00> : vector<24x16xf32>
    %106 = tpu.matmul %105, %93, %cst_40 {dimension_numbers = #tpu.dot_dimension_numbers<[1], [0], [0], [1], [0, 0, 1, 1], [], []>} : vector<24x24xf32>, vector<24x16xf32>, vector<24x16xf32> -> vector<24x16xf32>
    %107 = tpu.concatenate %90, %106 in 1 : vector<24x16xf32>, vector<24x16xf32> -> vector<24x32xf32>
    %108 = tpu.concatenate %74, %107 in 0 : vector<24x32xf32>, vector<24x32xf32> -> vector<48x32xf32>
    %c0_41 = arith.constant 0 : index
    %c0_42 = arith.constant 0 : index
    %c0_43 = arith.constant 0 : index
    %109 = vector.load %arg8[%c0_41, %c0_42, %c0_43] : memref<2x32x32xf32, #tpu.memory_space<vmem>>, vector<1x32x32xf32>
    %110 = vector.shape_cast %109 : vector<1x32x32xf32> to vector<32x32xf32>
    %cst_44 = arith.constant dense<0.000000e+00> : vector<48x32xf32>
    %111 = tpu.matmul %108, %110, %cst_44 {dimension_numbers = #tpu.dot_dimension_numbers<[1], [0], [0], [1], [0, 0, 1, 1], [], []>} : vector<48x32xf32>, vector<32x32xf32>, vector<48x32xf32> -> vector<48x32xf32>
    %c0_45 = arith.constant 0 : index
    %c0_46 = arith.constant 0 : index
    %c0_47 = arith.constant 0 : index
    %112 = vector.load %arg9[%c0_45, %c0_46, %c0_47] : memref<2x1x32xf32, #tpu.memory_space<vmem>>, vector<1x1x32xf32>
    %113 = vector.shape_cast %112 : vector<1x1x32xf32> to vector<1x32xf32>
    %114 = vector.broadcast %113 : vector<1x32xf32> to vector<48x32xf32>
    %115 = arith.addf %111, %114 : vector<48x32xf32>
    %116 = arith.addf %4, %115 : vector<48x32xf32>
    %c0_48 = arith.constant 0 : index
    %c0_49 = arith.constant 0 : index
    %c0_50 = arith.constant 0 : index
    %117 = vector.load %arg10[%c0_48, %c0_49, %c0_50] : memref<2x1x32xf32, #tpu.memory_space<vmem>>, vector<1x1x32xf32>
    %118 = vector.shape_cast %117 : vector<1x1x32xf32> to vector<1x32xf32>
    %c0_51 = arith.constant 0 : index
    %c0_52 = arith.constant 0 : index
    %c0_53 = arith.constant 0 : index
    %119 = vector.load %arg11[%c0_51, %c0_52, %c0_53] : memref<2x1x32xf32, #tpu.memory_space<vmem>>, vector<1x1x32xf32>
    %120 = vector.shape_cast %119 : vector<1x1x32xf32> to vector<1x32xf32>
    %cst_54 = arith.constant dense<0.000000e+00> : vector<48xf32>
    %121 = vector.multi_reduction <add>, %116, %cst_54 [1] : vector<48x32xf32> to vector<48xf32>
    %122 = vector.shape_cast %121 : vector<48xf32> to vector<48x1xf32>
    %cst_55 = arith.constant 3.200000e+01 : f32
    %123 = vector.broadcast %cst_55 : f32 to vector<48x1xf32>
    %124 = arith.divf %122, %123 : vector<48x1xf32>
    %125 = vector.broadcast %124 : vector<48x1xf32> to vector<48x32xf32>
    %126 = arith.subf %116, %125 : vector<48x32xf32>
    %127 = arith.mulf %126, %126 : vector<48x32xf32>
    %cst_56 = arith.constant dense<0.000000e+00> : vector<48xf32>
    %128 = vector.multi_reduction <add>, %127, %cst_56 [1] : vector<48x32xf32> to vector<48xf32>
    %129 = vector.shape_cast %128 : vector<48xf32> to vector<48x1xf32>
    %cst_57 = arith.constant 3.200000e+01 : f32
    %130 = vector.broadcast %cst_57 : f32 to vector<48x1xf32>
    %131 = arith.divf %129, %130 : vector<48x1xf32>
    %cst_58 = arith.constant 9.99999997E-7 : f32
    %132 = vector.broadcast %cst_58 : f32 to vector<48x1xf32>
    %133 = arith.addf %131, %132 : vector<48x1xf32>
    %134 = math.rsqrt %133 : vector<48x1xf32>
    %135 = vector.broadcast %134 : vector<48x1xf32> to vector<48x32xf32>
    %136 = arith.mulf %126, %135 : vector<48x32xf32>
    %137 = vector.broadcast %118 : vector<1x32xf32> to vector<48x32xf32>
    %138 = arith.mulf %136, %137 : vector<48x32xf32>
    %139 = vector.broadcast %120 : vector<1x32xf32> to vector<48x32xf32>
    %140 = arith.addf %138, %139 : vector<48x32xf32>
    %c0_59 = arith.constant 0 : index
    %c0_60 = arith.constant 0 : index
    %c0_61 = arith.constant 0 : index
    %141 = vector.load %arg12[%c0_59, %c0_60, %c0_61] : memref<2x32x64xf32, #tpu.memory_space<vmem>>, vector<1x32x64xf32>
    %142 = vector.shape_cast %141 : vector<1x32x64xf32> to vector<32x64xf32>
    %cst_62 = arith.constant dense<0.000000e+00> : vector<48x64xf32>
    %143 = tpu.matmul %140, %142, %cst_62 {dimension_numbers = #tpu.dot_dimension_numbers<[1], [0], [0], [1], [0, 0, 1, 1], [], []>} : vector<48x32xf32>, vector<32x64xf32>, vector<48x64xf32> -> vector<48x64xf32>
    %c0_63 = arith.constant 0 : index
    %c0_64 = arith.constant 0 : index
    %c0_65 = arith.constant 0 : index
    %144 = vector.load %arg13[%c0_63, %c0_64, %c0_65] : memref<2x1x64xf32, #tpu.memory_space<vmem>>, vector<1x1x64xf32>
    %145 = vector.shape_cast %144 : vector<1x1x64xf32> to vector<1x64xf32>
    %146 = vector.broadcast %145 : vector<1x64xf32> to vector<48x64xf32>
    %147 = arith.addf %143, %146 : vector<48x64xf32>
    %cst_66 = arith.constant 5.000000e-01 : f32
    %148 = vector.broadcast %cst_66 : f32 to vector<48x64xf32>
    %149 = arith.mulf %148, %147 : vector<48x64xf32>
    %cst_67 = arith.constant 0.707106769 : f32
    %150 = vector.broadcast %cst_67 : f32 to vector<48x64xf32>
    %151 = arith.mulf %147, %150 : vector<48x64xf32>
    %152 = math.absf %151 : vector<48x64xf32>
    %cst_68 = arith.constant 0.327591091 : f32
    %153 = vector.broadcast %cst_68 : f32 to vector<48x64xf32>
    %154 = arith.mulf %153, %152 : vector<48x64xf32>
    %cst_69 = arith.constant 1.000000e+00 : f32
    %155 = vector.broadcast %cst_69 : f32 to vector<48x64xf32>
    %156 = arith.addf %155, %154 : vector<48x64xf32>
    %cst_70 = arith.constant 1.000000e+00 : f32
    %157 = vector.broadcast %cst_70 : f32 to vector<48x64xf32>
    %158 = arith.divf %157, %156 : vector<48x64xf32>
    %cst_71 = arith.constant 1.06140542 : f32
    %159 = vector.broadcast %cst_71 : f32 to vector<48x64xf32>
    %160 = arith.mulf %159, %158 : vector<48x64xf32>
    %cst_72 = arith.constant 1.45315206 : f32
    %161 = vector.broadcast %cst_72 : f32 to vector<48x64xf32>
    %162 = arith.subf %160, %161 : vector<48x64xf32>
    %163 = arith.mulf %162, %158 : vector<48x64xf32>
    %cst_73 = arith.constant 1.42141378 : f32
    %164 = vector.broadcast %cst_73 : f32 to vector<48x64xf32>
    %165 = arith.addf %163, %164 : vector<48x64xf32>
    %166 = arith.mulf %165, %158 : vector<48x64xf32>
    %cst_74 = arith.constant 0.284496725 : f32
    %167 = vector.broadcast %cst_74 : f32 to vector<48x64xf32>
    %168 = arith.subf %166, %167 : vector<48x64xf32>
    %169 = arith.mulf %168, %158 : vector<48x64xf32>
    %cst_75 = arith.constant 0.254829586 : f32
    %170 = vector.broadcast %cst_75 : f32 to vector<48x64xf32>
    %171 = arith.addf %169, %170 : vector<48x64xf32>
    %172 = arith.mulf %171, %158 : vector<48x64xf32>
    %cst_76 = arith.constant 0.000000e+00 : f32
    %173 = vector.broadcast %cst_76 : f32 to vector<48x64xf32>
    %174 = arith.subf %173, %152 : vector<48x64xf32>
    %175 = arith.mulf %174, %152 : vector<48x64xf32>
    %176 = math.exp %175 : vector<48x64xf32>
    %177 = arith.mulf %172, %176 : vector<48x64xf32>
    %cst_77 = arith.constant 1.000000e+00 : f32
    %178 = vector.broadcast %cst_77 : f32 to vector<48x64xf32>
    %179 = arith.subf %178, %177 : vector<48x64xf32>
    %cst_78 = arith.constant 0.000000e+00 : f32
    %180 = vector.broadcast %cst_78 : f32 to vector<48x64xf32>
    %181 = arith.cmpf olt, %151, %180 : vector<48x64xf32>
    %cst_79 = arith.constant 0.000000e+00 : f32
    %182 = vector.broadcast %cst_79 : f32 to vector<48x64xf32>
    %183 = arith.subf %182, %179 : vector<48x64xf32>
    %184 = arith.select %181, %183, %179 : vector<48x64xi1>, vector<48x64xf32>
    %cst_80 = arith.constant 1.000000e+00 : f32
    %185 = vector.broadcast %cst_80 : f32 to vector<48x64xf32>
    %186 = arith.addf %185, %184 : vector<48x64xf32>
    %187 = arith.mulf %149, %186 : vector<48x64xf32>
    %c0_81 = arith.constant 0 : index
    %c0_82 = arith.constant 0 : index
    %c0_83 = arith.constant 0 : index
    %188 = vector.load %arg14[%c0_81, %c0_82, %c0_83] : memref<2x64x32xf32, #tpu.memory_space<vmem>>, vector<1x64x32xf32>
    %189 = vector.shape_cast %188 : vector<1x64x32xf32> to vector<64x32xf32>
    %cst_84 = arith.constant dense<0.000000e+00> : vector<48x32xf32>
    %190 = tpu.matmul %187, %189, %cst_84 {dimension_numbers = #tpu.dot_dimension_numbers<[1], [0], [0], [1], [0, 0, 1, 1], [], []>} : vector<48x64xf32>, vector<64x32xf32>, vector<48x32xf32> -> vector<48x32xf32>
    %c0_85 = arith.constant 0 : index
    %c0_86 = arith.constant 0 : index
    %c0_87 = arith.constant 0 : index
    %191 = vector.load %arg15[%c0_85, %c0_86, %c0_87] : memref<2x1x32xf32, #tpu.memory_space<vmem>>, vector<1x1x32xf32>
    %192 = vector.shape_cast %191 : vector<1x1x32xf32> to vector<1x32xf32>
    %193 = vector.broadcast %192 : vector<1x32xf32> to vector<48x32xf32>
    %194 = arith.addf %190, %193 : vector<48x32xf32>
    %195 = arith.addf %116, %194 : vector<48x32xf32>
    %c1 = arith.constant 1 : index
    %c0_88 = arith.constant 0 : index
    %c0_89 = arith.constant 0 : index
    %196 = vector.load %arg4[%c1, %c0_88, %c0_89] : memref<2x1x32xf32, #tpu.memory_space<vmem>>, vector<1x1x32xf32>
    %197 = vector.shape_cast %196 : vector<1x1x32xf32> to vector<1x32xf32>
    %c1_90 = arith.constant 1 : index
    %c0_91 = arith.constant 0 : index
    %c0_92 = arith.constant 0 : index
    %198 = vector.load %arg5[%c1_90, %c0_91, %c0_92] : memref<2x1x32xf32, #tpu.memory_space<vmem>>, vector<1x1x32xf32>
    %199 = vector.shape_cast %198 : vector<1x1x32xf32> to vector<1x32xf32>
    %cst_93 = arith.constant dense<0.000000e+00> : vector<48xf32>
    %200 = vector.multi_reduction <add>, %195, %cst_93 [1] : vector<48x32xf32> to vector<48xf32>
    %201 = vector.shape_cast %200 : vector<48xf32> to vector<48x1xf32>
    %cst_94 = arith.constant 3.200000e+01 : f32
    %202 = vector.broadcast %cst_94 : f32 to vector<48x1xf32>
    %203 = arith.divf %201, %202 : vector<48x1xf32>
    %204 = vector.broadcast %203 : vector<48x1xf32> to vector<48x32xf32>
    %205 = arith.subf %195, %204 : vector<48x32xf32>
    %206 = arith.mulf %205, %205 : vector<48x32xf32>
    %cst_95 = arith.constant dense<0.000000e+00> : vector<48xf32>
    %207 = vector.multi_reduction <add>, %206, %cst_95 [1] : vector<48x32xf32> to vector<48xf32>
    %208 = vector.shape_cast %207 : vector<48xf32> to vector<48x1xf32>
    %cst_96 = arith.constant 3.200000e+01 : f32
    %209 = vector.broadcast %cst_96 : f32 to vector<48x1xf32>
    %210 = arith.divf %208, %209 : vector<48x1xf32>
    %cst_97 = arith.constant 9.99999997E-7 : f32
    %211 = vector.broadcast %cst_97 : f32 to vector<48x1xf32>
    %212 = arith.addf %210, %211 : vector<48x1xf32>
    %213 = math.rsqrt %212 : vector<48x1xf32>
    %214 = vector.broadcast %213 : vector<48x1xf32> to vector<48x32xf32>
    %215 = arith.mulf %205, %214 : vector<48x32xf32>
    %216 = vector.broadcast %197 : vector<1x32xf32> to vector<48x32xf32>
    %217 = arith.mulf %215, %216 : vector<48x32xf32>
    %218 = vector.broadcast %199 : vector<1x32xf32> to vector<48x32xf32>
    %219 = arith.addf %217, %218 : vector<48x32xf32>
    %c1_98 = arith.constant 1 : index
    %c0_99 = arith.constant 0 : index
    %c0_100 = arith.constant 0 : index
    %220 = vector.load %arg6[%c1_98, %c0_99, %c0_100] : memref<2x32x96xf32, #tpu.memory_space<vmem>>, vector<1x32x96xf32>
    %221 = vector.shape_cast %220 : vector<1x32x96xf32> to vector<32x96xf32>
    %cst_101 = arith.constant dense<0.000000e+00> : vector<48x96xf32>
    %222 = tpu.matmul %219, %221, %cst_101 {dimension_numbers = #tpu.dot_dimension_numbers<[1], [0], [0], [1], [0, 0, 1, 1], [], []>} : vector<48x32xf32>, vector<32x96xf32>, vector<48x96xf32> -> vector<48x96xf32>
    %c1_102 = arith.constant 1 : index
    %c0_103 = arith.constant 0 : index
    %c0_104 = arith.constant 0 : index
    %223 = vector.load %arg7[%c1_102, %c0_103, %c0_104] : memref<2x1x96xf32, #tpu.memory_space<vmem>>, vector<1x1x96xf32>
    %224 = vector.shape_cast %223 : vector<1x1x96xf32> to vector<1x96xf32>
    %225 = vector.broadcast %224 : vector<1x96xf32> to vector<48x96xf32>
    %226 = arith.addf %222, %225 : vector<48x96xf32>
    %227 = vector.extract_strided_slice %226 {offsets = [0, 0], sizes = [24, 16], strides = [1, 1]} : vector<48x96xf32> to vector<24x16xf32>
    %228 = vector.extract_strided_slice %226 {offsets = [0, 32], sizes = [24, 16], strides = [1, 1]} : vector<48x96xf32> to vector<24x16xf32>
    %229 = vector.extract_strided_slice %226 {offsets = [0, 64], sizes = [24, 16], strides = [1, 1]} : vector<48x96xf32> to vector<24x16xf32>
    %cst_105 = arith.constant dense<0.000000e+00> : vector<24x24xf32>
    %230 = tpu.matmul %227, %228, %cst_105 {dimension_numbers = #tpu.dot_dimension_numbers<[1], [1], [0], [0], [0, 0, 1, 0], [], []>} : vector<24x16xf32>, vector<24x16xf32>, vector<24x24xf32> -> vector<24x24xf32>
    %231 = arith.addf %230, %10 : vector<24x24xf32>
    %cst_106 = arith.constant dense<0xFF800000> : vector<24xf32>
    %232 = vector.multi_reduction <maximumf>, %231, %cst_106 [1] : vector<24x24xf32> to vector<24xf32>
    %233 = vector.shape_cast %232 : vector<24xf32> to vector<24x1xf32>
    %234 = vector.broadcast %233 : vector<24x1xf32> to vector<24x24xf32>
    %235 = arith.subf %231, %234 : vector<24x24xf32>
    %236 = math.exp %235 : vector<24x24xf32>
    %cst_107 = arith.constant dense<0.000000e+00> : vector<24xf32>
    %237 = vector.multi_reduction <add>, %236, %cst_107 [1] : vector<24x24xf32> to vector<24xf32>
    %238 = vector.shape_cast %237 : vector<24xf32> to vector<24x1xf32>
    %239 = tpu.reciprocal %238 {approx = true} : vector<24x1xf32> -> vector<24x1xf32>
    %240 = vector.broadcast %239 : vector<24x1xf32> to vector<24x24xf32>
    %241 = arith.mulf %236, %240 : vector<24x24xf32>
    %cst_108 = arith.constant dense<0.000000e+00> : vector<24x16xf32>
    %242 = tpu.matmul %241, %229, %cst_108 {dimension_numbers = #tpu.dot_dimension_numbers<[1], [0], [0], [1], [0, 0, 1, 1], [], []>} : vector<24x24xf32>, vector<24x16xf32>, vector<24x16xf32> -> vector<24x16xf32>
    %243 = vector.extract_strided_slice %226 {offsets = [0, 16], sizes = [24, 16], strides = [1, 1]} : vector<48x96xf32> to vector<24x16xf32>
    %244 = vector.extract_strided_slice %226 {offsets = [0, 48], sizes = [24, 16], strides = [1, 1]} : vector<48x96xf32> to vector<24x16xf32>
    %245 = vector.extract_strided_slice %226 {offsets = [0, 80], sizes = [24, 16], strides = [1, 1]} : vector<48x96xf32> to vector<24x16xf32>
    %cst_109 = arith.constant dense<0.000000e+00> : vector<24x24xf32>
    %246 = tpu.matmul %243, %244, %cst_109 {dimension_numbers = #tpu.dot_dimension_numbers<[1], [1], [0], [0], [0, 0, 1, 0], [], []>} : vector<24x16xf32>, vector<24x16xf32>, vector<24x24xf32> -> vector<24x24xf32>
    %247 = arith.addf %246, %10 : vector<24x24xf32>
    %cst_110 = arith.constant dense<0xFF800000> : vector<24xf32>
    %248 = vector.multi_reduction <maximumf>, %247, %cst_110 [1] : vector<24x24xf32> to vector<24xf32>
    %249 = vector.shape_cast %248 : vector<24xf32> to vector<24x1xf32>
    %250 = vector.broadcast %249 : vector<24x1xf32> to vector<24x24xf32>
    %251 = arith.subf %247, %250 : vector<24x24xf32>
    %252 = math.exp %251 : vector<24x24xf32>
    %cst_111 = arith.constant dense<0.000000e+00> : vector<24xf32>
    %253 = vector.multi_reduction <add>, %252, %cst_111 [1] : vector<24x24xf32> to vector<24xf32>
    %254 = vector.shape_cast %253 : vector<24xf32> to vector<24x1xf32>
    %255 = tpu.reciprocal %254 {approx = true} : vector<24x1xf32> -> vector<24x1xf32>
    %256 = vector.broadcast %255 : vector<24x1xf32> to vector<24x24xf32>
    %257 = arith.mulf %252, %256 : vector<24x24xf32>
    %cst_112 = arith.constant dense<0.000000e+00> : vector<24x16xf32>
    %258 = tpu.matmul %257, %245, %cst_112 {dimension_numbers = #tpu.dot_dimension_numbers<[1], [0], [0], [1], [0, 0, 1, 1], [], []>} : vector<24x24xf32>, vector<24x16xf32>, vector<24x16xf32> -> vector<24x16xf32>
    %259 = tpu.concatenate %242, %258 in 1 : vector<24x16xf32>, vector<24x16xf32> -> vector<24x32xf32>
    %260 = vector.extract_strided_slice %226 {offsets = [24, 0], sizes = [24, 16], strides = [1, 1]} : vector<48x96xf32> to vector<24x16xf32>
    %261 = vector.extract_strided_slice %226 {offsets = [24, 32], sizes = [24, 16], strides = [1, 1]} : vector<48x96xf32> to vector<24x16xf32>
    %262 = vector.extract_strided_slice %226 {offsets = [24, 64], sizes = [24, 16], strides = [1, 1]} : vector<48x96xf32> to vector<24x16xf32>
    %cst_113 = arith.constant dense<0.000000e+00> : vector<24x24xf32>
    %263 = tpu.matmul %260, %261, %cst_113 {dimension_numbers = #tpu.dot_dimension_numbers<[1], [1], [0], [0], [0, 0, 1, 0], [], []>} : vector<24x16xf32>, vector<24x16xf32>, vector<24x24xf32> -> vector<24x24xf32>
    %264 = arith.addf %263, %10 : vector<24x24xf32>
    %cst_114 = arith.constant dense<0xFF800000> : vector<24xf32>
    %265 = vector.multi_reduction <maximumf>, %264, %cst_114 [1] : vector<24x24xf32> to vector<24xf32>
    %266 = vector.shape_cast %265 : vector<24xf32> to vector<24x1xf32>
    %267 = vector.broadcast %266 : vector<24x1xf32> to vector<24x24xf32>
    %268 = arith.subf %264, %267 : vector<24x24xf32>
    %269 = math.exp %268 : vector<24x24xf32>
    %cst_115 = arith.constant dense<0.000000e+00> : vector<24xf32>
    %270 = vector.multi_reduction <add>, %269, %cst_115 [1] : vector<24x24xf32> to vector<24xf32>
    %271 = vector.shape_cast %270 : vector<24xf32> to vector<24x1xf32>
    %272 = tpu.reciprocal %271 {approx = true} : vector<24x1xf32> -> vector<24x1xf32>
    %273 = vector.broadcast %272 : vector<24x1xf32> to vector<24x24xf32>
    %274 = arith.mulf %269, %273 : vector<24x24xf32>
    %cst_116 = arith.constant dense<0.000000e+00> : vector<24x16xf32>
    %275 = tpu.matmul %274, %262, %cst_116 {dimension_numbers = #tpu.dot_dimension_numbers<[1], [0], [0], [1], [0, 0, 1, 1], [], []>} : vector<24x24xf32>, vector<24x16xf32>, vector<24x16xf32> -> vector<24x16xf32>
    %276 = vector.extract_strided_slice %226 {offsets = [24, 16], sizes = [24, 16], strides = [1, 1]} : vector<48x96xf32> to vector<24x16xf32>
    %277 = vector.extract_strided_slice %226 {offsets = [24, 48], sizes = [24, 16], strides = [1, 1]} : vector<48x96xf32> to vector<24x16xf32>
    %278 = vector.extract_strided_slice %226 {offsets = [24, 80], sizes = [24, 16], strides = [1, 1]} : vector<48x96xf32> to vector<24x16xf32>
    %cst_117 = arith.constant dense<0.000000e+00> : vector<24x24xf32>
    %279 = tpu.matmul %276, %277, %cst_117 {dimension_numbers = #tpu.dot_dimension_numbers<[1], [1], [0], [0], [0, 0, 1, 0], [], []>} : vector<24x16xf32>, vector<24x16xf32>, vector<24x24xf32> -> vector<24x24xf32>
    %280 = arith.addf %279, %10 : vector<24x24xf32>
    %cst_118 = arith.constant dense<0xFF800000> : vector<24xf32>
    %281 = vector.multi_reduction <maximumf>, %280, %cst_118 [1] : vector<24x24xf32> to vector<24xf32>
    %282 = vector.shape_cast %281 : vector<24xf32> to vector<24x1xf32>
    %283 = vector.broadcast %282 : vector<24x1xf32> to vector<24x24xf32>
    %284 = arith.subf %280, %283 : vector<24x24xf32>
    %285 = math.exp %284 : vector<24x24xf32>
    %cst_119 = arith.constant dense<0.000000e+00> : vector<24xf32>
    %286 = vector.multi_reduction <add>, %285, %cst_119 [1] : vector<24x24xf32> to vector<24xf32>
    %287 = vector.shape_cast %286 : vector<24xf32> to vector<24x1xf32>
    %288 = tpu.reciprocal %287 {approx = true} : vector<24x1xf32> -> vector<24x1xf32>
    %289 = vector.broadcast %288 : vector<24x1xf32> to vector<24x24xf32>
    %290 = arith.mulf %285, %289 : vector<24x24xf32>
    %cst_120 = arith.constant dense<0.000000e+00> : vector<24x16xf32>
    %291 = tpu.matmul %290, %278, %cst_120 {dimension_numbers = #tpu.dot_dimension_numbers<[1], [0], [0], [1], [0, 0, 1, 1], [], []>} : vector<24x24xf32>, vector<24x16xf32>, vector<24x16xf32> -> vector<24x16xf32>
    %292 = tpu.concatenate %275, %291 in 1 : vector<24x16xf32>, vector<24x16xf32> -> vector<24x32xf32>
    %293 = tpu.concatenate %259, %292 in 0 : vector<24x32xf32>, vector<24x32xf32> -> vector<48x32xf32>
    %c1_121 = arith.constant 1 : index
    %c0_122 = arith.constant 0 : index
    %c0_123 = arith.constant 0 : index
    %294 = vector.load %arg8[%c1_121, %c0_122, %c0_123] : memref<2x32x32xf32, #tpu.memory_space<vmem>>, vector<1x32x32xf32>
    %295 = vector.shape_cast %294 : vector<1x32x32xf32> to vector<32x32xf32>
    %cst_124 = arith.constant dense<0.000000e+00> : vector<48x32xf32>
    %296 = tpu.matmul %293, %295, %cst_124 {dimension_numbers = #tpu.dot_dimension_numbers<[1], [0], [0], [1], [0, 0, 1, 1], [], []>} : vector<48x32xf32>, vector<32x32xf32>, vector<48x32xf32> -> vector<48x32xf32>
    %c1_125 = arith.constant 1 : index
    %c0_126 = arith.constant 0 : index
    %c0_127 = arith.constant 0 : index
    %297 = vector.load %arg9[%c1_125, %c0_126, %c0_127] : memref<2x1x32xf32, #tpu.memory_space<vmem>>, vector<1x1x32xf32>
    %298 = vector.shape_cast %297 : vector<1x1x32xf32> to vector<1x32xf32>
    %299 = vector.broadcast %298 : vector<1x32xf32> to vector<48x32xf32>
    %300 = arith.addf %296, %299 : vector<48x32xf32>
    %301 = arith.addf %195, %300 : vector<48x32xf32>
    %c1_128 = arith.constant 1 : index
    %c0_129 = arith.constant 0 : index
    %c0_130 = arith.constant 0 : index
    %302 = vector.load %arg10[%c1_128, %c0_129, %c0_130] : memref<2x1x32xf32, #tpu.memory_space<vmem>>, vector<1x1x32xf32>
    %303 = vector.shape_cast %302 : vector<1x1x32xf32> to vector<1x32xf32>
    %c1_131 = arith.constant 1 : index
    %c0_132 = arith.constant 0 : index
    %c0_133 = arith.constant 0 : index
    %304 = vector.load %arg11[%c1_131, %c0_132, %c0_133] : memref<2x1x32xf32, #tpu.memory_space<vmem>>, vector<1x1x32xf32>
    %305 = vector.shape_cast %304 : vector<1x1x32xf32> to vector<1x32xf32>
    %cst_134 = arith.constant dense<0.000000e+00> : vector<48xf32>
    %306 = vector.multi_reduction <add>, %301, %cst_134 [1] : vector<48x32xf32> to vector<48xf32>
    %307 = vector.shape_cast %306 : vector<48xf32> to vector<48x1xf32>
    %cst_135 = arith.constant 3.200000e+01 : f32
    %308 = vector.broadcast %cst_135 : f32 to vector<48x1xf32>
    %309 = arith.divf %307, %308 : vector<48x1xf32>
    %310 = vector.broadcast %309 : vector<48x1xf32> to vector<48x32xf32>
    %311 = arith.subf %301, %310 : vector<48x32xf32>
    %312 = arith.mulf %311, %311 : vector<48x32xf32>
    %cst_136 = arith.constant dense<0.000000e+00> : vector<48xf32>
    %313 = vector.multi_reduction <add>, %312, %cst_136 [1] : vector<48x32xf32> to vector<48xf32>
    %314 = vector.shape_cast %313 : vector<48xf32> to vector<48x1xf32>
    %cst_137 = arith.constant 3.200000e+01 : f32
    %315 = vector.broadcast %cst_137 : f32 to vector<48x1xf32>
    %316 = arith.divf %314, %315 : vector<48x1xf32>
    %cst_138 = arith.constant 9.99999997E-7 : f32
    %317 = vector.broadcast %cst_138 : f32 to vector<48x1xf32>
    %318 = arith.addf %316, %317 : vector<48x1xf32>
    %319 = math.rsqrt %318 : vector<48x1xf32>
    %320 = vector.broadcast %319 : vector<48x1xf32> to vector<48x32xf32>
    %321 = arith.mulf %311, %320 : vector<48x32xf32>
    %322 = vector.broadcast %303 : vector<1x32xf32> to vector<48x32xf32>
    %323 = arith.mulf %321, %322 : vector<48x32xf32>
    %324 = vector.broadcast %305 : vector<1x32xf32> to vector<48x32xf32>
    %325 = arith.addf %323, %324 : vector<48x32xf32>
    %c1_139 = arith.constant 1 : index
    %c0_140 = arith.constant 0 : index
    %c0_141 = arith.constant 0 : index
    %326 = vector.load %arg12[%c1_139, %c0_140, %c0_141] : memref<2x32x64xf32, #tpu.memory_space<vmem>>, vector<1x32x64xf32>
    %327 = vector.shape_cast %326 : vector<1x32x64xf32> to vector<32x64xf32>
    %cst_142 = arith.constant dense<0.000000e+00> : vector<48x64xf32>
    %328 = tpu.matmul %325, %327, %cst_142 {dimension_numbers = #tpu.dot_dimension_numbers<[1], [0], [0], [1], [0, 0, 1, 1], [], []>} : vector<48x32xf32>, vector<32x64xf32>, vector<48x64xf32> -> vector<48x64xf32>
    %c1_143 = arith.constant 1 : index
    %c0_144 = arith.constant 0 : index
    %c0_145 = arith.constant 0 : index
    %329 = vector.load %arg13[%c1_143, %c0_144, %c0_145] : memref<2x1x64xf32, #tpu.memory_space<vmem>>, vector<1x1x64xf32>
    %330 = vector.shape_cast %329 : vector<1x1x64xf32> to vector<1x64xf32>
    %331 = vector.broadcast %330 : vector<1x64xf32> to vector<48x64xf32>
    %332 = arith.addf %328, %331 : vector<48x64xf32>
    %cst_146 = arith.constant 5.000000e-01 : f32
    %333 = vector.broadcast %cst_146 : f32 to vector<48x64xf32>
    %334 = arith.mulf %333, %332 : vector<48x64xf32>
    %cst_147 = arith.constant 0.707106769 : f32
    %335 = vector.broadcast %cst_147 : f32 to vector<48x64xf32>
    %336 = arith.mulf %332, %335 : vector<48x64xf32>
    %337 = math.absf %336 : vector<48x64xf32>
    %cst_148 = arith.constant 0.327591091 : f32
    %338 = vector.broadcast %cst_148 : f32 to vector<48x64xf32>
    %339 = arith.mulf %338, %337 : vector<48x64xf32>
    %cst_149 = arith.constant 1.000000e+00 : f32
    %340 = vector.broadcast %cst_149 : f32 to vector<48x64xf32>
    %341 = arith.addf %340, %339 : vector<48x64xf32>
    %cst_150 = arith.constant 1.000000e+00 : f32
    %342 = vector.broadcast %cst_150 : f32 to vector<48x64xf32>
    %343 = arith.divf %342, %341 : vector<48x64xf32>
    %cst_151 = arith.constant 1.06140542 : f32
    %344 = vector.broadcast %cst_151 : f32 to vector<48x64xf32>
    %345 = arith.mulf %344, %343 : vector<48x64xf32>
    %cst_152 = arith.constant 1.45315206 : f32
    %346 = vector.broadcast %cst_152 : f32 to vector<48x64xf32>
    %347 = arith.subf %345, %346 : vector<48x64xf32>
    %348 = arith.mulf %347, %343 : vector<48x64xf32>
    %cst_153 = arith.constant 1.42141378 : f32
    %349 = vector.broadcast %cst_153 : f32 to vector<48x64xf32>
    %350 = arith.addf %348, %349 : vector<48x64xf32>
    %351 = arith.mulf %350, %343 : vector<48x64xf32>
    %cst_154 = arith.constant 0.284496725 : f32
    %352 = vector.broadcast %cst_154 : f32 to vector<48x64xf32>
    %353 = arith.subf %351, %352 : vector<48x64xf32>
    %354 = arith.mulf %353, %343 : vector<48x64xf32>
    %cst_155 = arith.constant 0.254829586 : f32
    %355 = vector.broadcast %cst_155 : f32 to vector<48x64xf32>
    %356 = arith.addf %354, %355 : vector<48x64xf32>
    %357 = arith.mulf %356, %343 : vector<48x64xf32>
    %cst_156 = arith.constant 0.000000e+00 : f32
    %358 = vector.broadcast %cst_156 : f32 to vector<48x64xf32>
    %359 = arith.subf %358, %337 : vector<48x64xf32>
    %360 = arith.mulf %359, %337 : vector<48x64xf32>
    %361 = math.exp %360 : vector<48x64xf32>
    %362 = arith.mulf %357, %361 : vector<48x64xf32>
    %cst_157 = arith.constant 1.000000e+00 : f32
    %363 = vector.broadcast %cst_157 : f32 to vector<48x64xf32>
    %364 = arith.subf %363, %362 : vector<48x64xf32>
    %cst_158 = arith.constant 0.000000e+00 : f32
    %365 = vector.broadcast %cst_158 : f32 to vector<48x64xf32>
    %366 = arith.cmpf olt, %336, %365 : vector<48x64xf32>
    %cst_159 = arith.constant 0.000000e+00 : f32
    %367 = vector.broadcast %cst_159 : f32 to vector<48x64xf32>
    %368 = arith.subf %367, %364 : vector<48x64xf32>
    %369 = arith.select %366, %368, %364 : vector<48x64xi1>, vector<48x64xf32>
    %cst_160 = arith.constant 1.000000e+00 : f32
    %370 = vector.broadcast %cst_160 : f32 to vector<48x64xf32>
    %371 = arith.addf %370, %369 : vector<48x64xf32>
    %372 = arith.mulf %334, %371 : vector<48x64xf32>
    %c1_161 = arith.constant 1 : index
    %c0_162 = arith.constant 0 : index
    %c0_163 = arith.constant 0 : index
    %373 = vector.load %arg14[%c1_161, %c0_162, %c0_163] : memref<2x64x32xf32, #tpu.memory_space<vmem>>, vector<1x64x32xf32>
    %374 = vector.shape_cast %373 : vector<1x64x32xf32> to vector<64x32xf32>
    %cst_164 = arith.constant dense<0.000000e+00> : vector<48x32xf32>
    %375 = tpu.matmul %372, %374, %cst_164 {dimension_numbers = #tpu.dot_dimension_numbers<[1], [0], [0], [1], [0, 0, 1, 1], [], []>} : vector<48x64xf32>, vector<64x32xf32>, vector<48x32xf32> -> vector<48x32xf32>
    %c1_165 = arith.constant 1 : index
    %c0_166 = arith.constant 0 : index
    %c0_167 = arith.constant 0 : index
    %376 = vector.load %arg15[%c1_165, %c0_166, %c0_167] : memref<2x1x32xf32, #tpu.memory_space<vmem>>, vector<1x1x32xf32>
    %377 = vector.shape_cast %376 : vector<1x1x32xf32> to vector<1x32xf32>
    %378 = vector.broadcast %377 : vector<1x32xf32> to vector<48x32xf32>
    %379 = arith.addf %375, %378 : vector<48x32xf32>
    %380 = arith.addf %301, %379 : vector<48x32xf32>
    %381 = vector.extract_strided_slice %380 {offsets = [0, 0], sizes = [1, 32], strides = [1, 1]} : vector<48x32xf32> to vector<1x32xf32>
    %382 = vector.extract_strided_slice %380 {offsets = [24, 0], sizes = [1, 32], strides = [1, 1]} : vector<48x32xf32> to vector<1x32xf32>
    %383 = tpu.concatenate %381, %382 in 0 : vector<1x32xf32>, vector<1x32xf32> -> vector<2x32xf32>
    %c0_168 = arith.constant 0 : index
    %c0_169 = arith.constant 0 : index
    %384 = vector.load %arg16[%c0_168, %c0_169] : memref<1x32xf32, #tpu.memory_space<vmem>>, vector<1x32xf32>
    %c0_170 = arith.constant 0 : index
    %c0_171 = arith.constant 0 : index
    %385 = vector.load %arg17[%c0_170, %c0_171] : memref<1x32xf32, #tpu.memory_space<vmem>>, vector<1x32xf32>
    %cst_172 = arith.constant dense<0.000000e+00> : vector<2xf32>
    %386 = vector.multi_reduction <add>, %383, %cst_172 [1] : vector<2x32xf32> to vector<2xf32>
    %387 = vector.shape_cast %386 : vector<2xf32> to vector<2x1xf32>
    %cst_173 = arith.constant 3.200000e+01 : f32
    %388 = vector.broadcast %cst_173 : f32 to vector<2x1xf32>
    %389 = arith.divf %387, %388 : vector<2x1xf32>
    %390 = vector.broadcast %389 : vector<2x1xf32> to vector<2x32xf32>
    %391 = arith.subf %383, %390 : vector<2x32xf32>
    %392 = arith.mulf %391, %391 : vector<2x32xf32>
    %cst_174 = arith.constant dense<0.000000e+00> : vector<2xf32>
    %393 = vector.multi_reduction <add>, %392, %cst_174 [1] : vector<2x32xf32> to vector<2xf32>
    %394 = vector.shape_cast %393 : vector<2xf32> to vector<2x1xf32>
    %cst_175 = arith.constant 3.200000e+01 : f32
    %395 = vector.broadcast %cst_175 : f32 to vector<2x1xf32>
    %396 = arith.divf %394, %395 : vector<2x1xf32>
    %cst_176 = arith.constant 9.99999997E-7 : f32
    %397 = vector.broadcast %cst_176 : f32 to vector<2x1xf32>
    %398 = arith.addf %396, %397 : vector<2x1xf32>
    %399 = math.rsqrt %398 : vector<2x1xf32>
    %400 = vector.broadcast %399 : vector<2x1xf32> to vector<2x32xf32>
    %401 = arith.mulf %391, %400 : vector<2x32xf32>
    %402 = vector.broadcast %384 : vector<1x32xf32> to vector<2x32xf32>
    %403 = arith.mulf %401, %402 : vector<2x32xf32>
    %404 = vector.broadcast %385 : vector<1x32xf32> to vector<2x32xf32>
    %405 = arith.addf %403, %404 : vector<2x32xf32>
    %c0_177 = arith.constant 0 : index
    %c0_178 = arith.constant 0 : index
    %406 = vector.load %arg18[%c0_177, %c0_178] : memref<32x10xf32, #tpu.memory_space<vmem>>, vector<32x10xf32>
    %cst_179 = arith.constant dense<0.000000e+00> : vector<2x10xf32>
    %407 = tpu.matmul %405, %406, %cst_179 {dimension_numbers = #tpu.dot_dimension_numbers<[1], [0], [0], [1], [0, 0, 1, 1], [], []>} : vector<2x32xf32>, vector<32x10xf32>, vector<2x10xf32> -> vector<2x10xf32>
    %c0_180 = arith.constant 0 : index
    %c0_181 = arith.constant 0 : index
    %408 = vector.load %arg19[%c0_180, %c0_181] : memref<1x10xf32, #tpu.memory_space<vmem>>, vector<1x10xf32>
    %409 = vector.broadcast %408 : vector<1x10xf32> to vector<2x10xf32>
    %410 = arith.addf %407, %409 : vector<2x10xf32>
    %c0_182 = arith.constant 0 : index
    %c0_183 = arith.constant 0 : index
    %411 = vector.load %arg20[%c0_182, %c0_183] : memref<2x10xf32, #tpu.memory_space<vmem>>, vector<2x10xf32>
    tpu.vector_store %arg20[%c0_182, %c0_183], %410 {strides = array<i32>} : memref<2x10xf32, #tpu.memory_space<vmem>>, vector<2x10xf32>,
    return
  }
  func.func @transform_0(%arg0: i32) -> (i32, i32) {
    %c0_i32 = arith.constant 0 : i32
    %c0_i32_0 = arith.constant 0 : i32
    %c0_i32_1 = arith.constant 0 : i32
    return %c0_i32, %c0_i32_0 : i32, i32
  }
  func.func @transform_1(%arg0: i32) -> (i32, i32) {
    %c0_i32 = arith.constant 0 : i32
    %c0_i32_0 = arith.constant 0 : i32
    %c0_i32_1 = arith.constant 0 : i32
    return %c0_i32, %c0_i32_0 : i32, i32
  }
  func.func @transform_2(%arg0: i32) -> (i32, i32) {
    %c0_i32 = arith.constant 0 : i32
    %c0_i32_0 = arith.constant 0 : i32
    %c0_i32_1 = arith.constant 0 : i32
    return %c0_i32, %c0_i32_0 : i32, i32
  }
  func.func @transform_3(%arg0: i32) -> (i32, i32, i32) {
    %c0_i32 = arith.constant 0 : i32
    %c0_i32_0 = arith.constant 0 : i32
    %c0_i32_1 = arith.constant 0 : i32
    %c0_i32_2 = arith.constant 0 : i32
    return %c0_i32, %c0_i32_0, %c0_i32_1 : i32, i32, i32
  }
  func.func @transform_4(%arg0: i32) -> (i32, i32, i32) {
    %c0_i32 = arith.constant 0 : i32
    %c0_i32_0 = arith.constant 0 : i32
    %c0_i32_1 = arith.constant 0 : i32
    %c0_i32_2 = arith.constant 0 : i32
    return %c0_i32, %c0_i32_0, %c0_i32_1 : i32, i32, i32
  }
  func.func @transform_5(%arg0: i32) -> (i32, i32, i32) {
    %c0_i32 = arith.constant 0 : i32
    %c0_i32_0 = arith.constant 0 : i32
    %c0_i32_1 = arith.constant 0 : i32
    %c0_i32_2 = arith.constant 0 : i32
    return %c0_i32, %c0_i32_0, %c0_i32_1 : i32, i32, i32
  }
  func.func @transform_6(%arg0: i32) -> (i32, i32, i32) {
    %c0_i32 = arith.constant 0 : i32
    %c0_i32_0 = arith.constant 0 : i32
    %c0_i32_1 = arith.constant 0 : i32
    %c0_i32_2 = arith.constant 0 : i32
    return %c0_i32, %c0_i32_0, %c0_i32_1 : i32, i32, i32
  }
  func.func @transform_7(%arg0: i32) -> (i32, i32, i32) {
    %c0_i32 = arith.constant 0 : i32
    %c0_i32_0 = arith.constant 0 : i32
    %c0_i32_1 = arith.constant 0 : i32
    %c0_i32_2 = arith.constant 0 : i32
    return %c0_i32, %c0_i32_0, %c0_i32_1 : i32, i32, i32
  }
  func.func @transform_8(%arg0: i32) -> (i32, i32, i32) {
    %c0_i32 = arith.constant 0 : i32
    %c0_i32_0 = arith.constant 0 : i32
    %c0_i32_1 = arith.constant 0 : i32
    %c0_i32_2 = arith.constant 0 : i32
    return %c0_i32, %c0_i32_0, %c0_i32_1 : i32, i32, i32
  }
  func.func @transform_9(%arg0: i32) -> (i32, i32, i32) {
    %c0_i32 = arith.constant 0 : i32
    %c0_i32_0 = arith.constant 0 : i32
    %c0_i32_1 = arith.constant 0 : i32
    %c0_i32_2 = arith.constant 0 : i32
    return %c0_i32, %c0_i32_0, %c0_i32_1 : i32, i32, i32
  }
  func.func @transform_10(%arg0: i32) -> (i32, i32, i32) {
    %c0_i32 = arith.constant 0 : i32
    %c0_i32_0 = arith.constant 0 : i32
    %c0_i32_1 = arith.constant 0 : i32
    %c0_i32_2 = arith.constant 0 : i32
    return %c0_i32, %c0_i32_0, %c0_i32_1 : i32, i32, i32
  }
  func.func @transform_11(%arg0: i32) -> (i32, i32, i32) {
    %c0_i32 = arith.constant 0 : i32
    %c0_i32_0 = arith.constant 0 : i32
    %c0_i32_1 = arith.constant 0 : i32
    %c0_i32_2 = arith.constant 0 : i32
    return %c0_i32, %c0_i32_0, %c0_i32_1 : i32, i32, i32
  }
  func.func @transform_12(%arg0: i32) -> (i32, i32, i32) {
    %c0_i32 = arith.constant 0 : i32
    %c0_i32_0 = arith.constant 0 : i32
    %c0_i32_1 = arith.constant 0 : i32
    %c0_i32_2 = arith.constant 0 : i32
    return %c0_i32, %c0_i32_0, %c0_i32_1 : i32, i32, i32
  }
  func.func @transform_13(%arg0: i32) -> (i32, i32, i32) {
    %c0_i32 = arith.constant 0 : i32
    %c0_i32_0 = arith.constant 0 : i32
    %c0_i32_1 = arith.constant 0 : i32
    %c0_i32_2 = arith.constant 0 : i32
    return %c0_i32, %c0_i32_0, %c0_i32_1 : i32, i32, i32
  }
  func.func @transform_14(%arg0: i32) -> (i32, i32, i32) {
    %c0_i32 = arith.constant 0 : i32
    %c0_i32_0 = arith.constant 0 : i32
    %c0_i32_1 = arith.constant 0 : i32
    %c0_i32_2 = arith.constant 0 : i32
    return %c0_i32, %c0_i32_0, %c0_i32_1 : i32, i32, i32
  }
  func.func @transform_15(%arg0: i32) -> (i32, i32) {
    %c0_i32 = arith.constant 0 : i32
    %c0_i32_0 = arith.constant 0 : i32
    %c0_i32_1 = arith.constant 0 : i32
    return %c0_i32, %c0_i32_0 : i32, i32
  }
  func.func @transform_16(%arg0: i32) -> (i32, i32) {
    %c0_i32 = arith.constant 0 : i32
    %c0_i32_0 = arith.constant 0 : i32
    %c0_i32_1 = arith.constant 0 : i32
    return %c0_i32, %c0_i32_0 : i32, i32
  }
  func.func @transform_17(%arg0: i32) -> (i32, i32) {
    %c0_i32 = arith.constant 0 : i32
    %c0_i32_0 = arith.constant 0 : i32
    %c0_i32_1 = arith.constant 0 : i32
    return %c0_i32, %c0_i32_0 : i32, i32
  }
  func.func @transform_18(%arg0: i32) -> (i32, i32) {
    %c0_i32 = arith.constant 0 : i32
    %c0_i32_0 = arith.constant 0 : i32
    %c0_i32_1 = arith.constant 0 : i32
    return %c0_i32, %c0_i32_0 : i32, i32
  }
  func.func @transform_19(%arg0: i32) -> (i32, i32) {
    %c0_i32 = arith.constant 0 : i32
    %c0_i32_0 = arith.constant 0 : i32
    %c0_i32_1 = arith.constant 0 : i32
    return %c0_i32, %c0_i32_0 : i32, i32
  }
}

</mosaic_0001>

<bundles_post_ra>
// kernel: vit_forward.1
= control target key start
LH: loop header
LB: loop body
LE: loop exit
PB: predicated region body
PF: predicated region fallthrough
CT: control target
= control target key end

     0   :  { %s4642_s0 = inlined_call_operand.vmem [shape: f32[48,48], index: 0, kind: input, shape index: {}]   ;;  %s4643_s1 = inlined_call_operand.vmem [shape: f32[48,32], index: 1, kind: input, shape index: {}]   ;;  %s4644_s2 = inlined_call_operand.vmem [shape: f32[48,32], index: 2, kind: input, shape index: {}]   ;;  %s4645_s3 = inlined_call_operand.vmem [shape: f32[2,1,32], index: 3, kind: input, shape index: {}]   ;;  %s4646_s4 = inlined_call_operand.vmem [shape: f32[2,1,32], index: 4, kind: input, shape index: {}]   ;;  %s4647_s5 = inlined_call_operand.vmem [shape: f32[2,32,96], index: 5, kind: input, shape index: {}]   ;;  %s4648_s6 = inlined_call_operand.vmem [shape: f32[2,1,96], index: 6, kind: input, shape index: {}]   ;;  %s4649_s7 = inlined_call_operand.vmem [shape: f32[2,32,32], index: 7, kind: input, shape index: {}]   ;;  %s4650_s8 = inlined_call_operand.vmem [shape: f32[2,1,32], index: 8, kind: input, shape index: {}]   ;;  %s4651_s9 = inlined_call_operand.vmem [shape: f32[2,1,32], index: 9, kind: input, shape index: {}]   ;;  %s4652_s10 = inlined_call_operand.vmem [shape: f32[2,1,32], index: 10, kind: input, shape index: {}]   ;;  %s4653_s11 = inlined_call_operand.vmem [shape: f32[2,32,64], index: 11, kind: input, shape index: {}]   ;;  %s4654_s12 = inlined_call_operand.vmem [shape: f32[2,1,64], index: 12, kind: input, shape index: {}]   ;;  %s4655_s13 = inlined_call_operand.vmem [shape: f32[2,64,32], index: 13, kind: input, shape index: {}]   ;;  %s4656_s14 = inlined_call_operand.vmem [shape: f32[2,1,32], index: 14, kind: input, shape index: {}]   ;;  %s4657_s15 = inlined_call_operand.vmem [shape: f32[1,32], index: 15, kind: input, shape index: {}]   ;;  %s4658_s16 = inlined_call_operand.vmem [shape: f32[1,32], index: 16, kind: input, shape index: {}]   ;;  %s4659_s17 = inlined_call_operand.vmem [shape: f32[32,10], index: 17, kind: input, shape index: {}]   ;;  %s4660_s18 = inlined_call_operand.vmem [shape: f32[1,10], index: 18, kind: input, shape index: {}]   ;;  %s4661_s19 = inlined_call_operand.hbm [shape: f32[2,10], index: 19, kind: output, shape index: {}]  }
   0x1   :  { %4666 = sst [smem:[#allocation5_spill]] %s4642_s0 }
   0x2   :  { %4667 = sst [smem:[#allocation6_spill]] %s4643_s1 }
   0x3   :  { %4668 = sst [smem:[#allocation7_spill]] %s4644_s2 }
   0x4   :  { %4669 = sst [smem:[#allocation8_spill]] %s4645_s3 }
   0x5   :  { %s4670_s20 = sld [smem:[#allocation6_spill]]  ;;  %vm81_vm0 = vcmask 392192  }
   0x6   :  { %s4671_s0 = sld [smem:[#allocation5_spill]] }
   0xb   :  { %v74_v0 = vld [vmem:[%s4670_s20 + $0x28] sm:$0xff]  ;;  %v73_v1 = vld [vmem:[%s4670_s20 + $0x20] sm:$0xff]  ;;  %v72_v2 = vld [vmem:[%s4670_s20 + $0x18] sm:$0xff] }
   0xc   :  { %110 = vmatpush.msra.mxu0 %v74_v0  ;;  %v71_v3 = vld [vmem:[%s4670_s20 + $0x10] sm:$0xff]  ;;  %v70_v4 = vld [vmem:[%s4670_s20 + $0x8] sm:$0xff]  ;;  %v69_v5 = vld [vmem:[%s4670_s20] sm:$0xff] }
   0xd   :  { %v63_v6 = vld [vmem:[%s4671_s0] sm:$0xff] }
   0xe   :  { %111 = vmatpush.msra.mxu0 %v73_v1 }
  0x10   :  { %112 = vmatpush.msra.mxu0 %v72_v2 }
  0x12   :  { %113 = vmatpush.msra.mxu0 %v71_v3 }
  0x14   :  { %114 = vmatpush.msra.mxu0 %v70_v4 }
  0x15   :  { %24 = vsyncpa [#allocation3], 0  ;;  %v64_v7 = vld [vmem:[%s4671_s0 + $0x8] sm:$0xff]  ;;  %v65_v8 = vld [vmem:[%s4671_s0 + $0x10] sm:$0xff]  ;;  %s4672_s23 = sld [smem:[#allocation7_spill]]  ;;  %vm141_vm1 = vcmask 261120  }
  0x16   :  { %115 = vmatpush.msra.mxu0 %v69_v5  ;;  %v3393_v21 = vmov 32.0   ;;  %v302_v43 = vld [vmem:[%s4647_s5 + $0x18] sm:$0xff]  ;;  %v301_v44 = vld [vmem:[%s4647_s5 + $0x10] sm:$0xff]  ;;  %v300_v45 = vld [vmem:[%s4647_s5 + $0x8] sm:$0xff]  ;;  %s4673_s25 = sld [smem:[#allocation8_spill]]  ;;  %s3394_s29 = smov 96  }
  0x17   :  { %2913 = vmatmul.msk.f32.vlgmr.msra.gmra.mxu0 %vm81_vm0, %v63_v6  ;;  %3171 = vrcp.f32 %v3393_v21  ;;  %337 = vmatpush.msra.mxu1 %v302_v43  ;;  %v299_v46 = vld [vmem:[%s4647_s5] sm:$0xff]  ;;  %s3395_s30 = smov 64   ;;  %s3396_s21 = smov 80   ;;  %vm369_vm12 = vcmask 130048   ;;  %vm408_vm14 = vcmask 195584  }
  0x18   :  { %v3591_v4 = vld [vmem:[%s4646_s4] ss:$0 sm:$0xff]  ;;  %s3398_s22 = smov 112   ;;  %s3399_s2 = smov 48  }
  0x19   :  { %338 = vmatpush.msra.mxu1 %v301_v44 }
  0x1b   :  { %v75_v9 = vld [vmem:[%s4672_s23] sm:$0xff]  ;;  %v76_v13 = vld [vmem:[%s4672_s23 + $0x8] sm:$0xff]  ;;  %v77_v17 = vld [vmem:[%s4672_s23 + $0x10] sm:$0xff]  ;;  %339 = vmatpush.msra.mxu1 %v300_v45  ;;  %v135_v45 = vlaneseq }
  0x1c   :  { %v3586_v0 = vld [vmem:[%s4673_s25] ss:$0 sm:$0xff] }
  0x1d   :  { %v3172_v22 = vpop.eup %3171  ;;  %340 = vmatpush.msra.mxu1 %v299_v46 }
  0x1e   :  { %v161_v23 = vmul.f32 32.0, %v3172_v22  ;;  %vm165_vm2 = vweird.f32 %v3172_v22 }
  0x1f   :  { %2914 = vmatmul.msk.f32.gmra.mxu0 %vm81_vm0, %v64_v7 }
  0x20   :  { %v162_v24 = vsub.f32 1.0, %v161_v23 }
  0x22   :  { %v163_v25 = vmul.f32 %v3172_v22, %v162_v24 }
  0x24   :  { %v164_v26 = vadd.f32 %v3172_v22, %v163_v25 }
  0x26   :  { %v3553_v27 = vsel %vm165_vm2, %v3172_v22, %v164_v26 }
  0x27   :  { %2915 = vmatmul.msk.f32.gmra.mxu0 %vm81_vm0, %v65_v8 }
  0x94   :  { %v117_v10 = vpop.f32.mrf.mxu0 }
  0x95   :  { %v3535_v11 = vadd.f32 %v117_v10, %v75_v9 }
  0x97   :  { %v142_v12 = vsel %vm141_vm1, %v3535_v11, 0.0 }
  0x98   :  { %143 = vadd.xlane.f32.xlu0 %v142_v12 }
  0x9c   :  { %v120_v14 = vpop.f32.mrf.mxu0 }
  0x9d   :  { %v3542_v15 = vadd.f32 %v120_v14, %v76_v13 }
  0x9f   :  { %v145_v16 = vsel %vm141_vm1, %v3542_v15, 0.0 }
  0xa0   :  { %146 = vadd.xlane.f32.xlu0 %v145_v16 }
  0xa4   :  { %v123_v18 = vpop.f32.mrf.mxu0 }
  0xa5   :  { %v3549_v19 = vadd.f32 %v123_v18, %v77_v17 }
  0xa7   :  { %v148_v20 = vsel %vm141_vm1, %v3549_v19, 0.0 }
  0xa8   :  { %149 = vadd.xlane.f32.xlu1 %v148_v20 }
 0x10b   :  { %v144_v28 = vpop.xlane.xlu0 %143 }
 0x10c   :  { %v167_v29 = vmul.f32 %v3553_v27, %v144_v28  ;;  %v3606_v28 = vld [vmem:[%s4648_s6] ss:$0 sm:$0xff] }
 0x10e   :  { %v173_v30 = vsub.f32 %v3535_v11, %v167_v29 }
 0x110   :  { %v179_v31 = vmul.f32 %v173_v30, %v173_v30 }
 0x112   :  { %v185_v32 = vsel %vm141_vm1, %v179_v31, 0.0 }
 0x113   :  { %186 = vadd.xlane.f32.xlu1 %v185_v32  ;;  %v147_v33 = vpop.xlane.xlu0 %146 }
 0x114   :  { %v168_v34 = vmul.f32 %v3553_v27, %v147_v33 }
 0x116   :  { %v174_v35 = vsub.f32 %v3542_v15, %v168_v34 }
 0x118   :  { %v180_v36 = vmul.f32 %v174_v35, %v174_v35 }
 0x11a   :  { %v188_v37 = vsel %vm141_vm1, %v180_v36, 0.0 }
 0x11b   :  { %v150_v38 = vpop.xlane.xlu1 %149  ;;  %189 = vadd.xlane.f32.xlu2 %v188_v37  ;;  %v67_v37 = vld [vmem:[%s4671_s0 + $0x20] sm:$0xff] }
 0x11c   :  { %v169_v39 = vmul.f32 %v3553_v27, %v150_v38 }
 0x11e   :  { %v3563_v40 = vsub.f32 %v3549_v19, %v169_v39 }
 0x120   :  { %v181_v41 = vmul.f32 %v3563_v40, %v3563_v40 }
 0x122   :  { %v191_v42 = vsel %vm141_vm1, %v181_v41, 0.0  ;;  %v79_v41 = vld [vmem:[%s4672_s23 + $0x20] sm:$0xff] }
 0x123   :  { %192 = vadd.xlane.f32.xlu2 %v191_v42 }
 0x186   :  { %v187_v47 = vpop.xlane.xlu1 %186 }
 0x187   :  { %v203_v48 = vmul.f32 %v187_v47, %v3553_v27  ;;  %v136_v47 = vand.u32 127, %v135_v45 }
 0x189   :  { %v209_v49 = vadd.f32 1e-06, %v203_v48  ;;  %vm137_vm13 = vcmp.lt.s32.totalorder %v136_v47, 17  ;;  %v3397_v48 = vmov -1e+30  }
 0x18b   :  { %3173 = vrsqrt.f32 %v209_v49  ;;  %vm221_vm4 = vweird.f32 %v209_v49 }
 0x18e   :  { %v190_v50 = vpop.xlane.xlu2 %189 }
 0x18f   :  { %v204_v51 = vmul.f32 %v190_v50, %v3553_v27 }
 0x191   :  { %v3174_v52 = vpop.eup %3173  ;;  %v210_v53 = vadd.f32 1e-06, %v204_v51 }
 0x192   :  { %v216_v54 = vmul.f32 %v3174_v52, %v209_v49  ;;  %vm222_vm3 = vweird.f32 %v3174_v52  ;;  %v3650_v49 = vsel %vm137_vm13, 0.0, %v3397_v48 }
 0x193   :  { %3175 = vrsqrt.f32 %v210_v53  ;;  %vm223_vm5 = vmor %vm221_vm4, %vm222_vm3  ;;  %vm231_vm7 = vweird.f32 %v210_v53 }
 0x194   :  { %v217_v55 = vmul.f32 %v3174_v52, %v216_v54 }
 0x196   :  { %v218_v56 = vmul.f32 0.5, %v217_v55  ;;  %v193_v57 = vpop.xlane.xlu2 %192 }
 0x197   :  { %v205_v58 = vmul.f32 %v193_v57, %v3553_v27  ;;  %v68_v57 = vld [vmem:[%s4671_s0 + $0x28] sm:$0xff] }
 0x198   :  { %v219_v59 = vsub.f32 1.5, %v218_v56 }
 0x199   :  { %v3176_v60 = vpop.eup %3175  ;;  %v211_v61 = vadd.f32 1e-06, %v205_v58  ;;  %v78_v58 = vld [vmem:[%s4672_s23 + $0x18] sm:$0xff] }
 0x19a   :  { %v220_v62 = vmul.f32 %v3174_v52, %v219_v59  ;;  %v226_v63 = vmul.f32 %v3176_v60, %v210_v53  ;;  %vm232_vm6 = vweird.f32 %v3176_v60 }
 0x19b   :  { %3177 = vrsqrt.f32 %v211_v61  ;;  %vm233_vm8 = vmor %vm231_vm7, %vm232_vm6  ;;  %vm241_vm10 = vweird.f32 %v211_v61 }
 0x19c   :  { %v227_v1 = vmul.f32 %v3176_v60, %v226_v63  ;;  %v224_v2 = vsel %vm223_vm5, %v3174_v52, %v220_v62 }
 0x19d   :  { %v275_v3 = vmul.f32 %v224_v2, %v173_v30 }
 0x19e   :  { %v228_v5 = vmul.f32 0.5, %v227_v1 }
 0x19f   :  { %v284_v6 = vmul.f32 %v3586_v0, %v275_v3 }
 0x1a0   :  { %v229_v7 = vsub.f32 1.5, %v228_v5 }
 0x1a1   :  { %v3178_v8 = vpop.eup %3177  ;;  %v293_v9 = vadd.f32 %v3591_v4, %v284_v6 }
 0x1a2   :  { %v230_v10 = vmul.f32 %v3176_v60, %v229_v7  ;;  %v236_v12 = vmul.f32 %v3178_v8, %v211_v61  ;;  %vm242_vm9 = vweird.f32 %v3178_v8 }
 0x1a3   :  { %2919 = vmatmul.msk.f32.vlgmr.msra.gmra.mxu1 %vm141_vm1, %v293_v9  ;;  %vm243_vm11 = vmor %vm241_vm10, %vm242_vm9 }
 0x1a4   :  { %v237_v13 = vmul.f32 %v3178_v8, %v236_v12  ;;  %v234_v14 = vsel %vm233_vm8, %v3176_v60, %v230_v10 }
 0x1a5   :  { %v276_v16 = vmul.f32 %v234_v14, %v174_v35  ;;  %v66_v35 = vld [vmem:[%s4671_s0 + $0x18] sm:$0xff] }
 0x1a6   :  { %v238_v17 = vmul.f32 0.5, %v237_v13  ;;  %2916 = vmatmul.msk.f32.gmra.mxu0 %vm81_vm0, %v66_v35 }
 0x1a7   :  { %v285_v18 = vmul.f32 %v3586_v0, %v276_v16 }
 0x1a8   :  { %v239_v20 = vsub.f32 1.5, %v238_v17 }
 0x1a9   :  { %v294_v21 = vadd.f32 %v3591_v4, %v285_v18 }
 0x1aa   :  { %v240_v22 = vmul.f32 %v3178_v8, %v239_v20 }
 0x1ab   :  { %2920 = vmatmul.msk.f32.gmra.mxu1 %vm141_vm1, %v294_v21 }
 0x1ac   :  { %v244_v23 = vsel %vm243_vm11, %v3178_v8, %v240_v22 }
 0x1ad   :  { %v277_v24 = vmul.f32 %v244_v23, %v3563_v40 }
 0x1ae   :  { %2917 = vmatmul.msk.f32.gmra.mxu0 %vm81_vm0, %v67_v37 }
 0x1af   :  { %v286_v25 = vmul.f32 %v3586_v0, %v277_v24  ;;  %v80_v24 = vld [vmem:[%s4672_s23 + $0x28] sm:$0xff]  ;;  %s3400_s23 = smov 16  }
 0x1b1   :  { %v295_v26 = vadd.f32 %v3591_v4, %v286_v25 }
 0x1b3   :  { %2921 = vmatmul.msk.f32.gmra.mxu1 %vm141_vm1, %v295_v26 }
 0x1b6   :  { %2918 = vmatmul.msk.f32.gmra.mxu0 %vm81_vm0, %v68_v57 }
 0x220   :  { %v342_v29 = vpop.f32.mrf.mxu1 }
 0x221   :  { %v3609_v30 = vadd.f32 %v3606_v28, %v342_v29 }
 0x223   :  { %363 = vrot.lane.b32.xlu2 %v3609_v30, %s3394_s29  ;;  %v126_v40 = vpop.f32.mrf.mxu0 }
 0x224   :  { %v3670_v59 = vadd.f32 %v126_v40, %v78_v58 }
 0x226   :  { %v151_v60 = vsel %vm141_vm1, %v3670_v59, 0.0 }
 0x228   :  { %v345_v31 = vpop.f32.mrf.mxu1 }
 0x229   :  { %v346_v32 = vadd.f32 %v3606_v28, %v345_v31 }
 0x22b   :  { %365 = vrot.lane.b32.xlu1 %v346_v32, %s3394_s29  ;;  %v129_v42 = vpop.f32.mrf.mxu0 }
 0x22c   :  { %v3644_v43 = vadd.f32 %v129_v42, %v79_v41 }
 0x22e   :  { %v154_v44 = vsel %vm141_vm1, %v3644_v43, 0.0 }
 0x230   :  { %v348_v33 = vpop.f32.mrf.mxu1 }
 0x231   :  { %v3616_v34 = vadd.f32 %v3606_v28, %v348_v33 }
 0x233   :  { %442 = vrot.lane.b32.xlu1 %v3609_v30, %s3395_s30  ;;  %496 = vrot.lane.b32.xlu2 %v3616_v34, %s3396_s21  ;;  %v3657_v56 = vpack.i.bf16 %v346_v32, %v3616_v34  ;;  %v132_v25 = vpop.f32.mrf.mxu0 }
 0x234   :  { %367 = vrot.lane.b32.xlu0 %v3616_v34, %s3394_s29  ;;  %v3690_v29 = vadd.f32 %v132_v25, %v80_v24 }
 0x23b   :  { %494 = vrot.lane.b32.xlu1 %v346_v32, %s3396_s21 }
 0x265   :  { %155 = vadd.xlane.f32.xlu1 %v154_v44 }
 0x27d   :  { %v364_v39 = vpop.permute.xlu2 %363 }
 0x28d   :  { %v497_v61 = vpop.permute.xlu2 %496 }
 0x29d   :  { %v366_v38 = vpop.permute.xlu1 %365 }
 0x2a5   :  { %v443_v10 = vpop.permute.xlu1 %442 }
 0x2a6   :  { %v368_v36 = vpop.permute.xlu0 %367 }
 0x2a7   :  { %2925 = vmatpush.xpose.msk.msra.mxu2 %vm369_vm12, %v368_v36 }
 0x2ab   :  { %2926 = vmatpush.xpose.msk.msra.mxu2 %vm369_vm12, %v366_v38 }
 0x2ad   :  { %v495_v16 = vpop.permute.xlu1 %494 }
 0x2af   :  { %2927 = vmatpush.xpose.msk.msra.mxu2 %vm369_vm12, %v364_v39 }
 0x2b2   :  { %2928 = vmatmul.msk.f32.vlgmr.msra.gmra.mxu2 %vm369_vm12, %v3609_v30 }
 0x2ba   :  { %2929 = vmatmul.msk.f32.gmra.mxu2 %vm369_vm12, %v346_v32 }
 0x2c2   :  { %2930 = vmatmul.msk.f32.gmra.mxu2 %vm369_vm12, %v3616_v34 }
 0x2d8   :  { %v156_v26 = vpop.xlane.xlu1 %155 }
 0x2d9   :  { %v171_v31 = vmul.f32 %v3553_v27, %v156_v26 }
 0x2db   :  { %v177_v33 = vsub.f32 %v3644_v43, %v171_v31 }
 0x335   :  { %v3648_v46 = vpop.f32.mrf.mxu2 }
 0x33d   :  { %v402_v50 = vpop.f32.mrf.mxu2 }
 0x33e   :  { %v403_v51 = vadd.f32 %v402_v50, %v3650_v49 }
 0x340   :  { %v412_v52 = vsel %vm408_vm14, %v403_v51, -inf }
 0x341   :  { %413 = vmax.xlane.f32.xlu0 %v412_v52 }
 0x345   :  { %v405_v53 = vpop.f32.mrf.mxu2 }
 0x346   :  { %v406_v54 = vadd.f32 %v405_v53, %v3650_v49 }
 0x348   :  { %v415_v55 = vsel %vm408_vm14, %v406_v54, -inf }
 0x349   :  { %416 = vmax.xlane.f32.xlu2 %v415_v55 }
 0x355   :  { %3108 = vrot.lane.b32.xlu0 %v3657_v56, %s3395_s30 }
 0x361   :  { %492 = vrot.lane.b32.xlu2 %v3609_v30, %s3396_s21 }
 0x37f   :  { %152 = vadd.xlane.f32.xlu0 %v151_v60 }
 0x393   :  { %488 = vrot.lane.b32.xlu0 %v346_v32, %s3398_s22  ;;  %v157_v32 = vsel %vm141_vm1, %v3690_v29, 0.0 }
 0x3b4   :  { %v414_v62 = vpop.xlane.xlu0 %413 }
 0x3b5   :  { %v419_v63 = vsub.f32 %v403_v51, %v414_v62 }
 0x3b7   :  { %v423_v1 = vmul.f32 1.442695, %v419_v63 }
 0x3b9   :  { %3179 = vpow2.f32 %v423_v1 }
 0x3bc   :  { %v417_v2 = vpop.xlane.xlu2 %416 }
 0x3bd   :  { %v420_v3 = vsub.f32 %v406_v54, %v417_v2 }
 0x3bf   :  { %v3180_v5 = vpop.eup %3179  ;;  %v425_v6 = vmul.f32 1.442695, %v420_v3 }
 0x3c0   :  { %v430_v7 = vsel %vm408_vm14, %v3180_v5, 0.0 }
 0x3c1   :  { %3181 = vpow2.f32 %v425_v6  ;;  %431 = vadd.xlane.f32.xlu1 %v430_v7 }
 0x3c4   :  { %v493_v17 = vpop.permute.xlu2 %492 }
 0x3c7   :  { %v3182_v8 = vpop.eup %3181  ;;  %v3109_v9 = vpop.permute.xlu0 %3108 }
 0x3c8   :  { %v433_v12 = vsel %vm408_vm14, %v3182_v8, 0.0  ;;  %v3110_v13 = vunpack.i.l.bf16 %v3109_v9  ;;  %v3111_v14 = vunpack.i.h.bf16 %v3109_v9 }
 0x3c9   :  { %434 = vadd.xlane.f32.xlu2 %v433_v12 }
 0x3ca   :  { %473 = vmatpush.msrb.mxu1 %v3110_v13  ;;  %3092 = vmatpush.msra.mxu3 %v3110_v13 }
 0x3cc   :  { %474 = vmatpush.msrb.mxu1 %v3111_v14  ;;  %3093 = vmatpush.msra.mxu3 %v3111_v14 }
 0x3ce   :  { %475 = vmatpush.msrb.mxu1 %v443_v10  ;;  %3094 = vmatpush.msra.mxu3 %v443_v10 }
 0x3d0   :  { %2934 = vmatpush.xpose.msk.msrb.mxu3 %vm369_vm12, %v497_v61 }
 0x3d4   :  { %2935 = vmatpush.xpose.msk.msrb.mxu3 %vm369_vm12, %v495_v16 }
 0x3d8   :  { %2936 = vmatpush.xpose.msk.msrb.mxu3 %vm369_vm12, %v493_v17 }
 0x3da   :  { %490 = vrot.lane.b32.xlu1 %v3616_v34, %s3398_s22  ;;  %v183_v34 = vmul.f32 %v177_v33, %v177_v33 }
 0x3dc   :  { %v197_v35 = vsel %vm141_vm1, %v183_v34, 0.0 }
 0x3e1   :  { %486 = vrot.lane.b32.xlu2 %v3609_v30, %s3398_s22 }
 0x3f2   :  { %v153_v18 = vpop.xlane.xlu0 %152 }
 0x3f3   :  { %v170_v20 = vmul.f32 %v3553_v27, %v153_v18 }
 0x3f5   :  { %v176_v21 = vsub.f32 %v3670_v59, %v170_v20 }
 0x3f7   :  { %v182_v22 = vmul.f32 %v176_v21, %v176_v21 }
 0x3f9   :  { %v194_v23 = vsel %vm141_vm1, %v182_v22, 0.0 }
 0x3fa   :  { %195 = vadd.xlane.f32.xlu0 %v194_v23 }
 0x405   :  { %v489_v44 = vpop.permute.xlu0 %488 }
 0x40a   :  { %158 = vadd.xlane.f32.xlu2 %v157_v32 }
 0x40e   :  { %569 = vrot.lane.b32.xlu0 %v3609_v30, %s3399_s2 }
 0x412   :  { %198 = vadd.xlane.f32.xlu2 %v197_v35 }
 0x434   :  { %v432_v36 = vpop.xlane.xlu1 %431 }
 0x435   :  { %3183 = vrcp.f32 %v432_v36 }
 0x43b   :  { %v3184_v37 = vpop.eup %3183 }
 0x43c   :  { %v435_v38 = vpop.xlane.xlu2 %434  ;;  %v440_v39 = vmul.f32 %v3184_v37, %v3180_v5 }
 0x43d   :  { %3185 = vrcp.f32 %v435_v38 }
 0x43e   :  { %2932 = vmatmul.msk.f32.vlgmr.msra.gmra.mxu3 %vm408_vm14, %v440_v39 }
 0x443   :  { %v3186_v40 = vpop.eup %3185 }
 0x444   :  { %v441_v41 = vmul.f32 %v3186_v40, %v3182_v8  ;;  %v487_v42 = vpop.permute.xlu2 %486 }
 0x446   :  { %2933 = vmatmul.msk.f32.gmra.mxu3 %vm408_vm14, %v441_v41 }
 0x44c   :  { %v491_v30 = vpop.permute.xlu1 %490 }
 0x44e   :  { %2937 = vmatmul.msk.f32.vlgmr.msrb.gmra.mxu3 %vm369_vm12, %v487_v42 }
 0x456   :  { %2938 = vmatmul.msk.f32.gmra.mxu3 %vm369_vm12, %v489_v44 }
 0x45e   :  { %2939 = vmatmul.msk.f32.gmra.mxu3 %vm369_vm12, %v491_v30 }
 0x46d   :  { %v196_v45 = vpop.xlane.xlu0 %195 }
 0x46e   :  { %v206_v47 = vmul.f32 %v196_v45, %v3553_v27 }
 0x470   :  { %v212_v48 = vadd.f32 1e-06, %v206_v47 }
 0x472   :  { %3187 = vrsqrt.f32 %v212_v48  ;;  %vm251_vm0 = vweird.f32 %v212_v48 }
 0x478   :  { %v3188_v50 = vpop.eup %3187 }
 0x479   :  { %v246_v51 = vmul.f32 %v3188_v50, %v212_v48  ;;  %vm252_vm15 = vweird.f32 %v3188_v50 }
 0x47a   :  { %vm253_vm2 = vmor %vm251_vm0, %vm252_vm15 }
 0x47b   :  { %v247_v52 = vmul.f32 %v3188_v50, %v246_v51 }
 0x47d   :  { %v248_v53 = vmul.f32 0.5, %v247_v52  ;;  %v159_v54 = vpop.xlane.xlu2 %158 }
 0x47e   :  { %v172_v55 = vmul.f32 %v3553_v27, %v159_v54 }
 0x47f   :  { %v249_v57 = vsub.f32 1.5, %v248_v53 }
 0x480   :  { %v178_v58 = vsub.f32 %v3690_v29, %v172_v55 }
 0x481   :  { %v250_v60 = vmul.f32 %v3188_v50, %v249_v57 }
 0x482   :  { %v184_v61 = vmul.f32 %v178_v58, %v178_v58 }
 0x483   :  { %v254_v62 = vsel %vm253_vm2, %v3188_v50, %v250_v60 }
 0x484   :  { %v200_v63 = vsel %vm141_vm1, %v184_v61, 0.0  ;;  %v278_v1 = vmul.f32 %v254_v62, %v176_v21 }
 0x485   :  { %201 = vadd.xlane.f32.xlu2 %v200_v63  ;;  %v199_v2 = vpop.xlane.xlu2 %198 }
 0x486   :  { %v207_v3 = vmul.f32 %v199_v2, %v3553_v27  ;;  %v287_v5 = vmul.f32 %v3586_v0, %v278_v1 }
 0x488   :  { %v213_v6 = vadd.f32 1e-06, %v207_v3  ;;  %v296_v7 = vadd.f32 %v3591_v4, %v287_v5 }
 0x48a   :  { %3189 = vrsqrt.f32 %v213_v6  ;;  %2922 = vmatmul.msk.f32.gmra.mxu1 %vm141_vm1, %v296_v7  ;;  %vm261_vm4 = vweird.f32 %v213_v6 }
 0x490   :  { %v3190_v8 = vpop.eup %3189 }
 0x491   :  { %v256_v9 = vmul.f32 %v3190_v8, %v213_v6  ;;  %vm262_vm3 = vweird.f32 %v3190_v8  ;;  %v570_v6 = vpop.permute.xlu0 %569 }
 0x492   :  { %vm263_vm5 = vmor %vm261_vm4, %vm262_vm3 }
 0x493   :  { %v257_v10 = vmul.f32 %v3190_v8, %v256_v9 }
 0x495   :  { %v258_v12 = vmul.f32 0.5, %v257_v10 }
 0x497   :  { %v259_v13 = vsub.f32 1.5, %v258_v12 }
 0x499   :  { %v260_v14 = vmul.f32 %v3190_v8, %v259_v13 }
 0x49b   :  { %v264_v16 = vsel %vm263_vm5, %v3190_v8, %v260_v14 }
 0x49c   :  { %v279_v17 = vmul.f32 %v264_v16, %v177_v33 }
 0x49e   :  { %v288_v18 = vmul.f32 %v3586_v0, %v279_v17 }
 0x4a0   :  { %v297_v20 = vadd.f32 %v3591_v4, %v288_v18 }
 0x4a2   :  { %2923 = vmatmul.msk.f32.gmra.mxu1 %vm141_vm1, %v297_v20 }
 0x4c1   :  { %v3715_v21 = vpop.f32.mrf.mxu3 }
 0x4c9   :  { %v3717_v22 = vpop.f32.mrf.mxu3 }
 0x4d1   :  { %v527_v23 = vpop.f32.mrf.mxu3 }
 0x4d2   :  { %v528_v24 = vadd.f32 %v527_v23, %v3650_v49 }
 0x4d4   :  { %v536_v25 = vsel %vm408_vm14, %v528_v24, -inf }
 0x4d5   :  { %537 = vmax.xlane.f32.xlu1 %v536_v25 }
 0x4d9   :  { %v530_v26 = vpop.f32.mrf.mxu3 }
 0x4da   :  { %v531_v31 = vadd.f32 %v530_v26, %v3650_v49 }
 0x4dc   :  { %v539_v32 = vsel %vm408_vm14, %v531_v31, -inf }
 0x4dd   :  { %540 = vmax.xlane.f32.xlu2 %v539_v32 }
 0x4e1   :  { %v533_v33 = vpop.f32.mrf.mxu3 }
 0x4e2   :  { %v534_v34 = vadd.f32 %v533_v33, %v3650_v49 }
 0x4e4   :  { %v542_v35 = vsel %vm408_vm14, %v534_v34, -inf }
 0x4e5   :  { %543 = vmax.xlane.f32.xlu2 %v542_v35 }
 0x4f8   :  { %v202_v36 = vpop.xlane.xlu2 %201 }
 0x4f9   :  { %v208_v37 = vmul.f32 %v202_v36, %v3553_v27 }
 0x4fb   :  { %v214_v38 = vadd.f32 1e-06, %v208_v37 }
 0x4fd   :  { %3191 = vrsqrt.f32 %v214_v38  ;;  %3113 = vrot.lane.b32.xlu2 %v3657_v56, %s3399_s2  ;;  %vm271_vm7 = vweird.f32 %v214_v38 }
 0x503   :  { %v3192_v39 = vpop.eup %3191 }
 0x504   :  { %v266_v40 = vmul.f32 %v3192_v39, %v214_v38  ;;  %vm272_vm6 = vweird.f32 %v3192_v39 }
 0x505   :  { %vm273_vm8 = vmor %vm271_vm7, %vm272_vm6 }
 0x506   :  { %v267_v41 = vmul.f32 %v3192_v39, %v266_v40 }
 0x507   :  { %v351_v7 = vpop.f32.mrf.mxu1 }
 0x508   :  { %v268_v42 = vmul.f32 0.5, %v267_v41  ;;  %v3735_v8 = vadd.f32 %v3606_v28, %v351_v7 }
 0x50a   :  { %v269_v44 = vsub.f32 1.5, %v268_v42 }
 0x50c   :  { %v270_v30 = vmul.f32 %v3192_v39, %v269_v44 }
 0x50e   :  { %v274_v45 = vsel %vm273_vm8, %v3192_v39, %v270_v30 }
 0x50f   :  { %v280_v47 = vmul.f32 %v274_v45, %v178_v58  ;;  %v400_v45 = vadd.f32 %v3648_v46, %v3650_v49 }
 0x511   :  { %v289_v48 = vmul.f32 %v3586_v0, %v280_v47 }
 0x513   :  { %v298_v50 = vadd.f32 %v3591_v4, %v289_v48 }
 0x515   :  { %2924 = vmatmul.msk.f32.gmra.mxu1 %vm141_vm1, %v298_v50 }
 0x51f   :  { %v354_v9 = vpop.f32.mrf.mxu1 }
 0x520   :  { %v3740_v10 = vadd.f32 %v3606_v28, %v354_v9 }
 0x548   :  { %v538_v51 = vpop.xlane.xlu1 %537 }
 0x549   :  { %v545_v52 = vsub.f32 %v528_v24, %v538_v51  ;;  %v409_v51 = vsel %vm408_vm14, %v400_v45, -inf }
 0x54b   :  { %v548_v56 = vmul.f32 1.442695, %v545_v52 }
 0x54d   :  { %3193 = vpow2.f32 %v548_v56 }
 0x550   :  { %v541_v53 = vpop.xlane.xlu2 %540 }
 0x551   :  { %v546_v54 = vsub.f32 %v531_v31, %v541_v53 }
 0x553   :  { %v3194_v55 = vpop.eup %3193  ;;  %v550_v57 = vmul.f32 1.442695, %v546_v54 }
 0x554   :  { %v554_v60 = vsel %vm408_vm14, %v3194_v55, 0.0 }
 0x555   :  { %3195 = vpow2.f32 %v550_v57  ;;  %555 = vadd.xlane.f32.xlu0 %v554_v60 }
 0x558   :  { %v544_v61 = vpop.xlane.xlu2 %543 }
 0x559   :  { %v547_v58 = vsub.f32 %v534_v34, %v544_v61 }
 0x55b   :  { %v3196_v62 = vpop.eup %3195  ;;  %v552_v0 = vmul.f32 1.442695, %v547_v58 }
 0x55c   :  { %v557_v4 = vsel %vm408_vm14, %v3196_v62, 0.0 }
 0x55d   :  { %3197 = vpow2.f32 %v552_v0  ;;  %558 = vadd.xlane.f32.xlu0 %v557_v4 }
 0x560   :  { %v3114_v63 = vpop.permute.xlu2 %3113 }
 0x561   :  { %v3115_v1 = vunpack.i.l.bf16 %v3114_v63  ;;  %v3116_v3 = vunpack.i.h.bf16 %v3114_v63 }
 0x563   :  { %v3198_v2 = vpop.eup %3197  ;;  %600 = vmatpush.msrb.mxu2 %v3115_v1 }
 0x564   :  { %v560_v5 = vsel %vm408_vm14, %v3198_v2, 0.0 }
 0x565   :  { %561 = vadd.xlane.f32.xlu1 %v560_v5  ;;  %601 = vmatpush.msrb.mxu2 %v3116_v3 }
 0x567   :  { %602 = vmatpush.msrb.mxu2 %v570_v6 }
 0x571   :  { %752 = vrot.lane.b32.xlu0 %v3735_v8, %s3398_s22 }
 0x57e   :  { %760 = vrot.lane.b32.xlu1 %v3740_v10, %s3396_s21 }
 0x586   :  { %631 = vrot.lane.b32.xlu1 %v3735_v8, %s3394_s29 }
 0x592   :  { %v357_v12 = vpop.f32.mrf.mxu1 }
 0x593   :  { %v3747_v13 = vadd.f32 %v3606_v28, %v357_v12 }
 0x595   :  { %762 = vrot.lane.b32.xlu2 %v3747_v13, %s3396_s21  ;;  %756 = vrot.lane.b32.xlu0 %v3747_v13, %s3398_s22 }
 0x59d   :  { %758 = vrot.lane.b32.xlu2 %v3735_v8, %s3396_s21  ;;  %633 = vrot.lane.b32.xlu0 %v3740_v10, %s3394_s29 }
 0x5a5   :  { %754 = vrot.lane.b32.xlu2 %v3740_v10, %s3398_s22 }
 0x5ad   :  { %635 = vrot.lane.b32.xlu2 %v3747_v13, %s3394_s29 }
 0x5c8   :  { %v556_v28 = vpop.xlane.xlu0 %555 }
 0x5c9   :  { %3199 = vrcp.f32 %v556_v28 }
 0x5cf   :  { %v3200_v14 = vpop.eup %3199 }
 0x5d0   :  { %v559_v16 = vpop.xlane.xlu0 %558  ;;  %v566_v17 = vmul.f32 %v3200_v14, %v3194_v55 }
 0x5d1   :  { %3201 = vrcp.f32 %v559_v16 }
 0x5d2   :  { %2940 = vmatmul.msk.f32.vlgmr.msrb.gmra.mxu2 %vm408_vm14, %v566_v17 }
 0x5d7   :  { %v3202_v18 = vpop.eup %3201 }
 0x5d8   :  { %v562_v20 = vpop.xlane.xlu1 %561  ;;  %v567_v23 = vmul.f32 %v3202_v18, %v3196_v62  ;;  %v3117_v62 = vpack.i.bf16 %v3740_v10, %v3747_v13 }
 0x5d9   :  { %3203 = vrcp.f32 %v562_v20 }
 0x5da   :  { %2941 = vmatmul.msk.f32.gmra.mxu2 %vm408_vm14, %v567_v23 }
 0x5df   :  { %v3204_v24 = vpop.eup %3203 }
 0x5e0   :  { %v568_v25 = vmul.f32 %v3204_v24, %v3198_v2 }
 0x5e2   :  { %2942 = vmatmul.msk.f32.gmra.mxu2 %vm408_vm14, %v568_v25 }
 0x5e3   :  { %v753_v33 = vpop.permute.xlu0 %752 }
 0x5ef   :  { %v763_v26 = vpop.permute.xlu2 %762 }
 0x5f0   :  { %2952 = vmatpush.xpose.msk.msra.mxu2 %vm369_vm12, %v763_v26  ;;  %v761_v31 = vpop.permute.xlu1 %760 }
 0x5f4   :  { %2953 = vmatpush.xpose.msk.msra.mxu2 %vm369_vm12, %v761_v31 }
 0x5f7   :  { %v759_v32 = vpop.permute.xlu2 %758 }
 0x5f8   :  { %2954 = vmatpush.xpose.msk.msra.mxu2 %vm369_vm12, %v759_v32  ;;  %v632_v38 = vpop.permute.xlu1 %631 }
 0x5fb   :  { %2955 = vmatmul.msk.f32.vlgmr.msra.gmra.mxu2 %vm369_vm12, %v753_v33 }
 0x5ff   :  { %v755_v34 = vpop.permute.xlu2 %754 }
 0x603   :  { %2956 = vmatmul.msk.f32.gmra.mxu2 %vm369_vm12, %v755_v34 }
 0x607   :  { %v757_v35 = vpop.permute.xlu0 %756  ;;  %v636_v36 = vpop.permute.xlu2 %635 }
 0x608   :  { %2943 = vmatpush.xpose.msk.msra.mxu3 %vm369_vm12, %v636_v36 }
 0x60b   :  { %2957 = vmatmul.msk.f32.gmra.mxu2 %vm369_vm12, %v757_v35 }
 0x60f   :  { %v634_v37 = vpop.permute.xlu0 %633 }
 0x610   :  { %2944 = vmatpush.xpose.msk.msra.mxu3 %vm369_vm12, %v634_v37 }
 0x614   :  { %2945 = vmatpush.xpose.msk.msra.mxu3 %vm369_vm12, %v632_v38 }
 0x617   :  { %2946 = vmatmul.msk.f32.vlgmr.msra.gmra.mxu3 %vm369_vm12, %v3735_v8 }
 0x61f   :  { %2947 = vmatmul.msk.f32.gmra.mxu3 %vm369_vm12, %v3740_v10 }
 0x627   :  { %2948 = vmatmul.msk.f32.gmra.mxu3 %vm369_vm12, %v3747_v13 }
 0x655   :  { %v604_v39 = vpop.f32.mrf.mxu2 }
 0x65d   :  { %v3779_v40 = vpop.f32.mrf.mxu2 }
 0x665   :  { %v3781_v41 = vpop.f32.mrf.mxu2 }
 0x67e   :  { %v793_v42 = vpop.f32.mrf.mxu2 }
 0x67f   :  { %v794_v44 = vadd.f32 %v793_v42, %v3650_v49 }
 0x681   :  { %v802_v30 = vsel %vm408_vm14, %v794_v44, -inf }
 0x682   :  { %803 = vmax.xlane.f32.xlu2 %v802_v30 }
 0x686   :  { %v796_v47 = vpop.f32.mrf.mxu2 }
 0x687   :  { %v797_v48 = vadd.f32 %v796_v47, %v3650_v49 }
 0x689   :  { %v805_v50 = vsel %vm408_vm14, %v797_v48, -inf }
 0x68a   :  { %806 = vmax.xlane.f32.xlu0 %v805_v50  ;;  %410 = vmax.xlane.f32.xlu2 %v409_v51 }
 0x68e   :  { %v799_v58 = vpop.f32.mrf.mxu2 }
 0x68f   :  { %v800_v0 = vadd.f32 %v799_v58, %v3650_v49 }
 0x691   :  { %v808_v4 = vsel %vm408_vm14, %v800_v0, -inf }
 0x69a   :  { %v666_v52 = vpop.f32.mrf.mxu3 }
 0x69b   :  { %v667_v56 = vadd.f32 %v666_v52, %v3650_v49 }
 0x69d   :  { %v675_v53 = vsel %vm408_vm14, %v667_v56, -inf }
 0x69e   :  { %676 = vmax.xlane.f32.xlu0 %v675_v53 }
 0x6a2   :  { %v669_v54 = vpop.f32.mrf.mxu3 }
 0x6a3   :  { %v670_v55 = vadd.f32 %v669_v54, %v3650_v49 }
 0x6a5   :  { %v678_v46 = vsel %vm408_vm14, %v670_v55, -inf }
 0x6a6   :  { %679 = vmax.xlane.f32.xlu1 %v678_v46 }
 0x6aa   :  { %v672_v57 = vpop.f32.mrf.mxu3 }
 0x6ab   :  { %v3795_v60 = vadd.f32 %v672_v57, %v3650_v49 }
 0x6ad   :  { %v681_v61 = vsel %vm408_vm14, %v3795_v60, -inf }
 0x6ae   :  { %682 = vmax.xlane.f32.xlu1 %v681_v61 }
 0x6b2   :  { %3118 = vrot.lane.b32.xlu0 %v3117_v62, %s3399_s2 }
 0x6b6   :  { %809 = vmax.xlane.f32.xlu1 %v808_v4 }
 0x6f5   :  { %v804_v63 = vpop.xlane.xlu2 %803 }
 0x6f6   :  { %v811_v1 = vsub.f32 %v794_v44, %v804_v63  ;;  %v896_v63 = vld [vmem:[%s4649_s7 + $0x10] sm:$0xff] }
 0x6f8   :  { %v814_v2 = vmul.f32 1.442695, %v811_v1  ;;  %v895_v1 = vld [vmem:[%s4649_s7 + $0x8] sm:$0xff] }
 0x6fa   :  { %3205 = vpow2.f32 %v814_v2 }
 0x6fd   :  { %v807_v3 = vpop.xlane.xlu0 %806  ;;  %v411_v5 = vpop.xlane.xlu2 %410 }
 0x6fe   :  { %v812_v6 = vsub.f32 %v797_v48, %v807_v3  ;;  %v418_v7 = vsub.f32 %v400_v45, %v411_v5  ;;  %v894_v5 = vld [vmem:[%s4649_s7] sm:$0xff] }
 0x700   :  { %v3206_v9 = vpop.eup %3205  ;;  %v816_v12 = vmul.f32 1.442695, %v812_v6  ;;  %v421_v28 = vmul.f32 1.442695, %v418_v7 }
 0x701   :  { %v820_v10 = vsel %vm408_vm14, %v3206_v9, 0.0 }
 0x702   :  { %3207 = vpow2.f32 %v816_v12  ;;  %821 = vadd.xlane.f32.xlu2 %v820_v10 }
 0x703   :  { %3209 = vpow2.f32 %v421_v28 }
 0x708   :  { %v3208_v13 = vpop.eup %3207 }
 0x709   :  { %v3210_v14 = vpop.eup %3209  ;;  %v823_v16 = vsel %vm408_vm14, %v3208_v13, 0.0 }
 0x70a   :  { %824 = vadd.xlane.f32.xlu2 %v823_v16  ;;  %v427_v17 = vsel %vm408_vm14, %v3210_v14, 0.0 }
 0x70b   :  { %428 = vadd.xlane.f32.xlu0 %v427_v17 }
 0x711   :  { %v677_v18 = vpop.xlane.xlu0 %676 }
 0x712   :  { %v684_v20 = vsub.f32 %v667_v56, %v677_v18 }
 0x714   :  { %v687_v23 = vmul.f32 1.442695, %v684_v20 }
 0x716   :  { %3211 = vpow2.f32 %v687_v23 }
 0x719   :  { %v680_v33 = vpop.xlane.xlu1 %679 }
 0x71a   :  { %v685_v34 = vsub.f32 %v670_v55, %v680_v33 }
 0x71c   :  { %v3807_v24 = vpop.eup %3211  ;;  %v689_v35 = vmul.f32 1.442695, %v685_v34 }
 0x71d   :  { %v693_v25 = vsel %vm408_vm14, %v3807_v24, 0.0 }
 0x71e   :  { %694 = vadd.xlane.f32.xlu1 %v693_v25  ;;  %3213 = vpow2.f32 %v689_v35 }
 0x71f   :  { %616 = vrot.lane.b32.xlu0 %v604_v39, %s3400_s23 }
 0x721   :  { %v683_v36 = vpop.xlane.xlu1 %682 }
 0x722   :  { %835 = vrot.lane.b32.xlu2 %v3735_v8, %s3399_s2 }
 0x724   :  { %v3119_v26 = vpop.permute.xlu0 %3118  ;;  %v3817_v37 = vpop.eup %3213 }
 0x725   :  { %v3120_v31 = vunpack.i.l.bf16 %v3119_v26  ;;  %v3121_v32 = vunpack.i.h.bf16 %v3119_v26  ;;  %v696_v38 = vsel %vm408_vm14, %v3817_v37, 0.0 }
 0x727   :  { %620 = vrot.lane.b32.xlu0 %v3781_v41, %s3400_s23  ;;  %866 = vmatpush.msrb.mxu2 %v3120_v31 }
 0x729   :  { %867 = vmatpush.msrb.mxu2 %v3121_v32  ;;  %v810_v39 = vpop.xlane.xlu1 %809 }
 0x72a   :  { %v813_v42 = vsub.f32 %v800_v0, %v810_v39 }
 0x72c   :  { %v818_v44 = vmul.f32 1.442695, %v813_v42 }
 0x72e   :  { %3215 = vpow2.f32 %v818_v44 }
 0x734   :  { %v3216_v41 = vpop.eup %3215 }
 0x735   :  { %v826_v30 = vsel %vm408_vm14, %v3216_v41, 0.0 }
 0x737   :  { %3123 = vrot.lane.b32.xlu1 %v3117_v62, %s3395_s30 }
 0x74b   :  { %697 = vadd.xlane.f32.xlu2 %v696_v38  ;;  %v3155_v38 = vld [vmem:[%s4650_s8] ss:$0 sm:$0xff] }
 0x761   :  { %827 = vadd.xlane.f32.xlu1 %v826_v30 }
 0x763   :  { %618 = vrot.lane.b32.xlu2 %v3779_v40, %s3400_s23 }
 0x775   :  { %v822_v45 = vpop.xlane.xlu2 %821 }
 0x776   :  { %3217 = vrcp.f32 %v822_v45 }
 0x77a   :  { %708 = vrot.lane.b32.xlu1 %v3735_v8, %s3395_s30  ;;  %v686_v8 = vsub.f32 %v3795_v60, %v683_v36  ;;  %v897_v60 = vld [vmem:[%s4649_s7 + $0x18] sm:$0xff] }
 0x77b   :  { %932 = vmatpush.msrb.mxu3 %v897_v60 }
 0x77c   :  { %v3218_v50 = vpop.eup %3217  ;;  %v691_v55 = vmul.f32 1.442695, %v686_v8 }
 0x77d   :  { %v825_v47 = vpop.xlane.xlu2 %824  ;;  %v832_v52 = vmul.f32 %v3218_v50, %v3206_v9  ;;  %933 = vmatpush.msrb.mxu3 %v896_v63 }
 0x77e   :  { %v429_v48 = vpop.xlane.xlu0 %428 }
 0x77f   :  { %3219 = vrcp.f32 %v429_v48  ;;  %934 = vmatpush.msrb.mxu3 %v895_v1 }
 0x780   :  { %3221 = vrcp.f32 %v825_v47 }
 0x781   :  { %3223 = vpow2.f32 %v691_v55  ;;  %935 = vmatpush.msrb.mxu3 %v894_v5 }
 0x785   :  { %v3220_v51 = vpop.eup %3219  ;;  %v836_v56 = vpop.permute.xlu2 %835 }
 0x786   :  { %868 = vmatpush.msrb.mxu2 %v836_v56  ;;  %v439_v53 = vmul.f32 %v3220_v51, %v3210_v14  ;;  %v3222_v40 = vpop.eup %3221 }
 0x787   :  { %2958 = vmatmul.msk.f32.vlgmr.msrb.gmra.mxu2 %vm408_vm14, %v832_v52  ;;  %v833_v54 = vmul.f32 %v3222_v40, %v3208_v13  ;;  %v3224_v46 = vpop.eup %3223 }
 0x788   :  { %2931 = vmatmul.msk.f32.vlgmr.msrb.gmra.mxu1 %vm408_vm14, %v439_v53  ;;  %v699_v61 = vsel %vm408_vm14, %v3224_v46, 0.0 }
 0x78f   :  { %2959 = vmatmul.msk.f32.gmra.mxu2 %vm408_vm14, %v833_v54 }
 0x791   :  { %v695_v57 = vpop.xlane.xlu1 %694  ;;  %v617_v13 = vpop.permute.xlu0 %616 }
 0x7a4   :  { %700 = vadd.xlane.f32.xlu1 %v699_v61 }
 0x7a9   :  { %v3124_v58 = vpop.permute.xlu1 %3123 }
 0x7aa   :  { %v3125_v62 = vunpack.i.l.bf16 %v3124_v58  ;;  %v3126_v0 = vunpack.i.h.bf16 %v3124_v58 }
 0x7ac   :  { %739 = vmatpush.msrb.mxu0 %v3125_v62  ;;  %3095 = vmatpush.msra.mxu1 %v3125_v62 }
 0x7ae   :  { %740 = vmatpush.msrb.mxu0 %v3126_v0  ;;  %3096 = vmatpush.msra.mxu1 %v3126_v0 }
 0x7be   :  { %v698_v6 = vpop.xlane.xlu2 %697 }
 0x7c6   :  { %v619_v18 = vpop.permute.xlu2 %618 }
 0x7c7   :  { %v626_v20 = vsel %vm369_vm12, %v3715_v21, %v619_v18 }
 0x7d4   :  { %v828_v4 = vpop.xlane.xlu1 %827 }
 0x7d5   :  { %3225 = vrcp.f32 %v828_v4 }
 0x7d6   :  { %3227 = vrcp.f32 %v695_v57 }
 0x7d7   :  { %3229 = vrcp.f32 %v698_v6 }
 0x7db   :  { %v3226_v2 = vpop.eup %3225 }
 0x7dc   :  { %v834_v3 = vmul.f32 %v3226_v2, %v3216_v41  ;;  %v3228_v7 = vpop.eup %3227 }
 0x7dd   :  { %v705_v12 = vmul.f32 %v3228_v7, %v3807_v24  ;;  %v3230_v28 = vpop.eup %3229  ;;  %v621_v24 = vpop.permute.xlu0 %620 }
 0x7de   :  { %2960 = vmatmul.msk.f32.gmra.mxu2 %vm408_vm14, %v834_v3  ;;  %v706_v10 = vmul.f32 %v3230_v28, %v3817_v37  ;;  %v627_v25 = vsel %vm369_vm12, %v3717_v22, %v621_v24 }
 0x7ec   :  { %v709_v9 = vpop.permute.xlu1 %708 }
 0x7ed   :  { %741 = vmatpush.msrb.mxu0 %v709_v9  ;;  %3097 = vmatpush.msra.mxu1 %v709_v9 }
 0x7ee   :  { %2949 = vmatmul.msk.f32.vlgmr.msrb.gmra.mxu0 %vm408_vm14, %v705_v12 }
 0x7f6   :  { %2950 = vmatmul.msk.f32.gmra.mxu0 %vm408_vm14, %v706_v10 }
 0x805   :  { %v477_v14 = vpop.f32.mrf.mxu1 }
 0x806   :  { %v625_v16 = vsel %vm369_vm12, %v477_v14, %v617_v13 }
 0x807   :  { %2961 = vmatmul.msk.f32.vlgmr.msrb.gmra.mxu3 %vm141_vm1, %v625_v16 }
 0x80a   :  { %v870_v17 = vpop.f32.mrf.mxu2 }
 0x80b   :  { %882 = vrot.lane.b32.xlu0 %v870_v17, %s3400_s23 }
 0x80f   :  { %2962 = vmatmul.msk.f32.gmra.mxu3 %vm141_vm1, %v626_v20 }
 0x812   :  { %v873_v23 = vpop.f32.mrf.mxu2 }
 0x813   :  { %884 = vrot.lane.b32.xlu0 %v873_v23, %s3400_s23 }
 0x817   :  { %2963 = vmatmul.msk.f32.gmra.mxu3 %vm141_vm1, %v627_v25  ;;  %v701_v26 = vpop.xlane.xlu1 %700 }
 0x818   :  { %3231 = vrcp.f32 %v701_v26 }
 0x81e   :  { %v3232_v31 = vpop.eup %3231 }
 0x81f   :  { %v707_v32 = vmul.f32 %v3232_v31, %v3224_v46  ;;  %v1116_v31 = vld [vmem:[%s4653_s11 + $0x18] sm:$0xff] }
 0x820   :  { %1151 = vmatpush.msrb.mxu1 %v1116_v31 }
 0x821   :  { %2951 = vmatmul.msk.f32.vlgmr.msra.gmra.mxu1 %vm408_vm14, %v707_v32 }
 0x861   :  { %v876_v33 = vpop.f32.mrf.mxu2 }
 0x862   :  { %886 = vrot.lane.b32.xlu2 %v876_v33, %s3400_s23 }
 0x86b   :  { %v743_v21 = vpop.f32.mrf.mxu0 }
 0x873   :  { %v746_v36 = vpop.f32.mrf.mxu0 }
 0x87d   :  { %v883_v34 = vpop.permute.xlu0 %882 }
 0x87e   :  { %v891_v35 = vsel %vm369_vm12, %v743_v21, %v883_v34  ;;  %v1115_v21 = vld [vmem:[%s4653_s11 + $0x10] sm:$0xff] }
 0x87f   :  { %2964 = vmatmul.msk.f32.gmra.mxu3 %vm141_vm1, %v891_v35  ;;  %1152 = vmatpush.msrb.mxu1 %v1115_v21  ;;  %v1114_v35 = vld [vmem:[%s4653_s11 + $0x8] sm:$0xff] }
 0x881   :  { %1153 = vmatpush.msrb.mxu1 %v1114_v35 }
 0x885   :  { %v885_v37 = vpop.permute.xlu0 %884 }
 0x886   :  { %v892_v22 = vsel %vm369_vm12, %v746_v36, %v885_v37 }
 0x887   :  { %2965 = vmatmul.msk.f32.gmra.mxu3 %vm141_vm1, %v892_v22  ;;  %v1113_v22 = vld [vmem:[%s4653_s11] sm:$0xff] }
 0x888   :  { %1154 = vmatpush.msrb.mxu1 %v1113_v22 }
 0x88a   :  { %v937_v39 = vpop.f32.mrf.mxu3 }
 0x88b   :  { %v938_v42 = vadd.f32 %v3155_v38, %v937_v39 }
 0x88d   :  { %v3868_v44 = vadd.f32 %v938_v42, %v3535_v11 }
 0x88f   :  { %v963_v41 = vsel %vm141_vm1, %v3868_v44, 0.0 }
 0x890   :  { %964 = vadd.xlane.f32.xlu1 %v963_v41 }
 0x892   :  { %v940_v30 = vpop.f32.mrf.mxu3 }
 0x893   :  { %v941_v45 = vadd.f32 %v3155_v38, %v940_v30 }
 0x895   :  { %v3873_v47 = vadd.f32 %v941_v45, %v3542_v15 }
 0x897   :  { %v966_v48 = vsel %vm141_vm1, %v3873_v47, 0.0 }
 0x898   :  { %967 = vadd.xlane.f32.xlu0 %v966_v48 }
 0x89a   :  { %v943_v50 = vpop.f32.mrf.mxu3 }
 0x89b   :  { %v944_v51 = vadd.f32 %v3155_v38, %v943_v50 }
 0x89d   :  { %v3878_v52 = vadd.f32 %v944_v51, %v3549_v19 }
 0x89e   :  { %v749_v56 = vpop.f32.mrf.mxu1 }
 0x89f   :  { %v969_v11 = vsel %vm141_vm1, %v3878_v52, 0.0 }
 0x8a0   :  { %970 = vadd.xlane.f32.xlu2 %v969_v11 }
 0x8bc   :  { %v887_v53 = vpop.permute.xlu2 %886 }
 0x8bd   :  { %v893_v40 = vsel %vm369_vm12, %v749_v56, %v887_v53 }
 0x8be   :  { %2966 = vmatmul.msk.f32.gmra.mxu3 %vm141_vm1, %v893_v40 }
 0x902   :  { %v946_v15 = vpop.f32.mrf.mxu3 }
 0x903   :  { %v947_v54 = vadd.f32 %v3155_v38, %v946_v15  ;;  %v965_v60 = vpop.xlane.xlu1 %964 }
 0x905   :  { %v3885_v8 = vadd.f32 %v947_v54, %v3670_v59 }
 0x907   :  { %v972_v55 = vsel %vm141_vm1, %v3885_v8, 0.0 }
 0x908   :  { %973 = vadd.xlane.f32.xlu1 %v972_v55 }
 0x90a   :  { %v949_v19 = vpop.f32.mrf.mxu3 }
 0x90b   :  { %v950_v46 = vadd.f32 %v3155_v38, %v949_v19  ;;  %v968_v6 = vpop.xlane.xlu0 %967 }
 0x90c   :  { %v982_v7 = vmul.f32 %v968_v6, %v3553_v27  ;;  %v3966_v6 = vld [vmem:[%s4652_s10] ss:$0 sm:$0xff] }
 0x90d   :  { %v3890_v57 = vadd.f32 %v950_v46, %v3644_v43  ;;  %v981_v43 = vmul.f32 %v965_v60, %v3553_v27  ;;  %v3959_v60 = vld [vmem:[%s4651_s9] ss:$0 sm:$0xff] }
 0x90e   :  { %v3914_v12 = vsub.f32 %v3873_v47, %v982_v7 }
 0x90f   :  { %v975_v61 = vsel %vm141_vm1, %v3890_v57, 0.0  ;;  %v3906_v3 = vsub.f32 %v3868_v44, %v981_v43 }
 0x910   :  { %976 = vadd.xlane.f32.xlu1 %v975_v61 }
 0x911   :  { %v993_v9 = vmul.f32 %v3906_v3, %v3906_v3 }
 0x913   :  { %v971_v58 = vpop.xlane.xlu2 %970  ;;  %v999_v28 = vsel %vm141_vm1, %v993_v9, 0.0 }
 0x914   :  { %v983_v62 = vmul.f32 %v971_v58, %v3553_v27 }
 0x916   :  { %v3896_v0 = vsub.f32 %v3878_v52, %v983_v62 }
 0x918   :  { %v995_v59 = vmul.f32 %v3896_v0, %v3896_v0 }
 0x91a   :  { %v1005_v4 = vsel %vm141_vm1, %v995_v59, 0.0 }
 0x91b   :  { %1006 = vadd.xlane.f32.xlu0 %v1005_v4 }
 0x941   :  { %v952_v63 = vpop.f32.mrf.mxu3 }
 0x942   :  { %v953_v1 = vadd.f32 %v3155_v38, %v952_v63 }
 0x944   :  { %v3903_v2 = vadd.f32 %v953_v1, %v3690_v29  ;;  %v994_v29 = vmul.f32 %v3914_v12, %v3914_v12 }
 0x946   :  { %v978_v5 = vsel %vm141_vm1, %v3903_v2, 0.0  ;;  %v1002_v10 = vsel %vm141_vm1, %v994_v29, 0.0 }
 0x947   :  { %979 = vadd.xlane.f32.xlu1 %v978_v5 }
 0x94f   :  { %1000 = vadd.xlane.f32.xlu1 %v999_v28 }
 0x957   :  { %1003 = vadd.xlane.f32.xlu1 %v1002_v10 }
 0x97b   :  { %v974_v13 = vpop.xlane.xlu1 %973 }
 0x97c   :  { %v984_v14 = vmul.f32 %v974_v13, %v3553_v27 }
 0x97e   :  { %v3922_v16 = vsub.f32 %v3885_v8, %v984_v14 }
 0x980   :  { %v996_v17 = vmul.f32 %v3922_v16, %v3922_v16 }
 0x982   :  { %v1008_v18 = vsel %vm141_vm1, %v996_v17, 0.0 }
 0x983   :  { %v977_v20 = vpop.xlane.xlu1 %976  ;;  %1009 = vadd.xlane.f32.xlu2 %v1008_v18 }
 0x984   :  { %v985_v23 = vmul.f32 %v977_v20, %v3553_v27 }
 0x986   :  { %v3929_v24 = vsub.f32 %v3890_v57, %v985_v23 }
 0x988   :  { %v997_v25 = vmul.f32 %v3929_v24, %v3929_v24 }
 0x98a   :  { %v1011_v26 = vsel %vm141_vm1, %v997_v25, 0.0 }
 0x98b   :  { %1012 = vadd.xlane.f32.xlu1 %v1011_v26 }
 0x98e   :  { %v1007_v32 = vpop.xlane.xlu0 %1006 }
 0x98f   :  { %v1019_v36 = vmul.f32 %v1007_v32, %v3553_v27 }
 0x991   :  { %v1025_v39 = vadd.f32 1e-06, %v1019_v36 }
 0x993   :  { %3233 = vrsqrt.f32 %v1025_v39  ;;  %vm1055_vm3 = vweird.f32 %v1025_v39 }
 0x999   :  { %v3234_v50 = vpop.eup %3233 }
 0x99a   :  { %v1050_v53 = vmul.f32 %v3234_v50, %v1025_v39  ;;  %vm1056_vm15 = vweird.f32 %v3234_v50 }
 0x99b   :  { %vm1057_vm4 = vmor %vm1055_vm3, %vm1056_vm15 }
 0x99c   :  { %v1051_v54 = vmul.f32 %v3234_v50, %v1050_v53 }
 0x99e   :  { %v1052_v61 = vmul.f32 0.5, %v1051_v54 }
 0x9a0   :  { %v1053_v43 = vsub.f32 1.5, %v1052_v61 }
 0x9a2   :  { %v1054_v28 = vmul.f32 %v3234_v50, %v1053_v43 }
 0x9a4   :  { %v1058_v13 = vsel %vm1057_vm4, %v3234_v50, %v1054_v28 }
 0x9a5   :  { %v1091_v18 = vmul.f32 %v1058_v13, %v3896_v0  ;;  %v1420_v13 = vld [vmem:[%s4655_s13 + $0x30] sm:$0xff] }
 0x9a7   :  { %v1100_v20 = vmul.f32 %v3959_v60, %v1091_v18 }
 0x9a9   :  { %v1109_v23 = vadd.f32 %v3966_v6, %v1100_v20 }
 0x9ba   :  { %v980_v33 = vpop.xlane.xlu1 %979 }
 0x9bb   :  { %v986_v34 = vmul.f32 %v980_v33, %v3553_v27 }
 0x9bd   :  { %v3946_v37 = vsub.f32 %v3903_v2, %v986_v34 }
 0x9bf   :  { %v998_v38 = vmul.f32 %v3946_v37, %v3946_v37 }
 0x9c1   :  { %v1014_v42 = vsel %vm141_vm1, %v998_v38, 0.0 }
 0x9c2   :  { %v1001_v41 = vpop.xlane.xlu1 %1000  ;;  %1015 = vadd.xlane.f32.xlu0 %v1014_v42 }
 0x9c3   :  { %v1017_v30 = vmul.f32 %v1001_v41, %v3553_v27 }
 0x9c5   :  { %v1023_v45 = vadd.f32 1e-06, %v1017_v30 }
 0x9c7   :  { %3235 = vrsqrt.f32 %v1023_v45  ;;  %vm1035_vm10 = vweird.f32 %v1023_v45 }
 0x9ca   :  { %v1004_v48 = vpop.xlane.xlu1 %1003 }
 0x9cb   :  { %v1018_v51 = vmul.f32 %v1004_v48, %v3553_v27 }
 0x9cd   :  { %v3236_v11 = vpop.eup %3235  ;;  %v1024_v56 = vadd.f32 1e-06, %v1018_v51 }
 0x9ce   :  { %v1030_v40 = vmul.f32 %v3236_v11, %v1023_v45  ;;  %vm1036_vm9 = vweird.f32 %v3236_v11 }
 0x9cf   :  { %3237 = vrsqrt.f32 %v1024_v56  ;;  %vm1037_vm11 = vmor %vm1035_vm10, %vm1036_vm9  ;;  %vm1045_vm0 = vweird.f32 %v1024_v56 }
 0x9d0   :  { %v1031_v15 = vmul.f32 %v3236_v11, %v1030_v40 }
 0x9d2   :  { %v1032_v55 = vmul.f32 0.5, %v1031_v15 }
 0x9d4   :  { %v1033_v19 = vsub.f32 1.5, %v1032_v55 }
 0x9d5   :  { %v3238_v46 = vpop.eup %3237 }
 0x9d6   :  { %v1034_v58 = vmul.f32 %v3236_v11, %v1033_v19  ;;  %v1040_v62 = vmul.f32 %v3238_v46, %v1024_v56  ;;  %vm1046_vm13 = vweird.f32 %v3238_v46 }
 0x9d7   :  { %vm1047_vm2 = vmor %vm1045_vm0, %vm1046_vm13 }
 0x9d8   :  { %v1038_v59 = vsel %vm1037_vm11, %v3236_v11, %v1034_v58  ;;  %v1041_v4 = vmul.f32 %v3238_v46, %v1040_v62 }
 0x9d9   :  { %v1089_v63 = vmul.f32 %v1038_v59, %v3906_v3 }
 0x9da   :  { %v1042_v1 = vmul.f32 0.5, %v1041_v4 }
 0x9db   :  { %v1098_v5 = vmul.f32 %v3959_v60, %v1089_v63 }
 0x9dc   :  { %v1043_v7 = vsub.f32 1.5, %v1042_v1  ;;  %v3996_v1 = vld [vmem:[%s4654_s12] ss:$0 sm:$0xff] }
 0x9dd   :  { %v1107_v9 = vadd.f32 %v3966_v6, %v1098_v5 }
 0x9de   :  { %v1044_v29 = vmul.f32 %v3238_v46, %v1043_v7 }
 0x9df   :  { %2967 = vmatmul.msk.f32.vlgmr.msrb.gmra.mxu1 %vm141_vm1, %v1107_v9 }
 0x9e0   :  { %v1048_v3 = vsel %vm1047_vm2, %v3238_v46, %v1044_v29 }
 0x9e1   :  { %v1090_v10 = vmul.f32 %v1048_v3, %v3914_v12  ;;  %v1421_v3 = vld [vmem:[%s4655_s13 + $0x38] sm:$0xff] }
 0x9e2   :  { %1453 = vmatpush.msra.mxu0 %v1421_v3 }
 0x9e3   :  { %v1099_v14 = vmul.f32 %v3959_v60, %v1090_v10 }
 0x9e4   :  { %1454 = vmatpush.msra.mxu0 %v1420_v13 }
 0x9e5   :  { %v1108_v17 = vadd.f32 %v3966_v6, %v1099_v14 }
 0x9e7   :  { %2968 = vmatmul.msk.f32.gmra.mxu1 %vm141_vm1, %v1108_v17  ;;  %v1419_v17 = vld [vmem:[%s4655_s13 + $0x28] sm:$0xff] }
 0x9e8   :  { %1455 = vmatpush.msra.mxu0 %v1419_v17 }
 0x9ef   :  { %2969 = vmatmul.msk.f32.gmra.mxu1 %vm141_vm1, %v1109_v23 }
 0x9f6   :  { %v1010_v25 = vpop.xlane.xlu2 %1009 }
 0x9f7   :  { %v1020_v26 = vmul.f32 %v1010_v25, %v3553_v27 }
 0x9f9   :  { %v1026_v31 = vadd.f32 1e-06, %v1020_v26  ;;  %v1418_v26 = vld [vmem:[%s4655_s13 + $0x20] sm:$0xff] }
 0x9fa   :  { %1456 = vmatpush.msra.mxu0 %v1418_v26 }
 0x9fb   :  { %3239 = vrsqrt.f32 %v1026_v31  ;;  %vm1065_vm6 = vweird.f32 %v1026_v31 }
 0x9fe   :  { %v1013_v12 = vpop.xlane.xlu1 %1012 }
 0x9ff   :  { %v1021_v32 = vmul.f32 %v1013_v12, %v3553_v27 }
 0xa01   :  { %v3240_v33 = vpop.eup %3239  ;;  %v1027_v21 = vadd.f32 1e-06, %v1021_v32 }
 0xa02   :  { %v1060_v34 = vmul.f32 %v3240_v33, %v1026_v31  ;;  %vm1066_vm5 = vweird.f32 %v3240_v33 }
 0xa03   :  { %3241 = vrsqrt.f32 %v1027_v21  ;;  %vm1067_vm7 = vmor %vm1065_vm6, %vm1066_vm5  ;;  %vm1075_vm9 = vweird.f32 %v1027_v21 }
 0xa04   :  { %v1061_v0 = vmul.f32 %v3240_v33, %v1060_v34 }
 0xa06   :  { %v1062_v35 = vmul.f32 0.5, %v1061_v0 }
 0xa08   :  { %v1063_v36 = vsub.f32 1.5, %v1062_v35 }
 0xa09   :  { %v3242_v22 = vpop.eup %3241 }
 0xa0a   :  { %v1064_v38 = vmul.f32 %v3240_v33, %v1063_v36  ;;  %v1070_v39 = vmul.f32 %v3242_v22, %v1027_v21  ;;  %vm1076_vm8 = vweird.f32 %v3242_v22 }
 0xa0b   :  { %vm1077_vm10 = vmor %vm1075_vm9, %vm1076_vm8 }
 0xa0c   :  { %v1068_v42 = vsel %vm1067_vm7, %v3240_v33, %v1064_v38  ;;  %v1071_v41 = vmul.f32 %v3242_v22, %v1070_v39  ;;  %v1417_v33 = vld [vmem:[%s4655_s13 + $0x18] sm:$0xff]  ;;  %v1415_v39 = vld [vmem:[%s4655_s13 + $0x8] sm:$0xff] }
 0xa0d   :  { %v1092_v30 = vmul.f32 %v1068_v42, %v3922_v16  ;;  %1457 = vmatpush.msra.mxu0 %v1417_v33 }
 0xa0e   :  { %v1072_v45 = vmul.f32 0.5, %v1071_v41 }
 0xa0f   :  { %v1101_v48 = vmul.f32 %v3959_v60, %v1092_v30 }
 0xa10   :  { %v1073_v50 = vsub.f32 1.5, %v1072_v45  ;;  %v1414_v45 = vld [vmem:[%s4655_s13] sm:$0xff] }
 0xa11   :  { %v1110_v51 = vadd.f32 %v3966_v6, %v1101_v48 }
 0xa12   :  { %v1074_v11 = vmul.f32 %v3242_v22, %v1073_v50 }
 0xa13   :  { %2970 = vmatmul.msk.f32.gmra.mxu1 %vm141_vm1, %v1110_v51 }
 0xa14   :  { %v1078_v56 = vsel %vm1077_vm10, %v3242_v22, %v1074_v11  ;;  %v1416_v22 = vld [vmem:[%s4655_s13 + $0x10] sm:$0xff] }
 0xa15   :  { %v1093_v53 = vmul.f32 %v1078_v56, %v3929_v24  ;;  %1458 = vmatpush.msra.mxu0 %v1416_v22 }
 0xa17   :  { %v1102_v40 = vmul.f32 %v3959_v60, %v1093_v53  ;;  %1459 = vmatpush.msra.mxu0 %v1415_v39 }
 0xa19   :  { %v1111_v15 = vadd.f32 %v3966_v6, %v1102_v40  ;;  %1460 = vmatpush.msra.mxu0 %v1414_v45 }
 0xa1b   :  { %2971 = vmatmul.msk.f32.gmra.mxu1 %vm141_vm1, %v1111_v15 }
 0xa35   :  { %v1016_v16 = vpop.xlane.xlu0 %1015 }
 0xa36   :  { %v1022_v54 = vmul.f32 %v1016_v16, %v3553_v27 }
 0xa38   :  { %v1028_v55 = vadd.f32 1e-06, %v1022_v54 }
 0xa3a   :  { %3243 = vrsqrt.f32 %v1028_v55  ;;  %vm1085_vm13 = vweird.f32 %v1028_v55 }
 0xa40   :  { %v3244_v19 = vpop.eup %3243 }
 0xa41   :  { %v1080_v46 = vmul.f32 %v3244_v19, %v1028_v55  ;;  %vm1086_vm11 = vweird.f32 %v3244_v19 }
 0xa42   :  { %vm1087_vm15 = vmor %vm1085_vm13, %vm1086_vm11 }
 0xa43   :  { %v1081_v61 = vmul.f32 %v3244_v19, %v1080_v46 }
 0xa45   :  { %v1082_v58 = vmul.f32 0.5, %v1081_v61 }
 0xa47   :  { %v1083_v62 = vsub.f32 1.5, %v1082_v58 }
 0xa49   :  { %v1084_v59 = vmul.f32 %v3244_v19, %v1083_v62 }
 0xa4b   :  { %v1088_v24 = vsel %vm1087_vm15, %v3244_v19, %v1084_v59 }
 0xa4c   :  { %v1094_v4 = vmul.f32 %v1088_v24, %v3946_v37 }
 0xa4e   :  { %v1103_v63 = vmul.f32 %v3959_v60, %v1094_v4 }
 0xa50   :  { %v1112_v43 = vadd.f32 %v3966_v6, %v1103_v63 }
 0xa52   :  { %2972 = vmatmul.msk.f32.gmra.mxu1 %vm141_vm1, %v1112_v43 }
 0xa5c   :  { %v1156_v5 = vpop.f32.mrf.mxu1 }
 0xa5d   :  { %v3999_v7 = vadd.f32 %v3996_v1, %v1156_v5 }
 0xa5f   :  { %v4002_v9 = vmul.f32 0.70710677, %v3999_v7 }
 0xa61   :  { %v1186_v37 = vand.u32 2147483647, %v4002_v9  ;;  %vm1384_vm15 = vcmp.lt.f32.partialorder %v4002_v9, 0.0 }
 0xa63   :  { %v1192_v28 = vmul.f32 0.3275911, %v1186_v37  ;;  %v1348_v11 = vsub.f32 0.0, %v1186_v37 }
 0xa64   :  { %v1159_v60 = vpop.f32.mrf.mxu1 }
 0xa65   :  { %v1198_v29 = vadd.f32 1.0, %v1192_v28  ;;  %v4006_v6 = vadd.f32 %v3996_v1, %v1159_v60  ;;  %v1354_v54 = vmul.f32 %v1348_v11, %v1186_v37 }
 0xa67   :  { %3245 = vrcp.f32 %v1198_v29  ;;  %v4012_v10 = vmul.f32 0.70710677, %v4006_v6  ;;  %v1215_v34 = vand.u32 2147483648, %v1198_v29  ;;  %v1213_v36 = vand.u32 2147483647, %v1198_v29 }
 0xa68   :  { %vm1209_vm2 = vweird.f32 %v1198_v29  ;;  %v1360_v4 = vmul.f32 1.442695, %v1354_v54 }
 0xa69   :  { %v4018_v14 = vand.u32 2147483647, %v4012_v10  ;;  %v1216_v41 = vor.u32 1.1754944e-38, %v1215_v34  ;;  %vm1214_vm4 = vcmp.eq.f32.partialorder %v1213_v36, 8.507059e+37 }
 0xa6b   :  { %v1193_v18 = vmul.f32 0.3275911, %v4018_v14  ;;  %v1349_v5 = vsub.f32 0.0, %v4018_v14 }
 0xa6c   :  { %v1162_v20 = vpop.f32.mrf.mxu1 }
 0xa6d   :  { %v3246_v23 = vpop.eup %3245  ;;  %v4025_v25 = vadd.f32 %v3996_v1, %v1162_v20  ;;  %v1199_v12 = vadd.f32 1.0, %v1193_v18 }
 0xa6e   :  { %v1205_v31 = vmul.f32 %v3246_v23, %v1198_v29  ;;  %vm1210_vm0 = vweird.f32 %v3246_v23 }
 0xa6f   :  { %v4031_v32 = vmul.f32 0.70710677, %v4025_v25  ;;  %3247 = vrcp.f32 %v1199_v12  ;;  %vm1211_vm3 = vmor %vm1209_vm2, %vm1210_vm0  ;;  %v1230_v16 = vand.u32 2147483648, %v1199_v12  ;;  %v1228_v19 = vand.u32 2147483647, %v1199_v12 }
 0xa70   :  { %v1206_v21 = vsub.f32 1.0, %v1205_v31  ;;  %vm1224_vm6 = vweird.f32 %v1199_v12  ;;  %vm1426_vm0 = vcmask 523264   ;;  %vm1385_vm2 = vcmp.lt.f32.partialorder %v4012_v10, 0.0 }
 0xa71   :  { %v4037_v0 = vand.u32 2147483647, %v4031_v32  ;;  %v1231_v59 = vor.u32 1.1754944e-38, %v1230_v16  ;;  %vm1229_vm8 = vcmp.eq.f32.partialorder %v1228_v19, 8.507059e+37  ;;  %v1174_v19 = vmul.f32 0.5, %v3999_v7 }
 0xa72   :  { %v1207_v35 = vmul.f32 %v3246_v23, %v1206_v21 }
 0xa73   :  { %v1194_v38 = vmul.f32 0.3275911, %v4037_v0  ;;  %v1350_v34 = vsub.f32 0.0, %v4037_v0 }
 0xa74   :  { %v1208_v42 = vadd.f32 %v3246_v23, %v1207_v35 }
 0xa75   :  { %v1200_v30 = vadd.f32 1.0, %v1194_v38  ;;  %v3248_v48 = vpop.eup %3247 }
 0xa76   :  { %v1212_v50 = vsel %vm1211_vm3, %v3246_v23, %v1208_v42  ;;  %v1220_v56 = vmul.f32 %v3248_v48, %v1199_v12  ;;  %vm1225_vm5 = vweird.f32 %v3248_v48  ;;  %v1355_v23 = vmul.f32 %v1349_v5, %v4018_v14 }
 0xa77   :  { %v1217_v51 = vsel %vm1214_vm4, %v1216_v41, %v1212_v50  ;;  %3249 = vrcp.f32 %v1200_v30  ;;  %vm1226_vm7 = vmor %vm1224_vm6, %vm1225_vm5  ;;  %v1245_v37 = vand.u32 2147483648, %v1200_v30  ;;  %v1243_v17 = vand.u32 2147483647, %v1200_v30 }
 0xa78   :  { %v1294_v53 = vmul.f32 1.0614054, %v1217_v51  ;;  %v1221_v40 = vsub.f32 1.0, %v1220_v56  ;;  %3251 = vpow2.f32 %v1360_v4  ;;  %vm1239_vm10 = vweird.f32 %v1200_v30 }
 0xa79   :  { %v1246_v31 = vor.u32 1.1754944e-38, %v1245_v37  ;;  %vm1244_vm13 = vcmp.eq.f32.partialorder %v1243_v17, 8.507059e+37  ;;  %v1362_v38 = vmul.f32 1.442695, %v1355_v23  ;;  %v1356_v14 = vmul.f32 %v1350_v34, %v4037_v0 }
 0xa7a   :  { %v2973_v15 = vadd.f32 -1.4531521, %v1294_v53  ;;  %v1222_v55 = vmul.f32 %v3248_v48, %v1221_v40  ;;  %vm1386_vm3 = vcmp.lt.f32.partialorder %v4031_v32, 0.0 }
 0xa7b   :  { %3253 = vpow2.f32 %v1362_v38 }
 0xa7c   :  { %v1306_v46 = vmul.f32 %v2973_v15, %v1217_v51  ;;  %v1223_v58 = vadd.f32 %v3248_v48, %v1222_v55  ;;  %v1364_v15 = vmul.f32 1.442695, %v1356_v14 }
 0xa7d   :  { %v3250_v61 = vpop.eup %3249 }
 0xa7e   :  { %v1312_v62 = vadd.f32 1.4214138, %v1306_v46  ;;  %v1235_v24 = vmul.f32 %v3250_v61, %v1200_v30  ;;  %v1227_v63 = vsel %vm1226_vm7, %v3248_v48, %v1223_v58  ;;  %vm1240_vm9 = vweird.f32 %v3250_v61  ;;  %v3252_v42 = vpop.eup %3251 }
 0xa7f   :  { %v1232_v60 = vsel %vm1229_vm8, %v1231_v59, %v1227_v63  ;;  %vm1241_vm11 = vmor %vm1239_vm10, %vm1240_vm9  ;;  %3255 = vpow2.f32 %v1364_v15 }
 0xa80   :  { %v1318_v43 = vmul.f32 %v1312_v62, %v1217_v51  ;;  %v1236_v28 = vsub.f32 1.0, %v1235_v24  ;;  %v1295_v29 = vmul.f32 1.0614054, %v1232_v60 }
 0xa81   :  { %v3254_v58 = vpop.eup %3253 }
 0xa82   :  { %v2979_v3 = vadd.f32 -0.28449672, %v1318_v43  ;;  %v1237_v13 = vmul.f32 %v3250_v61, %v1236_v28  ;;  %v2974_v18 = vadd.f32 -1.4531521, %v1295_v29 }
 0xa84   :  { %v1330_v20 = vmul.f32 %v2979_v3, %v1217_v51  ;;  %v1238_v26 = vadd.f32 %v3250_v61, %v1237_v13  ;;  %v1307_v12 = vmul.f32 %v2974_v18, %v1232_v60  ;;  %v1175_v18 = vmul.f32 0.5, %v4006_v6 }
 0xa85   :  { %v3256_v29 = vpop.eup %3255 }
 0xa86   :  { %v1336_v33 = vadd.f32 0.2548296, %v1330_v20  ;;  %v1242_v21 = vsel %vm1241_vm11, %v3250_v61, %v1238_v26  ;;  %v1313_v35 = vadd.f32 1.4214138, %v1307_v12 }
 0xa87   :  { %v1247_v36 = vsel %vm1244_vm13, %v1246_v31, %v1242_v21 }
 0xa88   :  { %v1342_v22 = vmul.f32 %v1336_v33, %v1217_v51  ;;  %v1296_v39 = vmul.f32 1.0614054, %v1247_v36  ;;  %v1319_v41 = vmul.f32 %v1313_v35, %v1232_v60 }
 0xa8a   :  { %v1372_v45 = vmul.f32 %v3252_v42, %v1342_v22  ;;  %v2975_v48 = vadd.f32 -1.4531521, %v1296_v39  ;;  %v2980_v30 = vadd.f32 -0.28449672, %v1319_v41  ;;  %v1176_v22 = vmul.f32 0.5, %v4025_v25 }
 0xa8c   :  { %v1378_v50 = vsub.f32 1.0, %v1372_v45  ;;  %v1308_v11 = vmul.f32 %v2975_v48, %v1247_v36  ;;  %v1331_v56 = vmul.f32 %v2980_v30, %v1232_v60 }
 0xa8e   :  { %v1390_v53 = vsub.f32 0.0, %v1378_v50  ;;  %v1314_v40 = vadd.f32 1.4214138, %v1308_v11  ;;  %v1337_v16 = vadd.f32 0.2548296, %v1331_v56 }
 0xa90   :  { %v1396_v51 = vsel %vm1384_vm15, %v1390_v53, %v1378_v50  ;;  %v1165_v54 = vpop.f32.mrf.mxu1  ;;  %v1320_v55 = vmul.f32 %v1314_v40, %v1247_v36  ;;  %v1343_v0 = vmul.f32 %v1337_v16, %v1232_v60 }
 0xa91   :  { %v1402_v46 = vadd.f32 1.0, %v1396_v51  ;;  %v4056_v61 = vadd.f32 %v3996_v1, %v1165_v54 }
 0xa92   :  { %v2981_v62 = vadd.f32 -0.28449672, %v1320_v55  ;;  %v1373_v9 = vmul.f32 %v3254_v58, %v1343_v0 }
 0xa93   :  { %v1408_v59 = vmul.f32 %v1402_v46, %v1174_v19  ;;  %v4059_v24 = vmul.f32 0.70710677, %v4056_v61 }
 0xa94   :  { %v1332_v4 = vmul.f32 %v2981_v62, %v1247_v36  ;;  %v1379_v7 = vsub.f32 1.0, %v1373_v9 }
 0xa95   :  { %v1189_v63 = vand.u32 2147483647, %v4059_v24  ;;  %2985 = vmatmul.msk.f32.vlgmr.msra.gmra.mxu0 %vm1426_vm0, %v1408_v59  ;;  %vm1387_vm13 = vcmp.lt.f32.partialorder %v4059_v24, 0.0 }
 0xa96   :  { %v1338_v43 = vadd.f32 0.2548296, %v1332_v4  ;;  %v1391_v28 = vsub.f32 0.0, %v1379_v7 }
 0xa97   :  { %v1195_v5 = vmul.f32 0.3275911, %v1189_v63  ;;  %v1351_v11 = vsub.f32 0.0, %v1189_v63 }
 0xa98   :  { %v1168_v60 = vpop.f32.mrf.mxu1  ;;  %v1344_v37 = vmul.f32 %v1338_v43, %v1247_v36  ;;  %v1397_v17 = vsel %vm1385_vm2, %v1391_v28, %v1379_v7 }
 0xa99   :  { %v1201_v3 = vadd.f32 1.0, %v1195_v5  ;;  %v4065_v13 = vadd.f32 %v3996_v1, %v1168_v60  ;;  %v1403_v20 = vadd.f32 1.0, %v1397_v17  ;;  %v1357_v51 = vmul.f32 %v1351_v11, %v1189_v63 }
 0xa9a   :  { %v1374_v23 = vmul.f32 %v3256_v29, %v1344_v37 }
 0xa9b   :  { %3257 = vrcp.f32 %v1201_v3  ;;  %v4069_v26 = vmul.f32 0.70710677, %v4065_v13  ;;  %v1409_v31 = vmul.f32 %v1403_v20, %v1175_v18  ;;  %v1260_v42 = vand.u32 2147483648, %v1201_v3 }
 0xa9c   :  { %v1380_v12 = vsub.f32 1.0, %v1374_v23  ;;  %v1258_v48 = vand.u32 2147483647, %v1201_v3  ;;  %vm1254_vm5 = vweird.f32 %v1201_v3  ;;  %v1366_v62 = vmul.f32 1.442695, %v1357_v51 }
 0xa9d   :  { %v1190_v10 = vand.u32 2147483647, %v4069_v26  ;;  %2986 = vmatmul.msk.f32.gmra.mxu0 %vm1426_vm0, %v1409_v31  ;;  %v1261_v32 = vor.u32 1.1754944e-38, %v1260_v42  ;;  %vm1388_vm15 = vcmp.lt.f32.partialorder %v4069_v26, 0.0 }
 0xa9e   :  { %v1392_v33 = vsub.f32 0.0, %v1380_v12  ;;  %vm1259_vm7 = vcmp.eq.f32.partialorder %v1258_v48, 8.507059e+37 }
 0xa9f   :  { %v1196_v21 = vmul.f32 0.3275911, %v1190_v10  ;;  %v1352_v9 = vsub.f32 0.0, %v1190_v10 }
 0xaa0   :  { %v1398_v35 = vsel %vm1386_vm3, %v1392_v33, %v1380_v12 }
 0xaa1   :  { %v3258_v34 = vpop.eup %3257  ;;  %v1202_v6 = vadd.f32 1.0, %v1196_v21  ;;  %v1404_v38 = vadd.f32 1.0, %v1398_v35  ;;  %v1358_v63 = vmul.f32 %v1352_v9, %v1190_v10  ;;  %v1177_v10 = vmul.f32 0.5, %v4056_v61 }
 0xaa2   :  { %v1250_v36 = vmul.f32 %v3258_v34, %v1201_v3  ;;  %vm1255_vm4 = vweird.f32 %v3258_v34 }
 0xaa3   :  { %3259 = vrcp.f32 %v1202_v6  ;;  %v1410_v41 = vmul.f32 %v1404_v38, %v1176_v22  ;;  %vm1256_vm6 = vmor %vm1254_vm5, %vm1255_vm4  ;;  %v1275_v15 = vand.u32 2147483648, %v1202_v6  ;;  %v1273_v55 = vand.u32 2147483647, %v1202_v6 }
 0xaa4   :  { %v1251_v39 = vsub.f32 1.0, %v1250_v36  ;;  %vm1269_vm9 = vweird.f32 %v1202_v6  ;;  %3261 = vpow2.f32 %v1366_v62  ;;  %v1368_v17 = vmul.f32 1.442695, %v1358_v63 }
 0xaa5   :  { %2987 = vmatmul.msk.f32.gmra.mxu0 %vm1426_vm0, %v1410_v41  ;;  %v1276_v0 = vor.u32 1.1754944e-38, %v1275_v15  ;;  %vm1274_vm11 = vcmp.eq.f32.partialorder %v1273_v55, 8.507059e+37 }
 0xaa6   :  { %v1252_v45 = vmul.f32 %v3258_v34, %v1251_v39  ;;  %3263 = vpow2.f32 %v1368_v17 }
 0xaa8   :  { %v1253_v14 = vadd.f32 %v3258_v34, %v1252_v45 }
 0xaa9   :  { %v3260_v30 = vpop.eup %3259 }
 0xaaa   :  { %v1257_v50 = vsel %vm1256_vm6, %v3258_v34, %v1253_v14  ;;  %v1265_v56 = vmul.f32 %v3260_v30, %v1202_v6  ;;  %vm1270_vm8 = vweird.f32 %v3260_v30  ;;  %v3262_v20 = vpop.eup %3261  ;;  %v1178_v14 = vmul.f32 0.5, %v4065_v13 }
 0xaab   :  { %v1262_v25 = vsel %vm1259_vm7, %v1261_v32, %v1257_v50  ;;  %vm1271_vm10 = vmor %vm1269_vm9, %vm1270_vm8 }
 0xaac   :  { %v1297_v53 = vmul.f32 1.0614054, %v1262_v25  ;;  %v1266_v40 = vsub.f32 1.0, %v1265_v56  ;;  %v3264_v38 = vpop.eup %3263 }
 0xaae   :  { %v2976_v16 = vadd.f32 -1.4531521, %v1297_v53  ;;  %v1267_v54 = vmul.f32 %v3260_v30, %v1266_v40 }
 0xab0   :  { %v1309_v19 = vmul.f32 %v2976_v16, %v1262_v25  ;;  %v1268_v46 = vadd.f32 %v3260_v30, %v1267_v54 }
 0xab2   :  { %v1315_v58 = vadd.f32 1.4214138, %v1309_v19  ;;  %v1272_v59 = vsel %vm1271_vm10, %v3260_v30, %v1268_v46 }
 0xab3   :  { %v1277_v7 = vsel %vm1274_vm11, %v1276_v0, %v1272_v59 }
 0xab4   :  { %v1321_v4 = vmul.f32 %v1315_v58, %v1262_v25  ;;  %v1298_v43 = vmul.f32 1.0614054, %v1277_v7 }
 0xab6   :  { %v2982_v5 = vadd.f32 -0.28449672, %v1321_v4  ;;  %v2977_v28 = vadd.f32 -1.4531521, %v1298_v43 }
 0xab8   :  { %v1333_v60 = vmul.f32 %v2982_v5, %v1262_v25  ;;  %v1310_v37 = vmul.f32 %v2977_v28, %v1277_v7 }
 0xaba   :  { %v1339_v29 = vadd.f32 0.2548296, %v1333_v60  ;;  %v1316_v3 = vadd.f32 1.4214138, %v1310_v37 }
 0xabc   :  { %v1345_v18 = vmul.f32 %v1339_v29, %v1262_v25  ;;  %v1322_v23 = vmul.f32 %v1316_v3, %v1277_v7 }
 0xabe   :  { %v1375_v31 = vmul.f32 %v3262_v20, %v1345_v18  ;;  %v2983_v12 = vadd.f32 -0.28449672, %v1322_v23  ;;  %v3159_v23 = vld [vmem:[%s4656_s14] ss:$0 sm:$0xff] }
 0xac0   :  { %v1381_v33 = vsub.f32 1.0, %v1375_v31  ;;  %v1334_v21 = vmul.f32 %v2983_v12, %v1277_v7 }
 0xac2   :  { %v1393_v34 = vsub.f32 0.0, %v1381_v33  ;;  %v1340_v35 = vadd.f32 0.2548296, %v1334_v21 }
 0xac4   :  { %v1399_v36 = vsel %vm1387_vm13, %v1393_v34, %v1381_v33  ;;  %v1346_v22 = vmul.f32 %v1340_v35, %v1277_v7 }
 0xac5   :  { %v1405_v6 = vadd.f32 1.0, %v1399_v36 }
 0xac6   :  { %v1376_v42 = vmul.f32 %v3264_v38, %v1346_v22 }
 0xac7   :  { %v1411_v39 = vmul.f32 %v1405_v6, %v1177_v10 }
 0xac8   :  { %v1382_v41 = vsub.f32 1.0, %v1376_v42 }
 0xac9   :  { %2988 = vmatmul.msk.f32.gmra.mxu0 %vm1426_vm0, %v1411_v39 }
 0xaca   :  { %v1394_v45 = vsub.f32 0.0, %v1382_v41 }
 0xacc   :  { %v1400_v48 = vsel %vm1388_vm15, %v1394_v45, %v1382_v41 }
 0xacd   :  { %v1406_v32 = vadd.f32 1.0, %v1400_v48 }
 0xacf   :  { %v1171_v24 = vpop.f32.mrf.mxu1  ;;  %v1412_v50 = vmul.f32 %v1406_v32, %v1178_v14 }
 0xad0   :  { %v1172_v30 = vadd.f32 %v3996_v1, %v1171_v24 }
 0xad1   :  { %2989 = vmatmul.msk.f32.gmra.mxu0 %vm1426_vm0, %v1412_v50 }
 0xad2   :  { %v1185_v61 = vmul.f32 0.70710677, %v1172_v30  ;;  %v1179_v17 = vmul.f32 0.5, %v1172_v30 }
 0xad4   :  { %v1191_v11 = vand.u32 2147483647, %v1185_v61  ;;  %vm1389_vm6 = vcmp.lt.f32.partialorder %v1185_v61, 0.0 }
 0xad6   :  { %v1197_v56 = vmul.f32 0.3275911, %v1191_v11  ;;  %v1353_v55 = vsub.f32 0.0, %v1191_v11 }
 0xad8   :  { %v1203_v25 = vadd.f32 1.0, %v1197_v56  ;;  %v1359_v58 = vmul.f32 %v1353_v55, %v1191_v11 }
 0xada   :  { %3265 = vrcp.f32 %v1203_v25  ;;  %v1290_v16 = vand.u32 2147483648, %v1203_v25  ;;  %v1288_v51 = vand.u32 2147483647, %v1203_v25  ;;  %vm1284_vm3 = vweird.f32 %v1203_v25 }
 0xadb   :  { %v1370_v9 = vmul.f32 1.442695, %v1359_v58 }
 0xadc   :  { %v1291_v54 = vor.u32 1.1754944e-38, %v1290_v16  ;;  %vm1289_vm5 = vcmp.eq.f32.partialorder %v1288_v51, 8.507059e+37 }
 0xadd   :  { %3267 = vpow2.f32 %v1370_v9 }
 0xae0   :  { %v3266_v53 = vpop.eup %3265 }
 0xae1   :  { %v1280_v40 = vmul.f32 %v3266_v53, %v1203_v25  ;;  %vm1285_vm2 = vweird.f32 %v3266_v53 }
 0xae2   :  { %vm1286_vm4 = vmor %vm1284_vm3, %vm1285_vm2 }
 0xae3   :  { %v1281_v15 = vsub.f32 1.0, %v1280_v40  ;;  %v3268_v63 = vpop.eup %3267 }
 0xae5   :  { %v1282_v26 = vmul.f32 %v3266_v53, %v1281_v15 }
 0xae7   :  { %v1283_v13 = vadd.f32 %v3266_v53, %v1282_v26 }
 0xae9   :  { %v1287_v1 = vsel %vm1286_vm4, %v3266_v53, %v1283_v13 }
 0xaea   :  { %v1292_v19 = vsel %vm1289_vm5, %v1291_v54, %v1287_v1 }
 0xaeb   :  { %v1299_v46 = vmul.f32 1.0614054, %v1292_v19 }
 0xaed   :  { %v2978_v0 = vadd.f32 -1.4531521, %v1299_v46 }
 0xaef   :  { %v1311_v62 = vmul.f32 %v2978_v0, %v1292_v19 }
 0xaf1   :  { %v1317_v59 = vadd.f32 1.4214138, %v1311_v62 }
 0xaf3   :  { %v1323_v4 = vmul.f32 %v1317_v59, %v1292_v19 }
 0xaf5   :  { %v2984_v7 = vadd.f32 -0.28449672, %v1323_v4 }
 0xaf7   :  { %v1335_v43 = vmul.f32 %v2984_v7, %v1292_v19  ;;  %v2996_v7 = vld [vmem:[%s4647_s5 + $0x38] sm:$0xff] }
 0xaf8   :  { %1680 = vmatpush.msra.mxu2 %v2996_v7 }
 0xaf9   :  { %v1341_v5 = vadd.f32 0.2548296, %v1335_v43 }
 0xafb   :  { %v1347_v28 = vmul.f32 %v1341_v5, %v1292_v19 }
 0xafd   :  { %v1377_v60 = vmul.f32 %v3268_v63, %v1347_v28  ;;  %v2995_v28 = vld [vmem:[%s4647_s5 + $0x30] sm:$0xff] }
 0xafe   :  { %1681 = vmatpush.msra.mxu2 %v2995_v28 }
 0xaff   :  { %v1383_v37 = vsub.f32 1.0, %v1377_v60  ;;  %v2994_v60 = vld [vmem:[%s4647_s5 + $0x28] sm:$0xff] }
 0xb00   :  { %1682 = vmatpush.msra.mxu2 %v2994_v60 }
 0xb01   :  { %v1395_v29 = vsub.f32 0.0, %v1383_v37 }
 0xb03   :  { %v1401_v3 = vsel %vm1389_vm6, %v1395_v29, %v1383_v37  ;;  %v2993_v29 = vld [vmem:[%s4647_s5 + $0x20] sm:$0xff] }
 0xb04   :  { %v1407_v18 = vadd.f32 1.0, %v1401_v3  ;;  %1683 = vmatpush.msra.mxu2 %v2993_v29 }
 0xb06   :  { %v1413_v20 = vmul.f32 %v1407_v18, %v1179_v17 }
 0xb08   :  { %2990 = vmatmul.msk.f32.gmra.mxu0 %vm1426_vm0, %v1413_v20 }
 0xb12   :  { %v1462_v31 = vpop.f32.mrf.mxu0 }
 0xb13   :  { %v1463_v12 = vadd.f32 %v3159_v23, %v1462_v31 }
 0xb15   :  { %v4088_v33 = vadd.f32 %v1463_v12, %v3868_v44 }
 0xb17   :  { %v1490_v21 = vsel %vm141_vm1, %v4088_v33, 0.0 }
 0xb18   :  { %1491 = vadd.xlane.f32.xlu2 %v1490_v21 }
 0xb1a   :  { %v1465_v34 = vpop.f32.mrf.mxu0 }
 0xb1b   :  { %v1466_v35 = vadd.f32 %v3159_v23, %v1465_v34 }
 0xb1d   :  { %v4093_v36 = vadd.f32 %v1466_v35, %v3873_v47 }
 0xb1f   :  { %v1493_v10 = vsel %vm141_vm1, %v4093_v36, 0.0 }
 0xb20   :  { %1494 = vadd.xlane.f32.xlu1 %v1493_v10 }
 0xb22   :  { %v1468_v6 = vpop.f32.mrf.mxu0 }
 0xb23   :  { %v1469_v22 = vadd.f32 %v3159_v23, %v1468_v6 }
 0xb25   :  { %v4098_v38 = vadd.f32 %v1469_v22, %v3878_v52 }
 0xb27   :  { %v1496_v44 = vsel %vm141_vm1, %v4098_v38, 0.0 }
 0xb28   :  { %1497 = vadd.xlane.f32.xlu0 %v1496_v44 }
 0xb46   :  { %v1471_v39 = vpop.f32.mrf.mxu0 }
 0xb47   :  { %v1472_v42 = vadd.f32 %v3159_v23, %v1471_v39 }
 0xb49   :  { %v4103_v41 = vadd.f32 %v1472_v42, %v3885_v8 }
 0xb4b   :  { %v1499_v47 = vsel %vm141_vm1, %v4103_v41, 0.0 }
 0xb4c   :  { %1500 = vadd.xlane.f32.xlu2 %v1499_v47  ;;  %v4177_v47 = vld [vmem:[%s4673_s25 + $0x1] ss:$0 sm:$0xff] }
 0xb4e   :  { %v1474_v45 = vpop.f32.mrf.mxu0 }
 0xb4f   :  { %v1475_v48 = vadd.f32 %v3159_v23, %v1474_v45 }
 0xb51   :  { %v4108_v14 = vadd.f32 %v1475_v48, %v3890_v57 }
 0xb53   :  { %v1502_v52 = vsel %vm141_vm1, %v4108_v14, 0.0 }
 0xb54   :  { %1503 = vadd.xlane.f32.xlu1 %v1502_v52 }
 0xb85   :  { %v1477_v32 = vpop.f32.mrf.mxu0 }
 0xb86   :  { %v1478_v24 = vadd.f32 %v3159_v23, %v1477_v32 }
 0xb88   :  { %v4113_v30 = vadd.f32 %v1478_v24, %v3903_v2 }
 0xb8a   :  { %v1505_v8 = vsel %vm141_vm1, %v4113_v30, 0.0 }
 0xb8b   :  { %1506 = vadd.xlane.f32.xlu0 %v1505_v8  ;;  %v1492_v50 = vpop.xlane.xlu2 %1491  ;;  %v4183_v8 = vld [vmem:[%s4646_s4 + $0x1] ss:$0 sm:$0xff] }
 0xb8c   :  { %v1508_v61 = vmul.f32 %v1492_v50, %v3553_v27 }
 0xb8e   :  { %v4119_v11 = vsub.f32 %v4088_v33, %v1508_v61 }
 0xb90   :  { %v1520_v57 = vmul.f32 %v4119_v11, %v4119_v11 }
 0xb92   :  { %v1526_v56 = vsel %vm141_vm1, %v1520_v57, 0.0 }
 0xb93   :  { %1527 = vadd.xlane.f32.xlu2 %v1526_v56  ;;  %v1495_v25 = vpop.xlane.xlu1 %1494 }
 0xb94   :  { %v1509_v2 = vmul.f32 %v1495_v25, %v3553_v27 }
 0xb96   :  { %v4126_v53 = vsub.f32 %v4093_v36, %v1509_v2 }
 0xb98   :  { %v1521_v40 = vmul.f32 %v4126_v53, %v4126_v53 }
 0xb9a   :  { %v1529_v15 = vsel %vm141_vm1, %v1521_v40, 0.0 }
 0xb9b   :  { %1530 = vadd.xlane.f32.xlu1 %v1529_v15  ;;  %v1498_v16 = vpop.xlane.xlu0 %1497 }
 0xb9c   :  { %v1510_v26 = vmul.f32 %v1498_v16, %v3553_v27 }
 0xb9e   :  { %v4133_v51 = vsub.f32 %v4098_v38, %v1510_v26 }
 0xba0   :  { %v1522_v13 = vmul.f32 %v4133_v51, %v4133_v51 }
 0xba2   :  { %v1532_v54 = vsel %vm141_vm1, %v1522_v13, 0.0 }
 0xba3   :  { %1533 = vadd.xlane.f32.xlu0 %v1532_v54 }
 0xbbf   :  { %v1501_v1 = vpop.xlane.xlu2 %1500 }
 0xbc0   :  { %v1511_v55 = vmul.f32 %v1501_v1, %v3553_v27 }
 0xbc2   :  { %v4140_v19 = vsub.f32 %v4103_v41, %v1511_v55 }
 0xbc4   :  { %v1523_v46 = vmul.f32 %v4140_v19, %v4140_v19 }
 0xbc6   :  { %v1535_v0 = vsel %vm141_vm1, %v1523_v46, 0.0 }
 0xbc7   :  { %1536 = vadd.xlane.f32.xlu2 %v1535_v0  ;;  %v1504_v58 = vpop.xlane.xlu1 %1503 }
 0xbc8   :  { %v1512_v62 = vmul.f32 %v1504_v58, %v3553_v27 }
 0xbca   :  { %v4147_v59 = vsub.f32 %v4108_v14, %v1512_v62 }
 0xbcc   :  { %v1524_v9 = vmul.f32 %v4147_v59, %v4147_v59 }
 0xbce   :  { %v1538_v4 = vsel %vm141_vm1, %v1524_v9, 0.0 }
 0xbcf   :  { %1539 = vadd.xlane.f32.xlu1 %v1538_v4 }
 0xbfe   :  { %v1507_v43 = vpop.xlane.xlu0 %1506 }
 0xbff   :  { %v1513_v5 = vmul.f32 %v1507_v43, %v3553_v27 }
 0xc01   :  { %v4160_v63 = vsub.f32 %v4113_v30, %v1513_v5 }
 0xc03   :  { %v1525_v37 = vmul.f32 %v4160_v63, %v4160_v63 }
 0xc05   :  { %v1541_v3 = vsel %vm141_vm1, %v1525_v37, 0.0 }
 0xc06   :  { %1542 = vadd.xlane.f32.xlu0 %v1541_v3  ;;  %v1528_v17 = vpop.xlane.xlu2 %1527 }
 0xc07   :  { %v1544_v18 = vmul.f32 %v1528_v17, %v3553_v27 }
 0xc09   :  { %v1550_v20 = vadd.f32 1e-06, %v1544_v18 }
 0xc0b   :  { %3269 = vrsqrt.f32 %v1550_v20  ;;  %vm1562_vm8 = vweird.f32 %v1550_v20 }
 0xc0e   :  { %v1531_v23 = vpop.xlane.xlu1 %1530 }
 0xc0f   :  { %v1545_v31 = vmul.f32 %v1531_v23, %v3553_v27 }
 0xc11   :  { %v3270_v12 = vpop.eup %3269  ;;  %v1551_v34 = vadd.f32 1e-06, %v1545_v31 }
 0xc12   :  { %v1557_v21 = vmul.f32 %v3270_v12, %v1550_v20  ;;  %vm1563_vm7 = vweird.f32 %v3270_v12 }
 0xc13   :  { %3271 = vrsqrt.f32 %v1551_v34  ;;  %vm1564_vm9 = vmor %vm1562_vm8, %vm1563_vm7  ;;  %vm1572_vm11 = vweird.f32 %v1551_v34 }
 0xc14   :  { %v1558_v35 = vmul.f32 %v3270_v12, %v1557_v21 }
 0xc16   :  { %v1559_v10 = vmul.f32 0.5, %v1558_v35  ;;  %v1534_v22 = vpop.xlane.xlu0 %1533 }
 0xc17   :  { %v1546_v44 = vmul.f32 %v1534_v22, %v3553_v27 }
 0xc18   :  { %v1560_v6 = vsub.f32 1.5, %v1559_v10 }
 0xc19   :  { %v3272_v39 = vpop.eup %3271  ;;  %v1552_v48 = vadd.f32 1e-06, %v1546_v44 }
 0xc1a   :  { %v1561_v42 = vmul.f32 %v3270_v12, %v1560_v6  ;;  %v1567_v45 = vmul.f32 %v3272_v39, %v1551_v34  ;;  %vm1573_vm10 = vweird.f32 %v3272_v39 }
 0xc1b   :  { %3273 = vrsqrt.f32 %v1552_v48  ;;  %vm1574_vm13 = vmor %vm1572_vm11, %vm1573_vm10  ;;  %vm1582_vm2 = vweird.f32 %v1552_v48 }
 0xc1c   :  { %v1565_v52 = vsel %vm1564_vm9, %v3270_v12, %v1561_v42  ;;  %v1568_v24 = vmul.f32 %v3272_v39, %v1567_v45 }
 0xc1d   :  { %v1616_v32 = vmul.f32 %v1565_v52, %v4119_v11 }
 0xc1e   :  { %v1569_v61 = vmul.f32 0.5, %v1568_v24 }
 0xc1f   :  { %v1625_v50 = vmul.f32 %v4177_v47, %v1616_v32 }
 0xc20   :  { %v1570_v57 = vsub.f32 1.5, %v1569_v61 }
 0xc21   :  { %v1634_v56 = vadd.f32 %v4183_v8, %v1625_v50  ;;  %v3274_v25 = vpop.eup %3273 }
 0xc22   :  { %v1571_v2 = vmul.f32 %v3272_v39, %v1570_v57  ;;  %v1577_v11 = vmul.f32 %v3274_v25, %v1552_v48  ;;  %vm1583_vm15 = vweird.f32 %v3274_v25 }
 0xc23   :  { %2998 = vmatmul.msk.f32.vlgmr.msra.gmra.mxu2 %vm141_vm1, %v1634_v56  ;;  %vm1584_vm3 = vmor %vm1582_vm2, %vm1583_vm15 }
 0xc24   :  { %v1575_v40 = vsel %vm1574_vm13, %v3272_v39, %v1571_v2  ;;  %v1578_v15 = vmul.f32 %v3274_v25, %v1577_v11  ;;  %v3162_v2 = vld [vmem:[%s4648_s6 + $0x1] ss:$0 sm:$0xff] }
 0xc25   :  { %v1617_v16 = vmul.f32 %v1575_v40, %v4126_v53 }
 0xc26   :  { %v1579_v26 = vmul.f32 0.5, %v1578_v15 }
 0xc27   :  { %v1626_v13 = vmul.f32 %v4177_v47, %v1617_v16 }
 0xc28   :  { %v1580_v54 = vsub.f32 1.5, %v1579_v26 }
 0xc29   :  { %v1635_v1 = vadd.f32 %v4183_v8, %v1626_v13 }
 0xc2a   :  { %v1581_v55 = vmul.f32 %v3274_v25, %v1580_v54 }
 0xc2b   :  { %2999 = vmatmul.msk.f32.gmra.mxu2 %vm141_vm1, %v1635_v1 }
 0xc2c   :  { %v1585_v46 = vsel %vm1584_vm3, %v3274_v25, %v1581_v55 }
 0xc2d   :  { %v1618_v0 = vmul.f32 %v1585_v46, %v4133_v51 }
 0xc2f   :  { %v1627_v58 = vmul.f32 %v4177_v47, %v1618_v0 }
 0xc31   :  { %v1636_v62 = vadd.f32 %v4183_v8, %v1627_v58 }
 0xc33   :  { %3000 = vmatmul.msk.f32.gmra.mxu2 %vm141_vm1, %v1636_v62 }
 0xc3a   :  { %v1537_v53 = vpop.xlane.xlu2 %1536 }
 0xc3b   :  { %v1547_v9 = vmul.f32 %v1537_v53, %v3553_v27 }
 0xc3d   :  { %v1553_v4 = vadd.f32 1e-06, %v1547_v9 }
 0xc3f   :  { %3275 = vrsqrt.f32 %v1553_v4  ;;  %vm1592_vm5 = vweird.f32 %v1553_v4 }
 0xc42   :  { %v1540_v7 = vpop.xlane.xlu1 %1539 }
 0xc43   :  { %v1548_v43 = vmul.f32 %v1540_v7, %v3553_v27 }
 0xc45   :  { %v3276_v5 = vpop.eup %3275  ;;  %v1554_v60 = vadd.f32 1e-06, %v1548_v43 }
 0xc46   :  { %v1587_v28 = vmul.f32 %v3276_v5, %v1553_v4  ;;  %vm1593_vm4 = vweird.f32 %v3276_v5 }
 0xc47   :  { %3277 = vrsqrt.f32 %v1554_v60  ;;  %vm1594_vm6 = vmor %vm1592_vm5, %vm1593_vm4  ;;  %vm1602_vm8 = vweird.f32 %v1554_v60 }
 0xc48   :  { %v1588_v37 = vmul.f32 %v3276_v5, %v1587_v28 }
 0xc4a   :  { %v1589_v51 = vmul.f32 0.5, %v1588_v37 }
 0xc4c   :  { %v1590_v29 = vsub.f32 1.5, %v1589_v51 }
 0xc4d   :  { %v3278_v3 = vpop.eup %3277 }
 0xc4e   :  { %v1591_v17 = vmul.f32 %v3276_v5, %v1590_v29  ;;  %v1597_v18 = vmul.f32 %v3278_v3, %v1554_v60  ;;  %vm1603_vm7 = vweird.f32 %v3278_v3 }
 0xc4f   :  { %vm1604_vm9 = vmor %vm1602_vm8, %vm1603_vm7 }
 0xc50   :  { %v1595_v20 = vsel %vm1594_vm6, %v3276_v5, %v1591_v17  ;;  %v1598_v23 = vmul.f32 %v3278_v3, %v1597_v18 }
 0xc51   :  { %v1619_v31 = vmul.f32 %v1595_v20, %v4140_v19 }
 0xc52   :  { %v1599_v12 = vmul.f32 0.5, %v1598_v23 }
 0xc53   :  { %v1628_v21 = vmul.f32 %v4177_v47, %v1619_v31 }
 0xc54   :  { %v1600_v34 = vsub.f32 1.5, %v1599_v12 }
 0xc55   :  { %v1637_v35 = vadd.f32 %v4183_v8, %v1628_v21 }
 0xc56   :  { %v1601_v10 = vmul.f32 %v3278_v3, %v1600_v34 }
 0xc57   :  { %3001 = vmatmul.msk.f32.gmra.mxu2 %vm141_vm1, %v1637_v35 }
 0xc58   :  { %v1605_v6 = vsel %vm1604_vm9, %v3278_v3, %v1601_v10 }
 0xc59   :  { %v1620_v22 = vmul.f32 %v1605_v6, %v4147_v59 }
 0xc5b   :  { %v1629_v44 = vmul.f32 %v4177_v47, %v1620_v22 }
 0xc5d   :  { %v1638_v39 = vadd.f32 %v4183_v8, %v1629_v44 }
 0xc5f   :  { %3002 = vmatmul.msk.f32.gmra.mxu2 %vm141_vm1, %v1638_v39 }
 0xc79   :  { %v1543_v19 = vpop.xlane.xlu0 %1542 }
 0xc7a   :  { %v1549_v42 = vmul.f32 %v1543_v19, %v3553_v27 }
 0xc7c   :  { %v1555_v45 = vadd.f32 1e-06, %v1549_v42 }
 0xc7e   :  { %3279 = vrsqrt.f32 %v1555_v45  ;;  %vm1612_vm11 = vweird.f32 %v1555_v45 }
 0xc84   :  { %v3280_v48 = vpop.eup %3279 }
 0xc85   :  { %v1607_v52 = vmul.f32 %v3280_v48, %v1555_v45  ;;  %vm1613_vm10 = vweird.f32 %v3280_v48 }
 0xc86   :  { %vm1614_vm13 = vmor %vm1612_vm11, %vm1613_vm10 }
 0xc87   :  { %v1608_v32 = vmul.f32 %v3280_v48, %v1607_v52 }
 0xc89   :  { %v1609_v24 = vmul.f32 0.5, %v1608_v32 }
 0xc8b   :  { %v1610_v50 = vsub.f32 1.5, %v1609_v24 }
 0xc8d   :  { %v1611_v61 = vmul.f32 %v3280_v48, %v1610_v50 }
 0xc8f   :  { %v1615_v59 = vsel %vm1614_vm13, %v3280_v48, %v1611_v61 }
 0xc90   :  { %v1621_v57 = vmul.f32 %v1615_v59, %v4160_v63 }
 0xc92   :  { %v1630_v56 = vmul.f32 %v4177_v47, %v1621_v57 }
 0xc94   :  { %v1639_v25 = vadd.f32 %v4183_v8, %v1630_v56 }
 0xc96   :  { %3003 = vmatmul.msk.f32.gmra.mxu2 %vm141_vm1, %v1639_v25 }
 0xca6   :  { %v1685_v11 = vpop.f32.mrf.mxu2 }
 0xca7   :  { %v4214_v40 = vadd.f32 %v3162_v2, %v1685_v11 }
 0xca9   :  { %1833 = vrot.lane.b32.xlu0 %v4214_v40, %s3396_s21 }
 0xcae   :  { %v1688_v15 = vpop.f32.mrf.mxu2 }
 0xcaf   :  { %v4218_v16 = vadd.f32 %v3162_v2, %v1688_v15 }
 0xcb1   :  { %1835 = vrot.lane.b32.xlu1 %v4218_v16, %s3396_s21  ;;  %1829 = vrot.lane.b32.xlu0 %v4218_v16, %s3398_s22 }
 0xcb6   :  { %v1691_v63 = vpop.f32.mrf.mxu2 }
 0xcb7   :  { %v4224_v47 = vadd.f32 %v3162_v2, %v1691_v63 }
 0xcb9   :  { %1837 = vrot.lane.b32.xlu2 %v4224_v47, %s3396_s21 }
 0xcc1   :  { %1827 = vrot.lane.b32.xlu2 %v4214_v40, %s3398_s22 }
 0xcc9   :  { %1831 = vrot.lane.b32.xlu2 %v4224_v47, %s3398_s22 }
 0xcda   :  { %v1694_v8 = vpop.f32.mrf.mxu2 }
 0xcdb   :  { %v4232_v26 = vadd.f32 %v3162_v2, %v1694_v8 }
 0xcdd   :  { %2093 = vrot.lane.b32.xlu2 %v4232_v26, %s3398_s22 }
 0xce2   :  { %v1697_v13 = vpop.f32.mrf.mxu2 }
 0xce3   :  { %v4236_v54 = vadd.f32 %v3162_v2, %v1697_v13 }
 0xce5   :  { %1706 = vrot.lane.b32.xlu2 %v4214_v40, %s3394_s29  ;;  %2101 = vrot.lane.b32.xlu0 %v4236_v54, %s3396_s21 }
 0xced   :  { %1972 = vrot.lane.b32.xlu2 %v4232_v26, %s3394_s29  ;;  %1710 = vrot.lane.b32.xlu0 %v4224_v47, %s3394_s29 }
 0xd13   :  { %v1838_v1 = vpop.permute.xlu2 %1837 }
 0xd14   :  { %3013 = vmatpush.xpose.msk.msrb.mxu0 %vm369_vm12, %v1838_v1  ;;  %v3127_v1 = vpack.i.bf16 %v4218_v16, %v4224_v47 }
 0xd19   :  { %v1700_v55 = vpop.f32.mrf.mxu2 }
 0xd1a   :  { %v4247_v46 = vadd.f32 %v3162_v2, %v1700_v55 }
 0xd1b   :  { %v1834_v58 = vpop.permute.xlu0 %1833  ;;  %v1828_v62 = vpop.permute.xlu2 %1827 }
 0xd1c   :  { %2103 = vrot.lane.b32.xlu1 %v4247_v46, %s3396_s21  ;;  %1976 = vrot.lane.b32.xlu0 %v4247_v46, %s3394_s29  ;;  %v3137_v55 = vpack.i.bf16 %v4247_v46, %v4214_v40 }
 0xd23   :  { %v1836_v0 = vpop.permute.xlu1 %1835  ;;  %v1830_v53 = vpop.permute.xlu0 %1829 }
 0xd24   :  { %2099 = vrot.lane.b32.xlu1 %v4232_v26, %s3396_s21  ;;  %3014 = vmatpush.xpose.msk.msrb.mxu0 %vm369_vm12, %v1836_v0  ;;  %v1832_v9 = vpop.permute.xlu2 %1831  ;;  %v3132_v0 = vpack.i.bf16 %v4232_v26, %v4236_v54 }
 0xd28   :  { %3015 = vmatpush.xpose.msk.msrb.mxu0 %vm369_vm12, %v1834_v58 }
 0xd2b   :  { %3016 = vmatmul.msk.f32.vlgmr.msrb.gmra.mxu0 %vm369_vm12, %v1828_v62 }
 0xd2c   :  { %1708 = vrot.lane.b32.xlu1 %v4218_v16, %s3394_s29 }
 0xd33   :  { %3017 = vmatmul.msk.f32.gmra.mxu0 %vm369_vm12, %v1830_v53 }
 0xd34   :  { %1974 = vrot.lane.b32.xlu1 %v4236_v54, %s3394_s29 }
 0xd37   :  { %v2094_v28 = vpop.permute.xlu2 %2093 }
 0xd3b   :  { %3018 = vmatmul.msk.f32.gmra.mxu0 %vm369_vm12, %v1832_v9 }
 0xd3f   :  { %v1707_v37 = vpop.permute.xlu2 %1706 }
 0xd47   :  { %v1973_v18 = vpop.permute.xlu2 %1972 }
 0xd57   :  { %v2102_v4 = vpop.permute.xlu0 %2101 }
 0xd5f   :  { %v1711_v7 = vpop.permute.xlu0 %1710 }
 0xd60   :  { %3004 = vmatpush.xpose.msk.msra.mxu3 %vm369_vm12, %v1711_v7 }
 0xd8e   :  { %v2104_v43 = vpop.permute.xlu1 %2103  ;;  %v1977_v51 = vpop.permute.xlu0 %1976 }
 0xd8f   :  { %3031 = vmatpush.xpose.msk.msra.mxu0 %vm369_vm12, %v2104_v43 }
 0xd93   :  { %3032 = vmatpush.xpose.msk.msra.mxu0 %vm369_vm12, %v2102_v4 }
 0xd96   :  { %v2100_v5 = vpop.permute.xlu1 %2099 }
 0xd97   :  { %3033 = vmatpush.xpose.msk.msra.mxu0 %vm369_vm12, %v2100_v5 }
 0xd9a   :  { %3034 = vmatmul.msk.f32.vlgmr.msra.gmra.mxu0 %vm369_vm12, %v2094_v28 }
 0xd9e   :  { %v1709_v60 = vpop.permute.xlu1 %1708 }
 0xd9f   :  { %3005 = vmatpush.xpose.msk.msra.mxu3 %vm369_vm12, %v1709_v60 }
 0xda3   :  { %3006 = vmatpush.xpose.msk.msra.mxu3 %vm369_vm12, %v1707_v37 }
 0xda6   :  { %v1975_v29 = vpop.permute.xlu1 %1974  ;;  %3007 = vmatmul.msk.f32.vlgmr.msra.gmra.mxu3 %vm369_vm12, %v4214_v40 }
 0xda7   :  { %3022 = vmatpush.xpose.msk.msrb.mxu3 %vm369_vm12, %v1977_v51 }
 0xda8   :  { %v1868_v3 = vpop.f32.mrf.mxu0 }
 0xda9   :  { %v1869_v17 = vadd.f32 %v1868_v3, %v3650_v49 }
 0xdab   :  { %3023 = vmatpush.xpose.msk.msrb.mxu3 %vm369_vm12, %v1975_v29  ;;  %v1877_v20 = vsel %vm408_vm14, %v1869_v17, -inf }
 0xdac   :  { %1878 = vmax.xlane.f32.xlu0 %v1877_v20 }
 0xdae   :  { %3008 = vmatmul.msk.f32.gmra.mxu3 %vm369_vm12, %v4218_v16 }
 0xdaf   :  { %3024 = vmatpush.xpose.msk.msrb.mxu3 %vm369_vm12, %v1973_v18 }
 0xdb0   :  { %v1871_v23 = vpop.f32.mrf.mxu0 }
 0xdb1   :  { %v1872_v31 = vadd.f32 %v1871_v23, %v3650_v49 }
 0xdb3   :  { %v1880_v12 = vsel %vm408_vm14, %v1872_v31, -inf }
 0xdb4   :  { %1881 = vmax.xlane.f32.xlu1 %v1880_v12 }
 0xdb6   :  { %3009 = vmatmul.msk.f32.gmra.mxu3 %vm369_vm12, %v4224_v47 }
 0xdb8   :  { %v1874_v21 = vpop.f32.mrf.mxu0 }
 0xdb9   :  { %v1875_v34 = vadd.f32 %v1874_v21, %v3650_v49 }
 0xdbb   :  { %v1883_v35 = vsel %vm408_vm14, %v1875_v34, -inf }
 0xdbc   :  { %1884 = vmax.xlane.f32.xlu2 %v1883_v35 }
 0xdbe   :  { %3025 = vmatmul.msk.f32.vlgmr.msrb.gmra.mxu3 %vm369_vm12, %v4232_v26 }
 0xdc6   :  { %3026 = vmatmul.msk.f32.gmra.mxu3 %vm369_vm12, %v4236_v54 }
 0xdce   :  { %3027 = vmatmul.msk.f32.gmra.mxu3 %vm369_vm12, %v4247_v46 }
 0xe17   :  { %v2134_v58 = vpop.f32.mrf.mxu0 }
 0xe18   :  { %v2135_v62 = vadd.f32 %v2134_v58, %v3650_v49 }
 0xe1a   :  { %v2143_v53 = vsel %vm408_vm14, %v2135_v62, -inf }
 0xe1f   :  { %v1879_v10 = vpop.xlane.xlu0 %1878 }
 0xe20   :  { %v1886_v6 = vsub.f32 %v1869_v17, %v1879_v10 }
 0xe22   :  { %v1889_v22 = vmul.f32 1.442695, %v1886_v6 }
 0xe24   :  { %3281 = vpow2.f32 %v1889_v22 }
 0xe27   :  { %v1882_v44 = vpop.xlane.xlu1 %1881 }
 0xe28   :  { %v1887_v39 = vsub.f32 %v1872_v31, %v1882_v44 }
 0xe29   :  { %v1741_v19 = vpop.f32.mrf.mxu3 }
 0xe2a   :  { %v1742_v42 = vadd.f32 %v1741_v19, %v3650_v49  ;;  %v4293_v45 = vpop.eup %3281  ;;  %v1891_v48 = vmul.f32 1.442695, %v1887_v39 }
 0xe2b   :  { %v1895_v52 = vsel %vm408_vm14, %v4293_v45, 0.0 }
 0xe2c   :  { %v1750_v32 = vsel %vm408_vm14, %v1742_v42, -inf  ;;  %3283 = vpow2.f32 %v1891_v48  ;;  %1896 = vadd.xlane.f32.xlu2 %v1895_v52 }
 0xe2d   :  { %1751 = vmax.xlane.f32.xlu1 %v1750_v32  ;;  %v3147_v32 = vpack.i.bf16 %v4236_v54, %v4247_v46 }
 0xe2f   :  { %v1885_v24 = vpop.xlane.xlu2 %1884 }
 0xe30   :  { %v1888_v57 = vsub.f32 %v1875_v34, %v1885_v24 }
 0xe31   :  { %v1744_v50 = vpop.f32.mrf.mxu3 }
 0xe32   :  { %v1745_v61 = vadd.f32 %v1744_v50, %v3650_v49  ;;  %v4299_v59 = vpop.eup %3283  ;;  %v1893_v2 = vmul.f32 1.442695, %v1888_v57 }
 0xe33   :  { %v1898_v56 = vsel %vm408_vm14, %v4299_v59, 0.0 }
 0xe34   :  { %v1753_v25 = vsel %vm408_vm14, %v1745_v61, -inf  ;;  %1899 = vadd.xlane.f32.xlu2 %v1898_v56  ;;  %3285 = vpow2.f32 %v1893_v2 }
 0xe35   :  { %1754 = vmax.xlane.f32.xlu0 %v1753_v25 }
 0xe39   :  { %v1747_v11 = vpop.f32.mrf.mxu3 }
 0xe3a   :  { %v4305_v15 = vadd.f32 %v1747_v11, %v3650_v49  ;;  %v3286_v8 = vpop.eup %3285 }
 0xe3b   :  { %v1901_v13 = vsel %vm408_vm14, %v3286_v8, 0.0 }
 0xe3c   :  { %v1756_v63 = vsel %vm408_vm14, %v4305_v15, -inf }
 0xe3d   :  { %1757 = vmax.xlane.f32.xlu0 %v1756_v63 }
 0xe41   :  { %v2007_v9 = vpop.f32.mrf.mxu3 }
 0xe42   :  { %v2008_v16 = vadd.f32 %v2007_v9, %v3650_v49 }
 0xe44   :  { %v2016_v47 = vsel %vm408_vm14, %v2008_v16, -inf }
 0xe45   :  { %1902 = vadd.xlane.f32.xlu0 %v1901_v13 }
 0xe46   :  { %3128 = vrot.lane.b32.xlu1 %v3127_v1, %s3399_s2 }
 0xe4c   :  { %3138 = vrot.lane.b32.xlu2 %v3137_v55, %s3399_s2 }
 0xe59   :  { %3133 = vrot.lane.b32.xlu0 %v3132_v0, %s3399_s2  ;;  %s3401_s2 = smov [#allocation2]  }
 0xe83   :  { %2144 = vmax.xlane.f32.xlu0 %v2143_v53 }
 0xe8b   :  { %2017 = vmax.xlane.f32.xlu0 %v2016_v47 }
 0xe9f   :  { %3143 = vrot.lane.b32.xlu0 %v3127_v1, %s3395_s30  ;;  %v1897_v5 = vpop.xlane.xlu2 %1896 }
 0xea0   :  { %v1752_v4 = vpop.xlane.xlu1 %1751 }
 0xea1   :  { %v1759_v7 = vsub.f32 %v1742_v42, %v1752_v4 }
 0xea3   :  { %v1762_v43 = vmul.f32 1.442695, %v1759_v7 }
 0xea5   :  { %3287 = vpow2.f32 %v1762_v43 }
 0xea6   :  { %3289 = vrcp.f32 %v1897_v5 }
 0xea7   :  { %v1900_v51 = vpop.xlane.xlu2 %1899 }
 0xea8   :  { %v1755_v37 = vpop.xlane.xlu0 %1754  ;;  %3291 = vrcp.f32 %v1900_v51 }
 0xea9   :  { %v1760_v29 = vsub.f32 %v1745_v61, %v1755_v37 }
 0xeab   :  { %v4324_v28 = vpop.eup %3287  ;;  %v1764_v31 = vmul.f32 1.442695, %v1760_v29 }
 0xeac   :  { %v1768_v60 = vsel %vm408_vm14, %v4324_v28, 0.0  ;;  %v3290_v23 = vpop.eup %3289 }
 0xead   :  { %1769 = vadd.xlane.f32.xlu2 %v1768_v60  ;;  %v1907_v34 = vmul.f32 %v3290_v23, %v4293_v45  ;;  %3293 = vpow2.f32 %v1764_v31 }
 0xeae   :  { %v3292_v6 = vpop.eup %3291 }
 0xeaf   :  { %v3139_v20 = vpop.permute.xlu2 %3138  ;;  %v1908_v44 = vmul.f32 %v3292_v6, %v4299_v59 }
 0xeb0   :  { %v4328_v3 = vpop.xlane.xlu0 %1757  ;;  %v3140_v21 = vunpack.i.l.bf16 %v3139_v20  ;;  %v3141_v35 = vunpack.i.h.bf16 %v3139_v20 }
 0xeb1   :  { %v1761_v0 = vsub.f32 %v4305_v15, %v4328_v3 }
 0xeb3   :  { %v4332_v22 = vpop.eup %3293  ;;  %v1766_v58 = vmul.f32 1.442695, %v1761_v0 }
 0xeb4   :  { %v1771_v39 = vsel %vm408_vm14, %v4332_v22, 0.0 }
 0xeb8   :  { %v3129_v17 = vpop.permute.xlu1 %3128  ;;  %v1903_v10 = vpop.xlane.xlu0 %1902 }
 0xeb9   :  { %v3130_v18 = vunpack.i.l.bf16 %v3129_v17  ;;  %v3131_v12 = vunpack.i.h.bf16 %v3129_v17  ;;  %3295 = vrcp.f32 %v1903_v10 }
 0xebb   :  { %1941 = vmatpush.msrb.mxu2 %v3130_v18 }
 0xebd   :  { %1942 = vmatpush.msrb.mxu2 %v3131_v12 }
 0xebf   :  { %1943 = vmatpush.msrb.mxu2 %v3140_v21  ;;  %v3296_v19 = vpop.eup %3295 }
 0xec0   :  { %3019 = vmatmul.msk.f32.vlgmr.msrb.gmra.mxu2 %vm408_vm14, %v1907_v34  ;;  %v1909_v48 = vmul.f32 %v3296_v19, %v3286_v8  ;;  %v3041_v19 = vld [vmem:[%s4649_s7 + $0x28] sm:$0xff] }
 0xec1   :  { %2207 = vmatpush.msra.mxu2 %v3141_v35 }
 0xec5   :  { %2095 = vrot.lane.b32.xlu2 %v4236_v54, %s3398_s22 }
 0xec8   :  { %3020 = vmatmul.msk.f32.gmra.mxu2 %vm408_vm14, %v1908_v44  ;;  %v3043_v44 = vld [vmem:[%s4649_s7 + $0x38] sm:$0xff] }
 0xec9   :  { %1772 = vadd.xlane.f32.xlu0 %v1771_v39  ;;  %v3042_v39 = vld [vmem:[%s4649_s7 + $0x30] sm:$0xff]  ;;  %2275 = vmatpush.msra.mxu3 %v3043_v44 }
 0xecb   :  { %v3134_v42 = vpop.permute.xlu0 %3133  ;;  %2276 = vmatpush.msra.mxu3 %v3042_v39 }
 0xecc   :  { %v3135_v45 = vunpack.i.l.bf16 %v3134_v42  ;;  %v3136_v52 = vunpack.i.h.bf16 %v3134_v42  ;;  %v3040_v42 = vld [vmem:[%s4649_s7 + $0x20] sm:$0xff]  ;;  %s2904_s7 = sshll.u32 %s4661_s19, 4  ;;  %s2905_s7 = int_to_ptr.hbm [resolvable:$true] %s2904_s7 }
 0xecd   :  { %2097 = vrot.lane.b32.xlu2 %v4247_v46, %s3398_s22  ;;  %2277 = vmatpush.msra.mxu3 %v3041_v19 }
 0xece   :  { %2208 = vmatpush.msra.mxu2 %v3135_v45 }
 0xecf   :  { %2278 = vmatpush.msra.mxu3 %v3040_v42 }
 0xed0   :  { %3021 = vmatmul.msk.f32.gmra.mxu2 %vm408_vm14, %v1909_v48 }
 0xed1   :  { %2209 = vmatpush.msra.mxu2 %v3136_v52 }
 0xed5   :  { %3148 = vrot.lane.b32.xlu2 %v3147_v32, %s3395_s30 }
 0xef6   :  { %v2145_v24 = vpop.xlane.xlu0 %2144 }
 0xef7   :  { %v2152_v50 = vsub.f32 %v2135_v62, %v2145_v24 }
 0xef9   :  { %v2155_v61 = vmul.f32 1.442695, %v2152_v50 }
 0xefb   :  { %3297 = vpow2.f32 %v2155_v61 }
 0xefe   :  { %v2018_v59 = vpop.xlane.xlu0 %2017 }
 0xeff   :  { %v2025_v57 = vsub.f32 %v2008_v16, %v2018_v59 }
 0xf01   :  { %v3298_v56 = vpop.eup %3297  ;;  %v2028_v25 = vmul.f32 1.442695, %v2025_v57 }
 0xf02   :  { %v2161_v2 = vsel %vm408_vm14, %v3298_v56, 0.0 }
 0xf03   :  { %3299 = vpow2.f32 %v2028_v25  ;;  %2162 = vadd.xlane.f32.xlu1 %v2161_v2  ;;  %v2010_v25 = vpop.f32.mrf.mxu3 }
 0xf04   :  { %3301 = vpow2.f32 %v1766_v58 }
 0xf09   :  { %v4347_v11 = vpop.eup %3299 }
 0xf0a   :  { %v2034_v63 = vsel %vm408_vm14, %v4347_v11, 0.0  ;;  %v3302_v62 = vpop.eup %3301 }
 0xf0b   :  { %2035 = vadd.xlane.f32.xlu0 %v2034_v63 }
 0xf11   :  { %v3144_v54 = vpop.permute.xlu0 %3143 }
 0xf12   :  { %v3145_v46 = vunpack.i.l.bf16 %v3144_v54  ;;  %v3146_v8 = vunpack.i.h.bf16 %v3144_v54  ;;  %v2011_v54 = vadd.f32 %v2010_v25, %v3650_v49 }
 0xf14   :  { %1814 = vmatpush.msra.mxu1 %v3145_v46 }
 0xf16   :  { %1815 = vmatpush.msra.mxu1 %v3146_v8 }
 0xf1c   :  { %1783 = vrot.lane.b32.xlu1 %v4214_v40, %s3395_s30  ;;  %v1774_v40 = vsel %vm408_vm14, %v3302_v62, 0.0 }
 0xf1f   :  { %2049 = vrot.lane.b32.xlu0 %v4232_v26, %s3395_s30 }
 0xf20   :  { %v1770_v13 = vpop.xlane.xlu2 %1769 }
 0xf28   :  { %v2096_v1 = vpop.permute.xlu2 %2095 }
 0xf29   :  { %3035 = vmatmul.msk.f32.gmra.mxu0 %vm369_vm12, %v2096_v1 }
 0xf30   :  { %v2098_v55 = vpop.permute.xlu2 %2097 }
 0xf31   :  { %3036 = vmatmul.msk.f32.gmra.mxu0 %vm369_vm12, %v2098_v55  ;;  %v2019_v55 = vsel %vm408_vm14, %v2011_v54, -inf }
 0xf38   :  { %v3149_v43 = vpop.permute.xlu2 %3148 }
 0xf39   :  { %v3150_v51 = vunpack.i.l.bf16 %v3149_v43  ;;  %v3151_v29 = vunpack.i.h.bf16 %v3149_v43 }
 0xf3c   :  { %v1773_v15 = vpop.xlane.xlu0 %1772 }
 0xf43   :  { %v1945_v53 = vpop.f32.mrf.mxu2 }
 0xf44   :  { %1957 = vrot.lane.b32.xlu2 %v1945_v53, %s3400_s23 }
 0xf46   :  { %1775 = vadd.xlane.f32.xlu1 %v1774_v40 }
 0xf4b   :  { %v1948_v26 = vpop.f32.mrf.mxu2 }
 0xf4c   :  { %1959 = vrot.lane.b32.xlu2 %v1948_v26, %s3400_s23 }
 0xf53   :  { %v1951_v9 = vpop.f32.mrf.mxu2 }
 0xf54   :  { %1961 = vrot.lane.b32.xlu0 %v1951_v9, %s3400_s23 }
 0xf76   :  { %v2163_v16 = vpop.xlane.xlu1 %2162 }
 0xf77   :  { %3303 = vrcp.f32 %v2163_v16 }
 0xf78   :  { %3305 = vrcp.f32 %v1770_v13  ;;  %v2013_v13 = vpop.f32.mrf.mxu3 }
 0xf79   :  { %3307 = vrcp.f32 %v1773_v15  ;;  %v2014_v0 = vadd.f32 %v2013_v13, %v3650_v49 }
 0xf7b   :  { %v2022_v58 = vsel %vm408_vm14, %v2014_v0, -inf }
 0xf7d   :  { %v3304_v47 = vpop.eup %3303 }
 0xf7e   :  { %v2173_v4 = vmul.f32 %v3304_v47, %v3298_v56  ;;  %v3306_v7 = vpop.eup %3305  ;;  %v2036_v5 = vpop.xlane.xlu0 %2035 }
 0xf7f   :  { %v1780_v60 = vmul.f32 %v3306_v7, %v4324_v28  ;;  %v3308_v3 = vpop.eup %3307 }
 0xf80   :  { %3037 = vmatmul.msk.f32.vlgmr.msra.gmra.mxu2 %vm408_vm14, %v2173_v4  ;;  %v1781_v18 = vmul.f32 %v3308_v3, %v4332_v22 }
 0xf8e   :  { %v1784_v37 = vpop.permute.xlu1 %1783 }
 0xf8f   :  { %1816 = vmatpush.msra.mxu1 %v1784_v37 }
 0xf90   :  { %3010 = vmatmul.msk.f32.vlgmr.msra.gmra.mxu1 %vm408_vm14, %v1780_v60 }
 0xf91   :  { %2080 = vmatpush.msrb.mxu1 %v3150_v51  ;;  %v2050_v17 = vpop.permute.xlu0 %2049 }
 0xf93   :  { %2081 = vmatpush.msrb.mxu1 %v3151_v29 }
 0xf95   :  { %2082 = vmatpush.msrb.mxu1 %v2050_v17 }
 0xf98   :  { %3011 = vmatmul.msk.f32.gmra.mxu1 %vm408_vm14, %v1781_v18 }
 0xf9e   :  { %v1958_v48 = vpop.permute.xlu2 %1957 }
 0xfa6   :  { %v2137_v20 = vpop.f32.mrf.mxu0  ;;  %v1960_v24 = vpop.permute.xlu2 %1959 }
 0xfa7   :  { %v2138_v23 = vadd.f32 %v2137_v20, %v3650_v49 }
 0xfa9   :  { %v2146_v28 = vsel %vm408_vm14, %v2138_v23, -inf }
 0xfaa   :  { %2147 = vmax.xlane.f32.xlu1 %v2146_v28 }
 0xfae   :  { %v2140_v31 = vpop.f32.mrf.mxu0 }
 0xfaf   :  { %v2141_v12 = vadd.f32 %v2140_v31, %v3650_v49  ;;  %v4405_v49 = vld [vmem:[%s4650_s8 + $0x1] ss:$0 sm:$0xff] }
 0xfb1   :  { %v2149_v21 = vsel %vm408_vm14, %v2141_v12, -inf }
 0xfb2   :  { %2150 = vmax.xlane.f32.xlu0 %v2149_v21 }
 0xfb9   :  { %v1776_v34 = vpop.xlane.xlu1 %1775 }
 0xfba   :  { %3309 = vrcp.f32 %v1776_v34 }
 0xfbb   :  { %3311 = vrcp.f32 %v2036_v5 }
 0xfc0   :  { %v3310_v35 = vpop.eup %3309 }
 0xfc1   :  { %v1782_v10 = vmul.f32 %v3310_v35, %v3302_v62  ;;  %v3312_v6 = vpop.eup %3311 }
 0xfc2   :  { %v2046_v22 = vmul.f32 %v3312_v6, %v4347_v11 }
 0xfc3   :  { %3012 = vmatmul.msk.f32.gmra.mxu1 %vm408_vm14, %v1782_v10 }
 0xfc6   :  { %v1962_v59 = vpop.permute.xlu0 %1961 }
 0xfcb   :  { %3028 = vmatmul.msk.f32.vlgmr.msrb.gmra.mxu1 %vm408_vm14, %v2046_v22 }
0x1003   :  { %v2211_v45 = vpop.f32.mrf.mxu2 }
0x1004   :  { %2223 = vrot.lane.b32.xlu2 %v2211_v45, %s3400_s23 }
0x100d   :  { %v1818_v52 = vpop.f32.mrf.mxu1 }
0x100e   :  { %v1966_v32 = vsel %vm369_vm12, %v1818_v52, %v1958_v48 }
0x100f   :  { %3045 = vmatmul.msk.f32.vlgmr.msra.gmra.mxu3 %vm141_vm1, %v1966_v32 }
0x1015   :  { %v1821_v50 = vpop.f32.mrf.mxu1 }
0x1016   :  { %v1967_v61 = vsel %vm369_vm12, %v1821_v50, %v1960_v24 }
0x1017   :  { %3046 = vmatmul.msk.f32.gmra.mxu3 %vm141_vm1, %v1967_v61 }
0x101d   :  { %v2148_v57 = vpop.xlane.xlu1 %2147 }
0x101e   :  { %v2153_v56 = vsub.f32 %v2138_v23, %v2148_v57 }
0x1020   :  { %v2157_v2 = vmul.f32 1.442695, %v2153_v56 }
0x1022   :  { %3313 = vpow2.f32 %v2157_v2 }
0x1025   :  { %v2151_v11 = vpop.xlane.xlu0 %2150 }
0x1026   :  { %v2154_v46 = vsub.f32 %v2141_v12, %v2151_v11 }
0x1028   :  { %v3314_v63 = vpop.eup %3313  ;;  %v2159_v1 = vmul.f32 1.442695, %v2154_v46 }
0x1029   :  { %v2164_v8 = vsel %vm408_vm14, %v3314_v63, 0.0 }
0x102a   :  { %2165 = vadd.xlane.f32.xlu1 %v2164_v8  ;;  %3315 = vpow2.f32 %v2159_v1 }
0x102d   :  { %2020 = vmax.xlane.f32.xlu2 %v2019_v55 }
0x1030   :  { %v3316_v62 = vpop.eup %3315 }
0x1031   :  { %v2167_v53 = vsel %vm408_vm14, %v3316_v62, 0.0 }
0x1032   :  { %2023 = vmax.xlane.f32.xlu1 %v2022_v58 }
0x103a   :  { %2168 = vadd.xlane.f32.xlu1 %v2167_v53 }
0x1040   :  { %v1824_v40 = vpop.f32.mrf.mxu1 }
0x1041   :  { %v1968_v26 = vsel %vm369_vm12, %v1824_v40, %v1962_v59 }
0x1042   :  { %3047 = vmatmul.msk.f32.gmra.mxu3 %vm141_vm1, %v1968_v26 }
0x1048   :  { %v2084_v9 = vpop.f32.mrf.mxu1 }
0x105e   :  { %v2224_v16 = vpop.permute.xlu2 %2223 }
0x105f   :  { %v2232_v47 = vsel %vm369_vm12, %v2084_v9, %v2224_v16 }
0x1060   :  { %3048 = vmatmul.msk.f32.gmra.mxu3 %vm141_vm1, %v2232_v47 }
0x1092   :  { %v2280_v4 = vpop.f32.mrf.mxu3 }
0x1093   :  { %v2281_v15 = vadd.f32 %v4405_v49, %v2280_v4  ;;  %v3056_v4 = vld [vmem:[%s4653_s11 + $0x38] sm:$0xff] }
0x1094   :  { %2498 = vmatpush.msra.mxu1 %v3056_v4 }
0x1095   :  { %v4409_v7 = vadd.f32 %v2281_v15, %v4088_v33  ;;  %v3055_v15 = vld [vmem:[%s4653_s11 + $0x30] sm:$0xff] }
0x1096   :  { %2499 = vmatpush.msra.mxu1 %v3055_v15 }
0x1097   :  { %v2308_v43 = vsel %vm141_vm1, %v4409_v7, 0.0 }
0x1098   :  { %2309 = vadd.xlane.f32.xlu0 %v2308_v43  ;;  %v3054_v43 = vld [vmem:[%s4653_s11 + $0x28] sm:$0xff] }
0x1099   :  { %2500 = vmatpush.msra.mxu1 %v3054_v43 }
0x109a   :  { %v2283_v12 = vpop.f32.mrf.mxu3 }
0x109b   :  { %v2284_v34 = vadd.f32 %v4405_v49, %v2283_v12  ;;  %v4476_v12 = vld [vmem:[%s4652_s10 + $0x1] ss:$0 sm:$0xff] }
0x109d   :  { %v2166_v5 = vpop.xlane.xlu1 %2165  ;;  %v2299_v6 = vadd.f32 %v2284_v34, %v4093_v36 }
0x109e   :  { %3317 = vrcp.f32 %v2166_v5  ;;  %v3053_v5 = vld [vmem:[%s4653_s11 + $0x20] sm:$0xff] }
0x109f   :  { %v2311_v22 = vsel %vm141_vm1, %v2299_v6, 0.0  ;;  %2501 = vmatpush.msra.mxu1 %v3053_v5 }
0x10a0   :  { %v2021_v60 = vpop.xlane.xlu2 %2020 }
0x10a1   :  { %v2026_v37 = vsub.f32 %v2011_v54, %v2021_v60 }
0x10a3   :  { %v2030_v51 = vmul.f32 1.442695, %v2026_v37 }
0x10a4   :  { %v3318_v29 = vpop.eup %3317 }
0x10a5   :  { %3319 = vpow2.f32 %v2030_v51  ;;  %v2024_v3 = vpop.xlane.xlu1 %2023  ;;  %v2174_v17 = vmul.f32 %v3318_v29, %v3314_v63 }
0x10a6   :  { %v2027_v18 = vsub.f32 %v2014_v0, %v2024_v3 }
0x10a7   :  { %3038 = vmatmul.msk.f32.gmra.mxu2 %vm408_vm14, %v2174_v17 }
0x10a8   :  { %v2032_v20 = vmul.f32 1.442695, %v2027_v18 }
0x10aa   :  { %3321 = vpow2.f32 %v2032_v20 }
0x10ab   :  { %v3320_v23 = vpop.eup %3319 }
0x10ac   :  { %v2037_v33 = vsel %vm408_vm14, %v3320_v23, 0.0 }
0x10ad   :  { %v2169_v28 = vpop.xlane.xlu1 %2168  ;;  %2038 = vadd.xlane.f32.xlu1 %v2037_v33  ;;  %v4471_v33 = vld [vmem:[%s4651_s9 + $0x1] ss:$0 sm:$0xff] }
0x10ae   :  { %3323 = vrcp.f32 %v2169_v28 }
0x10b0   :  { %v3322_v31 = vpop.eup %3321 }
0x10b1   :  { %v2040_v35 = vsel %vm408_vm14, %v3322_v31, 0.0 }
0x10b4   :  { %v3324_v21 = vpop.eup %3323 }
0x10b5   :  { %2041 = vadd.xlane.f32.xlu1 %v2040_v35  ;;  %v2175_v10 = vmul.f32 %v3324_v21, %v3316_v62 }
0x10b7   :  { %3039 = vmatmul.msk.f32.gmra.mxu2 %vm408_vm14, %v2175_v10 }
0x10bd   :  { %2312 = vadd.xlane.f32.xlu1 %v2311_v22 }
0x10c5   :  { %v2286_v44 = vpop.f32.mrf.mxu3 }
0x10c6   :  { %v2287_v39 = vadd.f32 %v4405_v49, %v2286_v44 }
0x10c8   :  { %v2300_v19 = vadd.f32 %v2287_v39, %v4098_v38 }
0x10ca   :  { %v2314_v42 = vsel %vm141_vm1, %v2300_v19, 0.0 }
0x10cb   :  { %2315 = vadd.xlane.f32.xlu2 %v2314_v42 }
0x10e3   :  { %v2289_v45 = vpop.f32.mrf.mxu3 }
0x10e4   :  { %v2290_v48 = vadd.f32 %v4405_v49, %v2289_v45 }
0x10e6   :  { %v4425_v52 = vadd.f32 %v2290_v48, %v4103_v41 }
0x10e8   :  { %v2317_v36 = vsel %vm141_vm1, %v4425_v52, 0.0 }
0x10e9   :  { %2318 = vadd.xlane.f32.xlu0 %v2317_v36 }
0x110b   :  { %v2310_v32 = vpop.xlane.xlu0 %2309 }
0x110c   :  { %v2326_v24 = vmul.f32 %v2310_v32, %v3553_v27 }
0x110e   :  { %v2332_v50 = vsub.f32 %v4409_v7, %v2326_v24 }
0x1110   :  { %v2338_v61 = vmul.f32 %v2332_v50, %v2332_v50 }
0x1112   :  { %v2344_v38 = vsel %vm141_vm1, %v2338_v61, 0.0 }
0x1113   :  { %2345 = vadd.xlane.f32.xlu1 %v2344_v38 }
0x1120   :  { %v2039_v59 = vpop.xlane.xlu1 %2038 }
0x1121   :  { %3325 = vrcp.f32 %v2039_v59 }
0x1127   :  { %v3326_v57 = vpop.eup %3325 }
0x1128   :  { %v2042_v56 = vpop.xlane.xlu1 %2041  ;;  %v2047_v25 = vmul.f32 %v3326_v57, %v3320_v23 }
0x1129   :  { %3327 = vrcp.f32 %v2042_v56 }
0x112a   :  { %3029 = vmatmul.msk.f32.gmra.mxu1 %vm408_vm14, %v2047_v25  ;;  %v2214_v62 = vpop.f32.mrf.mxu2 }
0x112f   :  { %v3328_v41 = vpop.eup %3327 }
0x1130   :  { %v2313_v2 = vpop.xlane.xlu1 %2312  ;;  %v2048_v11 = vmul.f32 %v3328_v41, %v3322_v31 }
0x1131   :  { %v2327_v63 = vmul.f32 %v2313_v2, %v3553_v27 }
0x1132   :  { %3030 = vmatmul.msk.f32.gmra.mxu1 %vm408_vm14, %v2048_v11 }
0x1133   :  { %v4435_v54 = vsub.f32 %v2299_v6, %v2327_v63 }
0x1135   :  { %v2339_v46 = vmul.f32 %v4435_v54, %v4435_v54 }
0x1137   :  { %v2347_v8 = vsel %vm141_vm1, %v2339_v46, 0.0 }
0x1138   :  { %2348 = vadd.xlane.f32.xlu2 %v2347_v8 }
0x113a   :  { %v2217_v53 = vpop.f32.mrf.mxu2 }
0x113e   :  { %v2316_v13 = vpop.xlane.xlu2 %2315 }
0x113f   :  { %v2328_v1 = vmul.f32 %v2316_v13, %v3553_v27 }
0x1141   :  { %v4441_v55 = vsub.f32 %v2300_v19, %v2328_v1 }
0x1143   :  { %v2340_v0 = vmul.f32 %v4441_v55, %v4441_v55 }
0x1145   :  { %v2350_v58 = vsel %vm141_vm1, %v2340_v0, 0.0 }
0x1146   :  { %2351 = vadd.xlane.f32.xlu0 %v2350_v58 }
0x1150   :  { %2225 = vrot.lane.b32.xlu2 %v2214_v62, %s3400_s23 }
0x115a   :  { %2227 = vrot.lane.b32.xlu0 %v2217_v53, %s3400_s23 }
0x115c   :  { %v2319_v40 = vpop.xlane.xlu0 %2318 }
0x115d   :  { %v2329_v26 = vmul.f32 %v2319_v40, %v3553_v27 }
0x115f   :  { %v4450_v9 = vsub.f32 %v4425_v52, %v2329_v26 }
0x1161   :  { %v2341_v16 = vmul.f32 %v4450_v9, %v4450_v9 }
0x1163   :  { %v2353_v47 = vsel %vm141_vm1, %v2341_v16, 0.0 }
0x1164   :  { %2354 = vadd.xlane.f32.xlu1 %v2353_v47 }
0x1186   :  { %v2346_v60 = vpop.xlane.xlu1 %2345 }
0x1187   :  { %v2362_v37 = vmul.f32 %v2346_v60, %v3553_v27 }
0x1189   :  { %v2368_v51 = vadd.f32 1e-06, %v2362_v37 }
0x118b   :  { %3329 = vrsqrt.f32 %v2368_v51  ;;  %vm2380_vm15 = vweird.f32 %v2368_v51 }
0x1191   :  { %v3330_v29 = vpop.eup %3329 }
0x1192   :  { %v2375_v3 = vmul.f32 %v3330_v29, %v2368_v51  ;;  %vm2381_vm14 = vweird.f32 %v3330_v29 }
0x1193   :  { %vm2382_vm2 = vmor %vm2380_vm15, %vm2381_vm14 }
0x1194   :  { %v2376_v17 = vmul.f32 %v3330_v29, %v2375_v3 }
0x1196   :  { %v2377_v18 = vmul.f32 0.5, %v2376_v17 }
0x1198   :  { %v2378_v20 = vsub.f32 1.5, %v2377_v18 }
0x119a   :  { %v2379_v23 = vmul.f32 %v3330_v29, %v2378_v20 }
0x119c   :  { %v2383_v28 = vsel %vm2382_vm2, %v3330_v29, %v2379_v23  ;;  %v4503_v29 = vld [vmem:[%s4654_s12 + $0x1] ss:$0 sm:$0xff] }
0x119d   :  { %v2434_v31 = vmul.f32 %v2383_v28, %v2332_v50  ;;  %v3083_v28 = vld [vmem:[%s4655_s13 + $0x78] sm:$0xff] }
0x119e   :  { %2801 = vmatpush.msrb.mxu0 %v3083_v28 }
0x119f   :  { %v2443_v21 = vmul.f32 %v4471_v33, %v2434_v31  ;;  %v3082_v31 = vld [vmem:[%s4655_s13 + $0x70] sm:$0xff] }
0x11a0   :  { %2802 = vmatpush.msrb.mxu0 %v3082_v31 }
0x11a1   :  { %v2452_v34 = vadd.f32 %v4476_v12, %v2443_v21  ;;  %v3081_v21 = vld [vmem:[%s4655_s13 + $0x68] sm:$0xff] }
0x11a2   :  { %2803 = vmatpush.msrb.mxu0 %v3081_v21 }
0x11a3   :  { %3058 = vmatmul.msk.f32.vlgmr.msra.gmra.mxu1 %vm141_vm1, %v2452_v34 }
0x11a7   :  { %v2087_v22 = vpop.f32.mrf.mxu1 }
0x11ab   :  { %v2349_v35 = vpop.xlane.xlu2 %2348 }
0x11ac   :  { %v2363_v10 = vmul.f32 %v2349_v35, %v3553_v27  ;;  %v3080_v35 = vld [vmem:[%s4655_s13 + $0x60] sm:$0xff] }
0x11ad   :  { %2804 = vmatpush.msrb.mxu0 %v3080_v35 }
0x11ae   :  { %v2369_v6 = vadd.f32 1e-06, %v2363_v10 }
0x11af   :  { %v2090_v46 = vpop.f32.mrf.mxu1 }
0x11b0   :  { %3331 = vrsqrt.f32 %v2369_v6  ;;  %vm2390_vm4 = vweird.f32 %v2369_v6 }
0x11b3   :  { %v2226_v44 = vpop.permute.xlu2 %2225 }
0x11b4   :  { %v2233_v39 = vsel %vm369_vm12, %v2087_v22, %v2226_v44 }
0x11b5   :  { %3049 = vmatmul.msk.f32.gmra.mxu3 %vm141_vm1, %v2233_v39  ;;  %v3078_v39 = vld [vmem:[%s4655_s13 + $0x50] sm:$0xff] }
0x11b6   :  { %v3332_v19 = vpop.eup %3331 }
0x11b7   :  { %v2385_v42 = vmul.f32 %v3332_v19, %v2369_v6  ;;  %vm2391_vm3 = vweird.f32 %v3332_v19  ;;  %v3079_v6 = vld [vmem:[%s4655_s13 + $0x58] sm:$0xff] }
0x11b8   :  { %vm2392_vm5 = vmor %vm2390_vm4, %vm2391_vm3  ;;  %2805 = vmatpush.msrb.mxu0 %v3079_v6 }
0x11b9   :  { %v2386_v45 = vmul.f32 %v3332_v19, %v2385_v42  ;;  %v2352_v48 = vpop.xlane.xlu0 %2351 }
0x11ba   :  { %v2364_v36 = vmul.f32 %v2352_v48, %v3553_v27  ;;  %2806 = vmatpush.msrb.mxu0 %v3078_v39 }
0x11bb   :  { %v2387_v32 = vmul.f32 0.5, %v2386_v45  ;;  %v3077_v45 = vld [vmem:[%s4655_s13 + $0x48] sm:$0xff] }
0x11bc   :  { %v2370_v24 = vadd.f32 1e-06, %v2364_v36  ;;  %2807 = vmatpush.msrb.mxu0 %v3077_v45 }
0x11bd   :  { %v2388_v50 = vsub.f32 1.5, %v2387_v32 }
0x11be   :  { %3333 = vrsqrt.f32 %v2370_v24  ;;  %vm2400_vm7 = vweird.f32 %v2370_v24 }
0x11bf   :  { %v2389_v61 = vmul.f32 %v3332_v19, %v2388_v50  ;;  %v3076_v50 = vld [vmem:[%s4655_s13 + $0x40] sm:$0xff] }
0x11c0   :  { %2808 = vmatpush.msrb.mxu0 %v3076_v50 }
0x11c1   :  { %v2393_v38 = vsel %vm2392_vm5, %v3332_v19, %v2389_v61 }
0x11c2   :  { %v2435_v59 = vmul.f32 %v2393_v38, %v4435_v54 }
0x11c4   :  { %v3334_v57 = vpop.eup %3333  ;;  %v2444_v56 = vmul.f32 %v4471_v33, %v2435_v59 }
0x11c5   :  { %v2395_v25 = vmul.f32 %v3334_v57, %v2370_v24  ;;  %vm2401_vm6 = vweird.f32 %v3334_v57 }
0x11c6   :  { %v2453_v41 = vadd.f32 %v4476_v12, %v2444_v56  ;;  %vm2402_vm8 = vmor %vm2400_vm7, %vm2401_vm6 }
0x11c7   :  { %v2396_v2 = vmul.f32 %v3334_v57, %v2395_v25 }
0x11c8   :  { %3059 = vmatmul.msk.f32.gmra.mxu1 %vm141_vm1, %v2453_v41 }
0x11c9   :  { %v2397_v11 = vmul.f32 0.5, %v2396_v2 }
0x11cb   :  { %v2398_v63 = vsub.f32 1.5, %v2397_v11 }
0x11cc   :  { %v2228_v8 = vpop.permute.xlu0 %2227 }
0x11cd   :  { %v2399_v13 = vmul.f32 %v3334_v57, %v2398_v63  ;;  %v2234_v1 = vsel %vm369_vm12, %v2090_v46, %v2228_v8 }
0x11ce   :  { %3050 = vmatmul.msk.f32.gmra.mxu3 %vm141_vm1, %v2234_v1 }
0x11cf   :  { %v2403_v54 = vsel %vm2402_vm8, %v3334_v57, %v2399_v13 }
0x11d0   :  { %v2436_v0 = vmul.f32 %v2403_v54, %v4441_v55 }
0x11d2   :  { %v2445_v58 = vmul.f32 %v4471_v33, %v2436_v0 }
0x11d4   :  { %v2454_v62 = vadd.f32 %v4476_v12, %v2445_v58 }
0x11d6   :  { %3060 = vmatmul.msk.f32.gmra.mxu1 %vm141_vm1, %v2454_v62 }
0x11d7   :  { %v2355_v53 = vpop.xlane.xlu1 %2354 }
0x11d8   :  { %v2365_v40 = vmul.f32 %v2355_v53, %v3553_v27 }
0x11da   :  { %v2371_v26 = vadd.f32 1e-06, %v2365_v40 }
0x11dc   :  { %3335 = vrsqrt.f32 %v2371_v26  ;;  %vm2410_vm9 = vweird.f32 %v2371_v26 }
0x11e2   :  { %v3336_v16 = vpop.eup %3335 }
0x11e3   :  { %v2405_v47 = vmul.f32 %v3336_v16, %v2371_v26  ;;  %vm2411_vm12 = vweird.f32 %v3336_v16 }
0x11e4   :  { %vm2412_vm10 = vmor %vm2410_vm9, %vm2411_vm12 }
0x11e5   :  { %v2406_v4 = vmul.f32 %v3336_v16, %v2405_v47 }
0x11e7   :  { %v2407_v15 = vmul.f32 0.5, %v2406_v4 }
0x11e9   :  { %v2408_v43 = vsub.f32 1.5, %v2407_v15 }
0x11eb   :  { %v2409_v5 = vmul.f32 %v3336_v16, %v2408_v43 }
0x11ed   :  { %v2413_v55 = vsel %vm2412_vm10, %v3336_v16, %v2409_v5 }
0x11ee   :  { %v2437_v60 = vmul.f32 %v2413_v55, %v4450_v9 }
0x11f0   :  { %v2446_v37 = vmul.f32 %v4471_v33, %v2437_v60 }
0x11f2   :  { %v2455_v51 = vadd.f32 %v4476_v12, %v2446_v37 }
0x11f4   :  { %3061 = vmatmul.msk.f32.gmra.mxu1 %vm141_vm1, %v2455_v51 }
0x1220   :  { %v2503_v3 = vpop.f32.mrf.mxu1 }
0x1221   :  { %v4506_v17 = vadd.f32 %v4503_v29, %v2503_v3 }
0x1223   :  { %v4509_v18 = vmul.f32 0.70710677, %v4506_v17  ;;  %v2521_v3 = vmul.f32 0.5, %v4506_v17 }
0x1225   :  { %v2533_v9 = vand.u32 2147483647, %v4509_v18  ;;  %vm2731_vm2 = vcmp.lt.f32.partialorder %v4509_v18, 0.0 }
0x1227   :  { %v2539_v20 = vmul.f32 0.3275911, %v2533_v9  ;;  %v2695_v59 = vsub.f32 0.0, %v2533_v9 }
0x1229   :  { %v2545_v23 = vadd.f32 1.0, %v2539_v20  ;;  %v2701_v2 = vmul.f32 %v2695_v59, %v2533_v9 }
0x122b   :  { %3337 = vrcp.f32 %v2545_v23  ;;  %v2562_v44 = vand.u32 2147483648, %v2545_v23  ;;  %v2560_v42 = vand.u32 2147483647, %v2545_v23  ;;  %vm2556_vm13 = vweird.f32 %v2545_v23 }
0x122c   :  { %v2707_v46 = vmul.f32 1.442695, %v2701_v2 }
0x122d   :  { %v2563_v32 = vor.u32 1.1754944e-38, %v2562_v44  ;;  %vm2561_vm15 = vcmp.eq.f32.partialorder %v2560_v42, 8.507059e+37 }
0x122e   :  { %3339 = vpow2.f32 %v2707_v46 }
0x1231   :  { %v3338_v34 = vpop.eup %3337 }
0x1232   :  { %v2552_v10 = vmul.f32 %v3338_v34, %v2545_v23  ;;  %vm2557_vm11 = vweird.f32 %v3338_v34 }
0x1233   :  { %vm2558_vm14 = vmor %vm2556_vm13, %vm2557_vm11 }
0x1234   :  { %v2553_v22 = vsub.f32 1.0, %v2552_v10  ;;  %v3340_v26 = vpop.eup %3339 }
0x1236   :  { %v2554_v19 = vmul.f32 %v3338_v34, %v2553_v22 }
0x1238   :  { %v2555_v48 = vadd.f32 %v3338_v34, %v2554_v19  ;;  %v2292_v36 = vpop.f32.mrf.mxu3 }
0x1239   :  { %v2293_v24 = vadd.f32 %v4405_v49, %v2292_v36 }
0x123a   :  { %v2559_v61 = vsel %vm2558_vm14, %v3338_v34, %v2555_v48 }
0x123b   :  { %v2564_v38 = vsel %vm2561_vm15, %v2563_v32, %v2559_v61  ;;  %v4538_v57 = vadd.f32 %v2293_v24, %v4108_v14 }
0x123c   :  { %v2641_v56 = vmul.f32 1.0614054, %v2564_v38 }
0x123d   :  { %v2320_v25 = vsel %vm141_vm1, %v4538_v57, 0.0 }
0x123e   :  { %v3064_v41 = vadd.f32 -1.4531521, %v2641_v56  ;;  %2321 = vadd.xlane.f32.xlu1 %v2320_v25 }
0x1240   :  { %v2653_v11 = vmul.f32 %v3064_v41, %v2564_v38 }
0x1242   :  { %v2659_v63 = vadd.f32 1.4214138, %v2653_v11 }
0x1244   :  { %v2665_v8 = vmul.f32 %v2659_v63, %v2564_v38 }
0x1245   :  { %v2506_v13 = vpop.f32.mrf.mxu1 }
0x1246   :  { %v3070_v1 = vadd.f32 -0.28449672, %v2665_v8  ;;  %v4543_v54 = vadd.f32 %v4503_v29, %v2506_v13 }
0x1248   :  { %v2677_v0 = vmul.f32 %v3070_v1, %v2564_v38  ;;  %v4546_v14 = vmul.f32 0.70710677, %v4543_v54 }
0x124a   :  { %v2683_v58 = vadd.f32 0.2548296, %v2677_v0  ;;  %v2534_v62 = vand.u32 2147483647, %v4546_v14  ;;  %vm2732_vm10 = vcmp.lt.f32.partialorder %v4546_v14, 0.0 }
0x124c   :  { %v2689_v53 = vmul.f32 %v2683_v58, %v2564_v38  ;;  %v2540_v40 = vmul.f32 0.3275911, %v2534_v62  ;;  %v2696_v39 = vsub.f32 0.0, %v2534_v62 }
0x124e   :  { %v2719_v16 = vmul.f32 %v3340_v26, %v2689_v53  ;;  %v2546_v47 = vadd.f32 1.0, %v2540_v40  ;;  %v2702_v36 = vmul.f32 %v2696_v39, %v2534_v62 }
0x1250   :  { %v2725_v4 = vsub.f32 1.0, %v2719_v16  ;;  %3341 = vrcp.f32 %v2546_v47  ;;  %v2577_v21 = vand.u32 2147483648, %v2546_v47  ;;  %v2575_v17 = vand.u32 2147483647, %v2546_v47 }
0x1251   :  { %v2295_v15 = vpop.f32.mrf.mxu3  ;;  %vm2571_vm4 = vweird.f32 %v2546_v47  ;;  %v2709_v38 = vmul.f32 1.442695, %v2702_v36 }
0x1252   :  { %v2737_v43 = vsub.f32 0.0, %v2725_v4  ;;  %v2296_v5 = vadd.f32 %v4405_v49, %v2295_v15  ;;  %v2578_v22 = vor.u32 1.1754944e-38, %v2577_v21  ;;  %vm2576_vm6 = vcmp.eq.f32.partialorder %v2575_v17, 8.507059e+37 }
0x1253   :  { %v2509_v55 = vpop.f32.mrf.mxu1  ;;  %v2522_v21 = vmul.f32 0.5, %v4543_v54 }
0x1254   :  { %v2743_v60 = vsel %vm2731_vm2, %v2737_v43, %v2725_v4  ;;  %v4552_v37 = vadd.f32 %v2296_v5, %v4113_v30  ;;  %v4555_v51 = vadd.f32 %v4503_v29, %v2509_v55 }
0x1255   :  { %v2749_v9 = vadd.f32 1.0, %v2743_v60 }
0x1256   :  { %v3342_v20 = vpop.eup %3341  ;;  %v4559_v23 = vmul.f32 0.70710677, %v4555_v51  ;;  %v2323_v49 = vsel %vm141_vm1, %v4552_v37, 0.0 }
0x1257   :  { %v2755_v28 = vmul.f32 %v2749_v9, %v2521_v3  ;;  %v2567_v18 = vmul.f32 %v3342_v20, %v2546_v47  ;;  %2324 = vadd.xlane.f32.xlu1 %v2323_v49  ;;  %vm2572_vm3 = vweird.f32 %v3342_v20 }
0x1258   :  { %v2535_v31 = vand.u32 2147483647, %v4559_v23  ;;  %vm2573_vm5 = vmor %vm2571_vm4, %vm2572_vm3  ;;  %vm2733_vm11 = vcmp.lt.f32.partialorder %v4559_v23, 0.0  ;;  %vm2829_vm4 = vcmask 1040384  }
0x1259   :  { %v2568_v30 = vsub.f32 1.0, %v2567_v18  ;;  %3085 = vmatmul.msk.f32.vlgmr.msrb.gmra.mxu0 %vm1426_vm0, %v2755_v28 }
0x125a   :  { %v2541_v34 = vmul.f32 0.3275911, %v2535_v31  ;;  %v2697_v13 = vsub.f32 0.0, %v2535_v31 }
0x125b   :  { %v2569_v35 = vmul.f32 %v3342_v20, %v2568_v30 }
0x125c   :  { %v2547_v10 = vadd.f32 1.0, %v2541_v34  ;;  %v2703_v16 = vmul.f32 %v2697_v13, %v2535_v31 }
0x125d   :  { %v2570_v6 = vadd.f32 %v3342_v20, %v2569_v35 }
0x125e   :  { %3343 = vrcp.f32 %v2547_v10  ;;  %v2592_v59 = vand.u32 2147483648, %v2547_v10  ;;  %v2590_v25 = vand.u32 2147483647, %v2547_v10  ;;  %vm2586_vm8 = vweird.f32 %v2547_v10 }
0x125f   :  { %v2574_v44 = vsel %vm2573_vm5, %v3342_v20, %v2570_v6  ;;  %3345 = vpow2.f32 %v2709_v38  ;;  %v2711_v60 = vmul.f32 1.442695, %v2703_v16  ;;  %vm2833_vm5 = vcmask 254976  }
0x1260   :  { %v2579_v19 = vsel %vm2576_vm6, %v2578_v22, %v2574_v44  ;;  %v2593_v63 = vor.u32 1.1754944e-38, %v2592_v59  ;;  %vm2591_vm9 = vcmp.eq.f32.partialorder %v2590_v25, 8.507059e+37 }
0x1261   :  { %v2642_v42 = vmul.f32 1.0614054, %v2579_v19  ;;  %3347 = vpow2.f32 %v2711_v60 }
0x1263   :  { %v3065_v45 = vadd.f32 -1.4531521, %v2642_v42 }
0x1264   :  { %v3344_v48 = vpop.eup %3343 }
0x1265   :  { %v2582_v32 = vmul.f32 %v3344_v48, %v2547_v10  ;;  %v2654_v24 = vmul.f32 %v3065_v45, %v2579_v19  ;;  %vm2587_vm7 = vweird.f32 %v3344_v48  ;;  %v3346_v26 = vpop.eup %3345 }
0x1266   :  { %vm2588_vm12 = vmor %vm2586_vm8, %vm2587_vm7 }
0x1267   :  { %v2583_v50 = vsub.f32 1.0, %v2582_v32  ;;  %v2660_v61 = vadd.f32 1.4214138, %v2654_v24  ;;  %v3348_v6 = vpop.eup %3347  ;;  %v2523_v32 = vmul.f32 0.5, %v4555_v51 }
0x1269   :  { %v2584_v56 = vmul.f32 %v3344_v48, %v2583_v50  ;;  %v2666_v41 = vmul.f32 %v2660_v61, %v2579_v19 }
0x126b   :  { %v3071_v2 = vadd.f32 -0.28449672, %v2666_v41  ;;  %v2585_v11 = vadd.f32 %v3344_v48, %v2584_v56 }
0x126d   :  { %v2678_v46 = vmul.f32 %v3071_v2, %v2579_v19  ;;  %v2589_v8 = vsel %vm2588_vm12, %v3344_v48, %v2585_v11 }
0x126e   :  { %v2594_v1 = vsel %vm2591_vm9, %v2593_v63, %v2589_v8 }
0x126f   :  { %v2684_v0 = vadd.f32 0.2548296, %v2678_v46  ;;  %v2643_v58 = vmul.f32 1.0614054, %v2594_v1 }
0x1271   :  { %v2512_v62 = vpop.f32.mrf.mxu1  ;;  %v2690_v53 = vmul.f32 %v2684_v0, %v2579_v19  ;;  %v3066_v40 = vadd.f32 -1.4531521, %v2643_v58 }
0x1272   :  { %v4566_v47 = vadd.f32 %v4503_v29, %v2512_v62 }
0x1273   :  { %v2720_v4 = vmul.f32 %v3346_v26, %v2690_v53  ;;  %v2655_v15 = vmul.f32 %v3066_v40, %v2594_v1 }
0x1274   :  { %v4569_v43 = vmul.f32 0.70710677, %v4566_v47  ;;  %v2524_v16 = vmul.f32 0.5, %v4566_v47 }
0x1275   :  { %v2726_v5 = vsub.f32 1.0, %v2720_v4  ;;  %v2661_v55 = vadd.f32 1.4214138, %v2655_v15 }
0x1276   :  { %v2536_v3 = vand.u32 2147483647, %v4569_v43  ;;  %vm2734_vm3 = vcmp.lt.f32.partialorder %v4569_v43, 0.0 }
0x1277   :  { %v2738_v9 = vsub.f32 0.0, %v2726_v5  ;;  %v2667_v20 = vmul.f32 %v2661_v55, %v2594_v1 }
0x1278   :  { %v2542_v49 = vmul.f32 0.3275911, %v2536_v3  ;;  %v2698_v56 = vsub.f32 0.0, %v2536_v3 }
0x1279   :  { %v2744_v28 = vsel %vm2732_vm10, %v2738_v9, %v2726_v5  ;;  %v3072_v18 = vadd.f32 -0.28449672, %v2667_v20 }
0x127a   :  { %v2548_v31 = vadd.f32 1.0, %v2542_v49  ;;  %v2750_v30 = vadd.f32 1.0, %v2744_v28  ;;  %v2704_v2 = vmul.f32 %v2698_v56, %v2536_v3 }
0x127b   :  { %v2679_v34 = vmul.f32 %v3072_v18, %v2594_v1 }
0x127c   :  { %3349 = vrcp.f32 %v2548_v31  ;;  %v2756_v35 = vmul.f32 %v2750_v30, %v2522_v21  ;;  %v2607_v45 = vand.u32 2147483648, %v2548_v31  ;;  %v2605_v54 = vand.u32 2147483647, %v2548_v31 }
0x127d   :  { %v2685_v17 = vadd.f32 0.2548296, %v2679_v34  ;;  %vm2601_vm14 = vweird.f32 %v2548_v31  ;;  %v2713_v46 = vmul.f32 1.442695, %v2704_v2 }
0x127e   :  { %3086 = vmatmul.msk.f32.gmra.mxu0 %vm1426_vm0, %v2756_v35  ;;  %v2608_v61 = vor.u32 1.1754944e-38, %v2607_v45  ;;  %vm2606_vm2 = vcmp.eq.f32.partialorder %v2605_v54, 8.507059e+37 }
0x127f   :  { %v2691_v10 = vmul.f32 %v2685_v17, %v2594_v1  ;;  %3351 = vpow2.f32 %v2713_v46 }
0x1281   :  { %v2721_v22 = vmul.f32 %v3348_v6, %v2691_v10 }
0x1282   :  { %v3350_v44 = vpop.eup %3349 }
0x1283   :  { %v2597_v39 = vmul.f32 %v3350_v44, %v2548_v31  ;;  %v2727_v14 = vsub.f32 1.0, %v2721_v22  ;;  %vm2602_vm13 = vweird.f32 %v3350_v44 }
0x1284   :  { %vm2603_vm15 = vmor %vm2601_vm14, %vm2602_vm13 }
0x1285   :  { %v2598_v19 = vsub.f32 1.0, %v2597_v39  ;;  %v2739_v42 = vsub.f32 0.0, %v2727_v14  ;;  %v3352_v58 = vpop.eup %3351 }
0x1287   :  { %v2599_v48 = vmul.f32 %v3350_v44, %v2598_v19  ;;  %v2745_v36 = vsel %vm2733_vm11, %v2739_v42, %v2727_v14 }
0x1288   :  { %v2751_v24 = vadd.f32 1.0, %v2745_v36 }
0x1289   :  { %v2600_v50 = vadd.f32 %v3350_v44, %v2599_v48 }
0x128a   :  { %v2757_v38 = vmul.f32 %v2751_v24, %v2523_v32 }
0x128b   :  { %v2604_v59 = vsel %vm2603_vm15, %v3350_v44, %v2600_v50 }
0x128c   :  { %3087 = vmatmul.msk.f32.gmra.mxu0 %vm1426_vm0, %v2757_v38  ;;  %v2609_v25 = vsel %vm2606_vm2, %v2608_v61, %v2604_v59 }
0x128d   :  { %v2644_v23 = vmul.f32 1.0614054, %v2609_v25 }
0x128f   :  { %v3067_v41 = vadd.f32 -1.4531521, %v2644_v23 }
0x1291   :  { %v2656_v11 = vmul.f32 %v3067_v41, %v2609_v25 }
0x1293   :  { %v2662_v63 = vadd.f32 1.4214138, %v2656_v11 }
0x1295   :  { %v2668_v8 = vmul.f32 %v2662_v63, %v2609_v25 }
0x1297   :  { %v3073_v51 = vadd.f32 -0.28449672, %v2668_v8 }
0x1299   :  { %v2680_v13 = vmul.f32 %v3073_v51, %v2609_v25 }
0x129b   :  { %v2686_v1 = vadd.f32 0.2548296, %v2680_v13 }
0x129d   :  { %v2692_v0 = vmul.f32 %v2686_v1, %v2609_v25 }
0x129f   :  { %v2722_v62 = vmul.f32 %v3352_v58, %v2692_v0 }
0x12a1   :  { %v2728_v53 = vsub.f32 1.0, %v2722_v62 }
0x12a3   :  { %v2740_v40 = vsub.f32 0.0, %v2728_v53 }
0x12a5   :  { %v2746_v26 = vsel %vm2734_vm3, %v2740_v40, %v2728_v53 }
0x12a6   :  { %v2752_v4 = vadd.f32 1.0, %v2746_v26 }
0x12a8   :  { %v2758_v15 = vmul.f32 %v2752_v4, %v2524_v16 }
0x12aa   :  { %3088 = vmatmul.msk.f32.gmra.mxu0 %vm1426_vm0, %v2758_v15 }
0x12b1   :  { %v2322_v5 = vpop.xlane.xlu1 %2321 }
0x12b2   :  { %v2330_v55 = vmul.f32 %v2322_v5, %v3553_v27 }
0x12b4   :  { %v2336_v60 = vsub.f32 %v4538_v57, %v2330_v55  ;;  %v3167_v57 = vld [vmem:[%s4656_s14 + $0x1] ss:$0 sm:$0xff] }
0x12b6   :  { %v2342_v3 = vmul.f32 %v2336_v60, %v2336_v60 }
0x12b8   :  { %v2356_v9 = vsel %vm141_vm1, %v2342_v3, 0.0 }
0x12b9   :  { %2357 = vadd.xlane.f32.xlu1 %v2356_v9 }
0x12ca   :  { %v2325_v20 = vpop.xlane.xlu1 %2324 }
0x12cb   :  { %v2331_v49 = vmul.f32 %v2325_v20, %v3553_v27 }
0x12cd   :  { %v2337_v43 = vsub.f32 %v4552_v37, %v2331_v49 }
0x12cf   :  { %v2343_v28 = vmul.f32 %v2337_v43, %v2337_v43 }
0x12d1   :  { %v2359_v47 = vsel %vm141_vm1, %v2343_v28, 0.0 }
0x12d2   :  { %2360 = vadd.xlane.f32.xlu2 %v2359_v47 }
0x12d6   :  { %v2810_v18 = vpop.f32.mrf.mxu0 }
0x12d7   :  { %v2811_v34 = vadd.f32 %v3167_v57, %v2810_v18 }
0x12d9   :  { %v2824_v10 = vadd.f32 %v2811_v34, %v4409_v7 }
0x12fb   :  { %v2813_v31 = vpop.f32.mrf.mxu0 }
0x1309   :  { %v2815_v30 = vpop.f32.mrf.mxu0 }
0x1327   :  { %v2817_v21 = vpop.f32.mrf.mxu0 }
0x1328   :  { %v2818_v35 = vadd.f32 %v3167_v57, %v2817_v21 }
0x132a   :  { %v2825_v17 = vadd.f32 %v2818_v35, %v4425_v52 }
0x132c   :  { %v2827_v37 = vrot.slane %v2825_v17, 7  ;;  %v2358_v6 = vpop.xlane.xlu1 %2357 }
0x132d   :  { %v2366_v22 = vmul.f32 %v2358_v6, %v3553_v27 }
0x132e   :  { %v2830_v44 = vsel %vm2829_vm4, %v2824_v10, %v2827_v37 }
0x132f   :  { %v2372_v39 = vadd.f32 1e-06, %v2366_v22  ;;  %v2834_v14 = vsel %vm2833_vm5, %v2830_v44, 0.0 }
0x1330   :  { %2835 = vadd.xlane.f32.xlu0 %v2834_v14 }
0x1331   :  { %3353 = vrsqrt.f32 %v2372_v39  ;;  %vm2420_vm7 = vweird.f32 %v2372_v39 }
0x1337   :  { %v3354_v19 = vpop.eup %3353 }
0x1338   :  { %v2415_v42 = vmul.f32 %v3354_v19, %v2372_v39  ;;  %vm2421_vm6 = vweird.f32 %v3354_v19 }
0x1339   :  { %vm2422_vm8 = vmor %vm2420_vm7, %vm2421_vm6 }
0x133a   :  { %v2416_v45 = vmul.f32 %v3354_v19, %v2415_v42 }
0x133c   :  { %v2417_v48 = vmul.f32 0.5, %v2416_v45 }
0x133e   :  { %v2418_v54 = vsub.f32 1.5, %v2417_v48 }
0x1340   :  { %v2419_v52 = vmul.f32 %v3354_v19, %v2418_v54 }
0x1342   :  { %v2423_v7 = vsel %vm2422_vm8, %v3354_v19, %v2419_v52 }
0x1343   :  { %v2438_v36 = vmul.f32 %v2423_v7, %v2336_v60 }
0x1345   :  { %v2361_v32 = vpop.xlane.xlu2 %2360  ;;  %v2447_v24 = vmul.f32 %v4471_v33, %v2438_v36 }
0x1346   :  { %v2367_v50 = vmul.f32 %v2361_v32, %v3553_v27 }
0x1347   :  { %v2456_v61 = vadd.f32 %v4476_v12, %v2447_v24 }
0x1348   :  { %v2373_v38 = vadd.f32 1e-06, %v2367_v50 }
0x1349   :  { %3062 = vmatmul.msk.f32.gmra.mxu1 %vm141_vm1, %v2456_v61 }
0x134a   :  { %3355 = vrsqrt.f32 %v2373_v38  ;;  %vm2430_vm9 = vweird.f32 %v2373_v38 }
0x1350   :  { %v3356_v59 = vpop.eup %3355 }
0x1351   :  { %v2425_v56 = vmul.f32 %v3356_v59, %v2373_v38  ;;  %vm2431_vm12 = vweird.f32 %v3356_v59 }
0x1352   :  { %vm2432_vm10 = vmor %vm2430_vm9, %vm2431_vm12  ;;  %vm2895_vm9 = vcmask 74752  }
0x1353   :  { %v2426_v25 = vmul.f32 %v3356_v59, %v2425_v56 }
0x1355   :  { %v2427_v23 = vmul.f32 0.5, %v2426_v25 }
0x1357   :  { %v2428_v41 = vsub.f32 1.5, %v2427_v23 }
0x1359   :  { %v2429_v2 = vmul.f32 %v3356_v59, %v2428_v41 }
0x135b   :  { %v2433_v11 = vsel %vm2432_vm10, %v3356_v59, %v2429_v2 }
0x135c   :  { %v2439_v63 = vmul.f32 %v2433_v11, %v2337_v43 }
0x135e   :  { %v2448_v46 = vmul.f32 %v4471_v33, %v2439_v63 }
0x1360   :  { %v2457_v8 = vadd.f32 %v4476_v12, %v2448_v46 }
0x1362   :  { %3063 = vmatmul.msk.f32.gmra.mxu1 %vm141_vm1, %v2457_v8 }
0x13a3   :  { %v2836_v51 = vpop.xlane.xlu0 %2835 }
0x13a4   :  { %v2837_v13 = vmul.f32 %v2836_v51, %v3553_v27 }
0x13a6   :  { %v4602_v1 = vsub.f32 %v2830_v44, %v2837_v13 }
0x13a8   :  { %v2839_v0 = vmul.f32 %v4602_v1, %v4602_v1 }
0x13aa   :  { %v2840_v58 = vsel %vm2833_vm5, %v2839_v0, 0.0 }
0x13ab   :  { %2841 = vadd.xlane.f32.xlu1 %v2840_v58 }
0x13c6   :  { %v2515_v62 = vpop.f32.mrf.mxu1 }
0x13c7   :  { %v2516_v53 = vadd.f32 %v4503_v29, %v2515_v62 }
0x13c9   :  { %v2531_v40 = vmul.f32 0.70710677, %v2516_v53  ;;  %v2525_v25 = vmul.f32 0.5, %v2516_v53 }
0x13cb   :  { %v2537_v33 = vand.u32 2147483647, %v2531_v40  ;;  %vm2735_vm5 = vcmp.lt.f32.partialorder %v2531_v40, 0.0 }
0x13cd   :  { %v2543_v26 = vmul.f32 0.3275911, %v2537_v33  ;;  %v2699_v47 = vsub.f32 0.0, %v2537_v33 }
0x13cf   :  { %v2549_v12 = vadd.f32 1.0, %v2543_v26  ;;  %v2705_v21 = vmul.f32 %v2699_v47, %v2537_v33 }
0x13d1   :  { %3357 = vrcp.f32 %v2549_v12  ;;  %v2622_v5 = vand.u32 2147483648, %v2549_v12  ;;  %v2620_v60 = vand.u32 2147483647, %v2549_v12  ;;  %vm2616_vm13 = vweird.f32 %v2549_v12 }
0x13d2   :  { %v2715_v37 = vmul.f32 1.442695, %v2705_v21  ;;  %v3168_v21 = vld [vmem:[%s4657_s15] ss:$0 sm:$0xff]  ;;  %s2902_s15 = sshll.u32 %s3401_s2, 4  ;;  %s2903_s15 = int_to_ptr.vmem [resolvable:$true] %s2902_s15 }
0x13d3   :  { %v2623_v9 = vor.u32 1.1754944e-38, %v2622_v5  ;;  %vm2621_vm15 = vcmp.eq.f32.partialorder %v2620_v60, 8.507059e+37  ;;  %v2867_v5 = vld [vmem:[%s4659_s17 + $0x18] sm:$0xff]  ;;  %v2866_v60 = vld [vmem:[%s4659_s17 + $0x10] sm:$0xff] }
0x13d4   :  { %2887 = vmatpush.msrb.mxu2 %v2867_v5 }
0x13d6   :  { %2888 = vmatpush.msrb.mxu2 %v2866_v60 }
0x13d7   :  { %v3358_v16 = vpop.eup %3357 }
0x13d8   :  { %v2612_v4 = vmul.f32 %v3358_v16, %v2549_v12  ;;  %vm2617_vm11 = vweird.f32 %v3358_v16 }
0x13d9   :  { %vm2618_vm14 = vmor %vm2616_vm13, %vm2617_vm11 }
0x13da   :  { %v2613_v15 = vsub.f32 1.0, %v2612_v4 }
0x13dc   :  { %v2614_v55 = vmul.f32 %v3358_v16, %v2613_v15 }
0x13de   :  { %v2615_v3 = vadd.f32 %v3358_v16, %v2614_v55 }
0x13df   :  { %v2518_v20 = vpop.f32.mrf.mxu1 }
0x13e0   :  { %v2619_v49 = vsel %vm2618_vm14, %v3358_v16, %v2615_v3  ;;  %v4609_v43 = vadd.f32 %v4503_v29, %v2518_v20  ;;  %v2865_v3 = vld [vmem:[%s4659_s17 + $0x8] sm:$0xff] }
0x13e1   :  { %v2624_v28 = vsel %vm2621_vm15, %v2623_v9, %v2619_v49  ;;  %v2864_v9 = vld [vmem:[%s4659_s17] sm:$0xff]  ;;  %2889 = vmatpush.msrb.mxu2 %v2865_v3 }
0x13e2   :  { %v2645_v18 = vmul.f32 1.0614054, %v2624_v28  ;;  %v2532_v31 = vmul.f32 0.70710677, %v4609_v43  ;;  %v2526_v4 = vmul.f32 0.5, %v4609_v43 }
0x13e3   :  { %2890 = vmatpush.msrb.mxu2 %v2864_v9 }
0x13e4   :  { %v3068_v30 = vadd.f32 -1.4531521, %v2645_v18  ;;  %v2538_v57 = vand.u32 2147483647, %v2532_v31  ;;  %vm2736_vm7 = vcmp.lt.f32.partialorder %v2532_v31, 0.0 }
0x13e6   :  { %v2657_v34 = vmul.f32 %v3068_v30, %v2624_v28  ;;  %v2544_v35 = vmul.f32 0.3275911, %v2538_v57  ;;  %v2700_v56 = vsub.f32 0.0, %v2538_v57 }
0x13e8   :  { %v2663_v17 = vadd.f32 1.4214138, %v2657_v34  ;;  %v2550_v10 = vadd.f32 1.0, %v2544_v35  ;;  %v2706_v63 = vmul.f32 %v2700_v56, %v2538_v57 }
0x13ea   :  { %v2669_v6 = vmul.f32 %v2663_v17, %v2624_v28  ;;  %3359 = vrcp.f32 %v2550_v10  ;;  %v2637_v54 = vand.u32 2147483648, %v2550_v10  ;;  %v2635_v7 = vand.u32 2147483647, %v2550_v10 }
0x13eb   :  { %3361 = vpow2.f32 %v2715_v37  ;;  %vm2631_vm3 = vweird.f32 %v2550_v10  ;;  %v2717_v51 = vmul.f32 1.442695, %v2706_v63 }
0x13ec   :  { %v3074_v22 = vadd.f32 -0.28449672, %v2669_v6  ;;  %v2638_v50 = vor.u32 1.1754944e-38, %v2637_v54  ;;  %vm2636_vm6 = vcmp.eq.f32.partialorder %v2635_v7, 8.507059e+37 }
0x13ed   :  { %3363 = vpow2.f32 %v2717_v51 }
0x13ee   :  { %v2681_v44 = vmul.f32 %v3074_v22, %v2624_v28  ;;  %v3170_v22 = vld [vmem:[%s4660_s18] ss:$0 sm:$0xff] }
0x13f0   :  { %v3360_v29 = vpop.eup %3359  ;;  %v2687_v39 = vadd.f32 0.2548296, %v2681_v44 }
0x13f1   :  { %v2627_v14 = vmul.f32 %v3360_v29, %v2550_v10  ;;  %v3362_v42 = vpop.eup %3361  ;;  %vm2632_vm2 = vweird.f32 %v3360_v29 }
0x13f2   :  { %v2693_v19 = vmul.f32 %v2687_v39, %v2624_v28  ;;  %vm2633_vm4 = vmor %vm2631_vm3, %vm2632_vm2 }
0x13f3   :  { %v2628_v45 = vsub.f32 1.0, %v2627_v14  ;;  %v3364_v33 = vpop.eup %3363 }
0x13f4   :  { %v2723_v48 = vmul.f32 %v3362_v42, %v2693_v19 }
0x13f5   :  { %v2629_v52 = vmul.f32 %v3360_v29, %v2628_v45 }
0x13f6   :  { %v2729_v36 = vsub.f32 1.0, %v2723_v48 }
0x13f7   :  { %v2630_v32 = vadd.f32 %v3360_v29, %v2629_v52 }
0x13f8   :  { %v2741_v24 = vsub.f32 0.0, %v2729_v36 }
0x13f9   :  { %v2634_v61 = vsel %vm2633_vm4, %v3360_v29, %v2630_v32 }
0x13fa   :  { %v2747_v38 = vsel %vm2735_vm5, %v2741_v24, %v2729_v36  ;;  %v2639_v59 = vsel %vm2636_vm6, %v2638_v50, %v2634_v61 }
0x13fb   :  { %v2753_v23 = vadd.f32 1.0, %v2747_v38  ;;  %v2646_v41 = vmul.f32 1.0614054, %v2639_v59 }
0x13fd   :  { %v2759_v2 = vmul.f32 %v2753_v23, %v2525_v25  ;;  %v3069_v11 = vadd.f32 -1.4531521, %v2646_v41 }
0x13ff   :  { %v2658_v46 = vmul.f32 %v3069_v11, %v2639_v59  ;;  %3089 = vmatmul.msk.f32.gmra.mxu0 %vm1426_vm0, %v2759_v2 }
0x1401   :  { %v2664_v8 = vadd.f32 1.4214138, %v2658_v46 }
0x1403   :  { %v2670_v13 = vmul.f32 %v2664_v8, %v2639_v59 }
0x1405   :  { %v3075_v0 = vadd.f32 -0.28449672, %v2670_v13 }
0x1407   :  { %v2682_v58 = vmul.f32 %v3075_v0, %v2639_v59 }
0x1409   :  { %v2688_v62 = vadd.f32 0.2548296, %v2682_v58 }
0x140b   :  { %v2694_v40 = vmul.f32 %v2688_v62, %v2639_v59 }
0x140d   :  { %v2724_v26 = vmul.f32 %v3364_v33, %v2694_v40 }
0x140f   :  { %v2730_v12 = vsub.f32 1.0, %v2724_v26 }
0x1411   :  { %v2742_v53 = vsub.f32 0.0, %v2730_v12 }
0x1413   :  { %v2748_v16 = vsel %vm2736_vm7, %v2742_v53, %v2730_v12 }
0x1414   :  { %v2754_v15 = vadd.f32 1.0, %v2748_v16 }
0x1416   :  { %v2760_v55 = vmul.f32 %v2754_v15, %v2526_v4 }
0x1418   :  { %3090 = vmatmul.msk.f32.gmra.mxu0 %vm1426_vm0, %v2760_v55 }
0x141e   :  { %v2842_v20 = vpop.xlane.xlu1 %2841 }
0x141f   :  { %v2843_v49 = vmul.f32 %v2842_v20, %v3553_v27  ;;  %v3169_v27 = vld [vmem:[%s4658_s16] ss:$0 sm:$0xff] }
0x1421   :  { %v2844_v43 = vadd.f32 1e-06, %v2843_v49 }
0x1423   :  { %3365 = vrsqrt.f32 %v2844_v43  ;;  %vm2851_vm8 = vweird.f32 %v2844_v43 }
0x1429   :  { %v3366_v28 = vpop.eup %3365 }
0x142a   :  { %v2846_v47 = vmul.f32 %v3366_v28, %v2844_v43  ;;  %vm2852_vm0 = vweird.f32 %v3366_v28 }
0x142b   :  { %vm2853_vm12 = vmor %vm2851_vm8, %vm2852_vm0 }
0x142c   :  { %v2847_v18 = vmul.f32 %v3366_v28, %v2846_v47 }
0x142e   :  { %v2848_v31 = vmul.f32 0.5, %v2847_v18 }
0x1430   :  { %v2849_v30 = vsub.f32 1.5, %v2848_v31 }
0x1432   :  { %v2850_v57 = vmul.f32 %v3366_v28, %v2849_v30 }
0x1434   :  { %v2854_v34 = vsel %vm2853_vm12, %v3366_v28, %v2850_v57 }
0x1435   :  { %v2855_v35 = vmul.f32 %v2854_v34, %v4602_v1 }
0x1437   :  { %v2859_v17 = vmul.f32 %v3168_v21, %v2855_v35 }
0x1439   :  { %v2863_v10 = vadd.f32 %v3169_v27, %v2859_v17 }
0x143b   :  { %3091 = vmatmul.msk.f32.vlgmr.msrb.gmra.mxu2 %vm141_vm1, %v2863_v10 }
0x147c   :  { %v2820_v37 = vpop.f32.mrf.mxu0 }
0x1495   :  { %v2822_v6 = vpop.f32.mrf.mxu0 }
0x14be   :  { %v2892_v44 = vpop.f32.mrf.mxu2 }
0x14bf   :  { %v2893_v29 = vadd.f32 %v3170_v22, %v2892_v44 }
0x14c1   :  { %2896 = vst.msk [vmem:[#allocation2] sm:$0x3] %vm2895_vm9, %v2893_v29 }
0x14c2   :  { %2907 = dma.vmem_to_hbm [thread:$0]  %s2903_s15, 32, %s2905_s7, [#allocation3]  }
0x14c3   :  { %3391 = dma.done.wait [#allocation3], 32  }
0x14c4   :  { %3392 = vsyncadd [#allocation3], 4294967264 }
0x14c5   :  { %2912 = vsyncpa [#allocation3], 1 }

</bundles_post_ra>
